<compile_context>
chip_gen: v5e
topology: v5e:2x2
jax: 0.10.0
libtpu: 0.0.40
codegen_flags: <defaults>
</compile_context>

<pallas_src>
import math

import jax
import jax.numpy as jnp
import numpy as np
from jax.experimental import pallas as pl
from jax.experimental.pallas import tpu as pltpu

EPS = 1e-5

IN_DIM, HID_DIM, OUT_DIM = 28 * 28, 1200, 10
HID_PAD, OUT_PAD = 1280, 128          # lane(128)-aligned output padding
TILE = 256                            # fc1 N-tile == fc2 K-tile
N_TILES = HID_PAD // TILE             # 5 grid steps


def _bn_relu(h, gamma, beta):
    """Training-mode BatchNorm1d (biased batch var) + ReLU, folded affine, f32."""
    inv_b = jnp.float32(1.0 / h.shape[0])
    mu = jnp.sum(h, axis=0, keepdims=True) * inv_b
    var = jnp.maximum(jnp.sum(h * h, axis=0, keepdims=True) * inv_b - mu * mu, 0.0)
    scale = gamma * jax.lax.rsqrt(var + EPS)
    shift = beta - mu * scale
    return jnp.maximum(h * scale + shift, 0.0)


def _mlp_kernel(x_ref, w1_ref, bn1_ref, w2_ref, bn2_ref, w3_ref, b3_ref,
                out_ref, acc_ref):
    j = pl.program_id(0)

    @pl.when(j == 0)
    def _():
        acc_ref[...] = jnp.zeros_like(acc_ref)

    x = x_ref[...].astype(jnp.bfloat16)                       # (B, 784)

    # ----- fc1 column tile + bn1 + relu (per-column stats: exact per tile) -----
    h1 = jnp.dot(x, w1_ref[...], preferred_element_type=jnp.float32)
    h1 = _bn_relu(h1, bn1_ref[0:1, :], bn1_ref[1:2, :])        # (B, TILE) f32

    # ----- fc2 partial accumulation over the K tiles -----
    acc_ref[...] += jnp.dot(h1.astype(jnp.bfloat16), w2_ref[...],
                            preferred_element_type=jnp.float32)

    # ----- finalize: bn2 + relu + fc3 on the last tile -----
    @pl.when(j == pl.num_programs(0) - 1)
    def _():
        h2 = _bn_relu(acc_ref[...], bn2_ref[0:1, :], bn2_ref[1:2, :])
        out_ref[...] = (jnp.dot(h2.astype(jnp.bfloat16), w3_ref[...],
                                preferred_element_type=jnp.float32)
                        + b3_ref[...])


def net_forward(x, params):
    """x: (B, 1, 28, 28) or (B, 784). Returns (B, 10) f32 logits."""
    x = x.reshape(-1, IN_DIM).astype(jnp.float32)
    B = x.shape[0]
    w1, bn1, w2, bn2, w3, b3 = params

    flops = 2 * B * (IN_DIM * HID_PAD + HID_PAD * HID_PAD + HID_PAD * OUT_PAD)
    weight_bytes = 2 * (IN_DIM * HID_PAD + HID_PAD * HID_PAD + HID_PAD * OUT_PAD)
    small_bytes = 4 * (4 * HID_PAD + OUT_PAD)                 # bn params + b3
    act_bytes = B * (IN_DIM * 4 + OUT_PAD * 4)                # x in, logits out

    grid_spec = pltpu.PrefetchScalarGridSpec(
        num_scalar_prefetch=0,
        grid=(N_TILES,),
        in_specs=[
            pl.BlockSpec((B, IN_DIM), lambda j: (0, 0)),       # x (kept resident)
            pl.BlockSpec((IN_DIM, TILE), lambda j: (0, j)),    # w1 column tile
            pl.BlockSpec((2, TILE), lambda j: (0, j)),         # bn1 gamma/beta tile
            pl.BlockSpec((TILE, HID_PAD), lambda j: (j, 0)),   # w2 row tile
            pl.BlockSpec((2, HID_PAD), lambda j: (0, 0)),      # bn2 gamma/beta
            pl.BlockSpec((HID_PAD, OUT_PAD), lambda j: (0, 0)),  # w3
            pl.BlockSpec((1, OUT_PAD), lambda j: (0, 0)),      # b3
        ],
        out_specs=pl.BlockSpec((B, OUT_PAD), lambda j: (0, 0)),
        scratch_shapes=[pltpu.VMEM((B, HID_PAD), jnp.float32)],  # fc2 accumulator
    )

    out = pl.pallas_call(
        _mlp_kernel,
        out_shape=jax.ShapeDtypeStruct((B, OUT_PAD), jnp.float32),
        grid_spec=grid_spec,
        compiler_params=pltpu.CompilerParams(
            dimension_semantics=("arbitrary",),      # reduction axis (fc2 K)
            vmem_limit_bytes=32 << 20),
        cost_estimate=pl.CostEstimate(
            flops=flops,
            transcendentals=2 * HID_PAD,             # rsqrt per BN column
            bytes_accessed=weight_bytes + small_bytes + act_bytes),
    )(x, w1, bn1, w2, bn2, w3, b3)
    return out[:, :OUT_DIM]


def _pad2(a, shape):
    out = jnp.zeros(shape, a.dtype)
    return out.at[:a.shape[0], :a.shape[1]].set(a)


def init_params(key):
    k1, k2, k3 = jax.random.split(key, 3)
    std1 = 0.1 * math.sqrt(2.0 / IN_DIM)
    std2 = 0.1 * math.sqrt(2.0 / HID_DIM)
    std3 = 0.0001 * math.sqrt(2.0 / HID_DIM)

    # Weights stored as (in, out), bf16 for the MXU, output dims zero-padded to
    # lane multiples (padded columns stay exactly 0 through BN + ReLU).
    w1 = _pad2(jax.random.normal(k1, (IN_DIM, HID_DIM), jnp.float32) * std1,
               (IN_DIM, HID_PAD)).astype(jnp.bfloat16)
    w2 = _pad2(jax.random.normal(k2, (HID_DIM, HID_DIM), jnp.float32) * std2,
               (HID_PAD, HID_PAD)).astype(jnp.bfloat16)
    w3 = _pad2(jax.random.normal(k3, (HID_DIM, OUT_DIM), jnp.float32) * std3,
               (HID_PAD, OUT_PAD)).astype(jnp.bfloat16)

    # Packed BN params: row 0 = gamma (=1), row 1 = beta (=0), f32.
    # fc1/fc2 biases are omitted: they are cancelled exactly by the BN mean
    # subtraction (and the module initializes them to 0 anyway).
    bn = jnp.concatenate([jnp.ones((1, HID_PAD), jnp.float32),
                          jnp.zeros((1, HID_PAD), jnp.float32)], axis=0)
    b3 = jnp.zeros((1, OUT_PAD), jnp.float32)
    return (w1, bn, w2, bn, w3, b3)


def _reference_forward(x, params):
    """Pure-JAX reference with identical numerics (bf16 matmul operands,
    f32 accumulation, folded training-mode BN) for a tight correctness check."""
    x = x.reshape(-1, IN_DIM).astype(jnp.float32)
    w1, bn1, w2, bn2, w3, b3 = params

    def dot(a, b):
        return jnp.dot(a.astype(jnp.bfloat16), b,
                       preferred_element_type=jnp.float32)

    def bn_relu(h, bn):
        g, be = bn[0:1, :], bn[1:2, :]
        inv_b = jnp.float32(1.0 / h.shape[0])
        mu = jnp.sum(h, axis=0, keepdims=True) * inv_b
        var = jnp.maximum(jnp.sum(h * h, axis=0, keepdims=True) * inv_b - mu * mu,
                          0.0)
        scale = g * jax.lax.rsqrt(var + EPS)
        shift = be - mu * scale
        return jnp.maximum(h * scale + shift, 0.0)

    h = bn_relu(dot(x, w1), bn1)
    h = bn_relu(dot(h, w2), bn2)
    return (dot(h, w3) + b3)[:, :OUT_DIM]


if __name__ == "__main__":
    key = jax.random.PRNGKey(0)
    pkey, xkey = jax.random.split(key)
    params = init_params(pkey)

    # Small batch of "MNIST-like" inputs: (B, 1, 28, 28)
    x = jax.random.normal(xkey, (8, 1, 28, 28), jnp.float32)

    out = jax.block_until_ready(net_forward(x, params))
    ref = jax.block_until_ready(_reference_forward(x, params))

    assert out.shape == (8, OUT_DIM), out.shape
    np.testing.assert_allclose(np.asarray(out), np.asarray(ref),
                               rtol=1e-2, atol=1e-6)
    print("KERNEL_OK")
</pallas_src>

<mosaic_0001>
module attributes {stable_mosaic.version = 11 : i64} {
  func.func @_mlp_kernel(%arg0: i32, %arg1: memref<8x784xf32, #tpu.memory_space<vmem>>, %arg2: memref<784x256xbf16, #tpu.memory_space<vmem>>, %arg3: memref<2x256xf32, #tpu.memory_space<vmem>>, %arg4: memref<256x1280xbf16, #tpu.memory_space<vmem>>, %arg5: memref<2x1280xf32, #tpu.memory_space<vmem>>, %arg6: memref<1280x128xbf16, #tpu.memory_space<vmem>>, %arg7: memref<1x128xf32, #tpu.memory_space<vmem>>, %arg8: memref<8x128xf32, #tpu.memory_space<vmem>>, %arg9: memref<8x1280xf32, #tpu.memory_space<vmem>>) attributes {dimension_semantics = [#tpu.dimension_semantics<arbitrary>], iteration_bounds = array<i64: 5>, scalar_prefetch = 0 : i64, scratch_operands = 1 : i64, tpu.core_type = #tpu.core_type<tc>, window_params = [{pipeline_mode = #tpu.pipeline_mode<synchronous>, transform_indices = @transform_0, window_bounds = array<i64: 8, 784>}, {transform_indices = @transform_1, window_bounds = array<i64: 784, 256>}, {transform_indices = @transform_2, window_bounds = array<i64: 2, 256>}, {transform_indices = @transform_3, window_bounds = array<i64: 256, 1280>}, {pipeline_mode = #tpu.pipeline_mode<synchronous>, transform_indices = @transform_4, window_bounds = array<i64: 2, 1280>}, {pipeline_mode = #tpu.pipeline_mode<synchronous>, transform_indices = @transform_5, window_bounds = array<i64: 1280, 128>}, {pipeline_mode = #tpu.pipeline_mode<synchronous>, transform_indices = @transform_6, window_bounds = array<i64: 1, 128>}, {pipeline_mode = #tpu.pipeline_mode<synchronous>, transform_indices = @transform_7, window_bounds = array<i64: 8, 128>}]} {
    %c0_i32 = arith.constant 0 : i32
    %0 = arith.cmpi eq, %arg0, %c0_i32 : i32
    %1 = arith.extui %0 : i1 to i32
    %c0_i32_0 = arith.constant 0 : i32
    %2 = arith.cmpi ne, %1, %c0_i32_0 : i32
    scf.if %2 {
      %cst_22 = arith.constant 0.000000e+00 : f32
      %43 = vector.broadcast %cst_22 : f32 to vector<8x1280xf32>
      %c0_23 = arith.constant 0 : index
      %c0_24 = arith.constant 0 : index
      %44 = vector.load %arg9[%c0_23, %c0_24] : memref<8x1280xf32, #tpu.memory_space<vmem>>, vector<8x1280xf32>
      tpu.vector_store %arg9[%c0_23, %c0_24], %43 {strides = array<i32>} : memref<8x1280xf32, #tpu.memory_space<vmem>>, vector<8x1280xf32>,
    } else {
    }
    %c0 = arith.constant 0 : index
    %c0_1 = arith.constant 0 : index
    %3 = vector.load %arg1[%c0, %c0_1] : memref<8x784xf32, #tpu.memory_space<vmem>>, vector<8x784xf32>
    %4 = arith.truncf %3 : vector<8x784xf32> to vector<8x784xbf16>
    %c0_2 = arith.constant 0 : index
    %c0_3 = arith.constant 0 : index
    %5 = vector.load %arg2[%c0_2, %c0_3] : memref<784x256xbf16, #tpu.memory_space<vmem>>, vector<784x256xbf16>
    %cst = arith.constant dense<0.000000e+00> : vector<8x256xf32>
    %6 = tpu.matmul %4, %5, %cst {dimension_numbers = #tpu.dot_dimension_numbers<[1], [0], [0], [1], [0, 0, 1, 1], [], []>} : vector<8x784xbf16>, vector<784x256xbf16>, vector<8x256xf32> -> vector<8x256xf32>
    %c0_4 = arith.constant 0 : index
    %c0_5 = arith.constant 0 : index
    %7 = vector.load %arg3[%c0_4, %c0_5] : memref<2x256xf32, #tpu.memory_space<vmem>>, vector<1x256xf32>
    %c1 = arith.constant 1 : index
    %c0_6 = arith.constant 0 : index
    %8 = vector.load %arg3[%c1, %c0_6] : memref<2x256xf32, #tpu.memory_space<vmem>>, vector<1x256xf32>
    %cst_7 = arith.constant dense<0.000000e+00> : vector<256xf32>
    %9 = vector.multi_reduction <add>, %6, %cst_7 [0] : vector<8x256xf32> to vector<256xf32>
    %10 = vector.shape_cast %9 : vector<256xf32> to vector<1x256xf32>
    %cst_8 = arith.constant 1.250000e-01 : f32
    %11 = vector.broadcast %cst_8 : f32 to vector<1x256xf32>
    %12 = arith.mulf %10, %11 : vector<1x256xf32>
    %13 = arith.mulf %6, %6 : vector<8x256xf32>
    %cst_9 = arith.constant dense<0.000000e+00> : vector<256xf32>
    %14 = vector.multi_reduction <add>, %13, %cst_9 [0] : vector<8x256xf32> to vector<256xf32>
    %15 = vector.shape_cast %14 : vector<256xf32> to vector<1x256xf32>
    %cst_10 = arith.constant 1.250000e-01 : f32
    %16 = vector.broadcast %cst_10 : f32 to vector<1x256xf32>
    %17 = arith.mulf %15, %16 : vector<1x256xf32>
    %18 = arith.mulf %12, %12 : vector<1x256xf32>
    %19 = arith.subf %17, %18 : vector<1x256xf32>
    %cst_11 = arith.constant 0.000000e+00 : f32
    %20 = vector.broadcast %cst_11 : f32 to vector<1x256xf32>
    %21 = arith.maximumf %19, %20 : vector<1x256xf32>
    %cst_12 = arith.constant 9.99999974E-6 : f32
    %22 = vector.broadcast %cst_12 : f32 to vector<1x256xf32>
    %23 = arith.addf %21, %22 : vector<1x256xf32>
    %24 = math.rsqrt %23 : vector<1x256xf32>
    %25 = arith.mulf %7, %24 : vector<1x256xf32>
    %26 = arith.mulf %12, %25 : vector<1x256xf32>
    %27 = arith.subf %8, %26 : vector<1x256xf32>
    %28 = vector.broadcast %25 : vector<1x256xf32> to vector<8x256xf32>
    %29 = arith.mulf %6, %28 : vector<8x256xf32>
    %30 = vector.broadcast %27 : vector<1x256xf32> to vector<8x256xf32>
    %31 = arith.addf %29, %30 : vector<8x256xf32>
    %cst_13 = arith.constant 0.000000e+00 : f32
    %32 = vector.broadcast %cst_13 : f32 to vector<8x256xf32>
    %33 = arith.maximumf %31, %32 : vector<8x256xf32>
    %c0_14 = arith.constant 0 : index
    %c0_15 = arith.constant 0 : index
    %34 = vector.load %arg9[%c0_14, %c0_15] : memref<8x1280xf32, #tpu.memory_space<vmem>>, vector<8x1280xf32>
    %35 = arith.truncf %33 : vector<8x256xf32> to vector<8x256xbf16>
    %c0_16 = arith.constant 0 : index
    %c0_17 = arith.constant 0 : index
    %36 = vector.load %arg4[%c0_16, %c0_17] : memref<256x1280xbf16, #tpu.memory_space<vmem>>, vector<256x1280xbf16>
    %cst_18 = arith.constant dense<0.000000e+00> : vector<8x1280xf32>
    %37 = tpu.matmul %35, %36, %cst_18 {dimension_numbers = #tpu.dot_dimension_numbers<[1], [0], [0], [1], [0, 0, 1, 1], [], []>} : vector<8x256xbf16>, vector<256x1280xbf16>, vector<8x1280xf32> -> vector<8x1280xf32>
    %38 = arith.addf %34, %37 : vector<8x1280xf32>
    %c0_19 = arith.constant 0 : index
    %c0_20 = arith.constant 0 : index
    %39 = vector.load %arg9[%c0_19, %c0_20] : memref<8x1280xf32, #tpu.memory_space<vmem>>, vector<8x1280xf32>
    tpu.vector_store %arg9[%c0_19, %c0_20], %38 {strides = array<i32>} : memref<8x1280xf32, #tpu.memory_space<vmem>>, vector<8x1280xf32>,
    %c4_i32 = arith.constant 4 : i32
    %40 = arith.cmpi eq, %arg0, %c4_i32 : i32
    %41 = arith.extui %40 : i1 to i32
    %c0_i32_21 = arith.constant 0 : i32
    %42 = arith.cmpi ne, %41, %c0_i32_21 : i32
    scf.if %42 {
      %c0_22 = arith.constant 0 : index
      %c0_23 = arith.constant 0 : index
      %43 = vector.load %arg9[%c0_22, %c0_23] : memref<8x1280xf32, #tpu.memory_space<vmem>>, vector<8x1280xf32>
      %c0_24 = arith.constant 0 : index
      %c0_25 = arith.constant 0 : index
      %44 = vector.load %arg5[%c0_24, %c0_25] : memref<2x1280xf32, #tpu.memory_space<vmem>>, vector<1x1280xf32>
      %c1_26 = arith.constant 1 : index
      %c0_27 = arith.constant 0 : index
      %45 = vector.load %arg5[%c1_26, %c0_27] : memref<2x1280xf32, #tpu.memory_space<vmem>>, vector<1x1280xf32>
      %cst_28 = arith.constant dense<0.000000e+00> : vector<1280xf32>
      %46 = vector.multi_reduction <add>, %43, %cst_28 [0] : vector<8x1280xf32> to vector<1280xf32>
      %47 = vector.shape_cast %46 : vector<1280xf32> to vector<1x1280xf32>
      %cst_29 = arith.constant 1.250000e-01 : f32
      %48 = vector.broadcast %cst_29 : f32 to vector<1x1280xf32>
      %49 = arith.mulf %47, %48 : vector<1x1280xf32>
      %50 = arith.mulf %43, %43 : vector<8x1280xf32>
      %cst_30 = arith.constant dense<0.000000e+00> : vector<1280xf32>
      %51 = vector.multi_reduction <add>, %50, %cst_30 [0] : vector<8x1280xf32> to vector<1280xf32>
      %52 = vector.shape_cast %51 : vector<1280xf32> to vector<1x1280xf32>
      %cst_31 = arith.constant 1.250000e-01 : f32
      %53 = vector.broadcast %cst_31 : f32 to vector<1x1280xf32>
      %54 = arith.mulf %52, %53 : vector<1x1280xf32>
      %55 = arith.mulf %49, %49 : vector<1x1280xf32>
      %56 = arith.subf %54, %55 : vector<1x1280xf32>
      %cst_32 = arith.constant 0.000000e+00 : f32
      %57 = vector.broadcast %cst_32 : f32 to vector<1x1280xf32>
      %58 = arith.maximumf %56, %57 : vector<1x1280xf32>
      %cst_33 = arith.constant 9.99999974E-6 : f32
      %59 = vector.broadcast %cst_33 : f32 to vector<1x1280xf32>
      %60 = arith.addf %58, %59 : vector<1x1280xf32>
      %61 = math.rsqrt %60 : vector<1x1280xf32>
      %62 = arith.mulf %44, %61 : vector<1x1280xf32>
      %63 = arith.mulf %49, %62 : vector<1x1280xf32>
      %64 = arith.subf %45, %63 : vector<1x1280xf32>
      %65 = vector.broadcast %62 : vector<1x1280xf32> to vector<8x1280xf32>
      %66 = arith.mulf %43, %65 : vector<8x1280xf32>
      %67 = vector.broadcast %64 : vector<1x1280xf32> to vector<8x1280xf32>
      %68 = arith.addf %66, %67 : vector<8x1280xf32>
      %cst_34 = arith.constant 0.000000e+00 : f32
      %69 = vector.broadcast %cst_34 : f32 to vector<8x1280xf32>
      %70 = arith.maximumf %68, %69 : vector<8x1280xf32>
      %71 = arith.truncf %70 : vector<8x1280xf32> to vector<8x1280xbf16>
      %c0_35 = arith.constant 0 : index
      %c0_36 = arith.constant 0 : index
      %72 = vector.load %arg6[%c0_35, %c0_36] : memref<1280x128xbf16, #tpu.memory_space<vmem>>, vector<1280x128xbf16>
      %cst_37 = arith.constant dense<0.000000e+00> : vector<8x128xf32>
      %73 = tpu.matmul %71, %72, %cst_37 {dimension_numbers = #tpu.dot_dimension_numbers<[1], [0], [0], [1], [0, 0, 1, 1], [], []>} : vector<8x1280xbf16>, vector<1280x128xbf16>, vector<8x128xf32> -> vector<8x128xf32>
      %c0_38 = arith.constant 0 : index
      %c0_39 = arith.constant 0 : index
      %74 = vector.load %arg7[%c0_38, %c0_39] : memref<1x128xf32, #tpu.memory_space<vmem>>, vector<1x128xf32>
      %75 = vector.broadcast %74 : vector<1x128xf32> to vector<8x128xf32>
      %76 = arith.addf %73, %75 : vector<8x128xf32>
      %c0_40 = arith.constant 0 : index
      %c0_41 = arith.constant 0 : index
      %77 = vector.load %arg8[%c0_40, %c0_41] : memref<8x128xf32, #tpu.memory_space<vmem>>, vector<8x128xf32>
      tpu.vector_store %arg8[%c0_40, %c0_41], %76 {strides = array<i32>} : memref<8x128xf32, #tpu.memory_space<vmem>>, vector<8x128xf32>,
    } else {
    }
    return
  }
  func.func @transform_0(%arg0: i32) -> (i32, i32) {
    %c0_i32 = arith.constant 0 : i32
    %c0_i32_0 = arith.constant 0 : i32
    %c0_i32_1 = arith.constant 0 : i32
    return %c0_i32, %c0_i32_0 : i32, i32
  }
  func.func @transform_1(%arg0: i32) -> (i32, i32) {
    %c0_i32 = arith.constant 0 : i32
    %c0_i32_0 = arith.constant 0 : i32
    return %c0_i32, %arg0 : i32, i32
  }
  func.func @transform_2(%arg0: i32) -> (i32, i32) {
    %c0_i32 = arith.constant 0 : i32
    %c0_i32_0 = arith.constant 0 : i32
    return %c0_i32, %arg0 : i32, i32
  }
  func.func @transform_3(%arg0: i32) -> (i32, i32) {
    %c0_i32 = arith.constant 0 : i32
    %c0_i32_0 = arith.constant 0 : i32
    return %arg0, %c0_i32 : i32, i32
  }
  func.func @transform_4(%arg0: i32) -> (i32, i32) {
    %c0_i32 = arith.constant 0 : i32
    %c0_i32_0 = arith.constant 0 : i32
    %c0_i32_1 = arith.constant 0 : i32
    return %c0_i32, %c0_i32_0 : i32, i32
  }
  func.func @transform_5(%arg0: i32) -> (i32, i32) {
    %c0_i32 = arith.constant 0 : i32
    %c0_i32_0 = arith.constant 0 : i32
    %c0_i32_1 = arith.constant 0 : i32
    return %c0_i32, %c0_i32_0 : i32, i32
  }
  func.func @transform_6(%arg0: i32) -> (i32, i32) {
    %c0_i32 = arith.constant 0 : i32
    %c0_i32_0 = arith.constant 0 : i32
    %c0_i32_1 = arith.constant 0 : i32
    return %c0_i32, %c0_i32_0 : i32, i32
  }
  func.func @transform_7(%arg0: i32) -> (i32, i32) {
    %c0_i32 = arith.constant 0 : i32
    %c0_i32_0 = arith.constant 0 : i32
    %c0_i32_1 = arith.constant 0 : i32
    return %c0_i32, %c0_i32_0 : i32, i32
  }
}

</mosaic_0001>

<bundles_post_ra>
// kernel: tpu_custom_call.1
= control target key start
LH: loop header
LB: loop body
LE: loop exit
PB: predicated region body
PF: predicated region fallthrough
CT: control target
= control target key end

     0   :  { %s7354_s0 = inlined_call_operand.hbm [shape: f32[8,784], index: 0, kind: input, shape index: {}]   ;;  %s7355_s1 = inlined_call_operand.hbm [shape: bf16[784,1280], index: 1, kind: input, shape index: {}]   ;;  %s7356_s2 = inlined_call_operand.hbm [shape: f32[2,1280], index: 2, kind: input, shape index: {}]   ;;  %s7357_s3 = inlined_call_operand.hbm [shape: bf16[1280,1280], index: 3, kind: input, shape index: {}]   ;;  %s7358_s4 = inlined_call_operand.hbm [shape: f32[2,1280], index: 4, kind: input, shape index: {}]   ;;  %s7359_s5 = inlined_call_operand.hbm [shape: bf16[1280,128], index: 5, kind: input, shape index: {}]   ;;  %s7360_s6 = inlined_call_operand.hbm [shape: f32[1,128], index: 6, kind: input, shape index: {}]   ;;  %s7361_s7 = inlined_call_operand.hbm [shape: f32[8,128], index: 7, kind: output, shape index: {}]  }
   0x1   :  { %7364 = sst [smem:[#allocation23_spill]] %s7355_s1 }
   0x2   :  { %7365 = sst [smem:[#allocation24_spill]] %s7358_s4 }
   0x3   :  { %7366 = sst [smem:[#allocation25_spill]] %s7359_s5 }
   0x4   :  { %12 = vsyncpa [#allocation4], 0 }
   0x5   :  { %13 = vsyncpa [#allocation7], 0 }
   0x6   :  { %15 = vsyncpa [#allocation7 + $0x1], 0 }
   0x7   :  { %16 = vsyncpa [#allocation10], 0 }
   0x8   :  { %18 = vsyncpa [#allocation10 + $0x1], 0 }
   0x9   :  { %19 = vsyncpa [#allocation13], 0 }
   0xa   :  { %20 = vsyncpa [#allocation5], 0  ;;  %s6167_s24 = smov 0   ;;  %s6169_s25 = smov 0  }
   0xb   :  { %s6171_s26 = smov 0   ;;  %s6173_s27 = smov 0  }
   0xc LB: > { %s6186_s28 = sadd.s32 4294967295, %s6113_s27   ;;  %p67_p0 = scmp.ne.s32.totalorder %s6105_s25, %s6101_s24  ;;  %s6113_s27 = sphi %s6173_s27, %s7405_s27   ;;  %s6109_s26 = sphi %s6171_s26, %s7404_s26   ;;  %s6105_s25 = sphi %s6169_s25, %s7403_s25   ;;  %s6101_s24 = sphi %s6167_s24, %s7402_s24  }
   0xd   : > { %p68_p1 = scmp.eq.s32.totalorder %s6186_s28, 0  ;;  %p3966_p2 = scmp.ge.s32.totalorder %s6113_s27, 1 }
   0xe   : > { %p214_p3 = scmp.lt.s32.totalorder %s6113_s27, 6  ;;  %p3967_p4 = scmp.ne.s32.totalorder %s6186_s28, 0 }
   0xf   : > { %p6195_p5 = por %p68_p1, %p67_p0  ;;  %s7368_s4 = sld [smem:[#allocation24_spill]] }
  0x10   : > { %p6202_p6 = pnand %p3966_p2, %p214_p3  ;;  %s6115_s11 = smov [#allocation11]  }
  0x11   : > { %s240_s12 = sshll.u32 %s6115_s11, 4  ;;  %s7370_s5 = sld [smem:[#allocation25_spill]]  ;;  %s241_s12 = int_to_ptr.vmem [resolvable:$true] %s240_s12 }
  0x12   : > { %p5718_p7 = pneg %p6202_p6  ;;  %s6116_s17 = smov [#allocation12]  }
  0x13   : > { %s251_s18 = sshll.u32 %s6116_s17, 4  ;;  %s6117_s19 = smov 64   ;;  %s252_s18 = int_to_ptr.vmem [resolvable:$true] %s251_s18 }
  0x14   : > { %p6213_p8 = pnand %p5718_p7, %p68_p1  ;;  %s6118_s20 = smov 4  }
  0x15   : > { %s238_s9 = sshll.u32 %s7368_s4, 4  ;;  %s6222_s21 = sadd.s32 1, %s6113_s27   ;;  %s239_s9 = int_to_ptr.hbm [resolvable:$true] %s238_s9 }
  0x16   : > { %5724 = dma.hbm_to_vmem [thread:$0]  (!%p6213_p8), %s239_s9, 320, %s241_s12, [#allocation10]  }
  0x17   : > { %s249_s15 = sshll.u32 %s7370_s5, 4  ;;  %s51_s22 = ssub.s32 %s6113_s27, %s6222_s21  ;;  %s250_s15 = int_to_ptr.hbm [resolvable:$true] %s249_s15 }
  0x18   : > { %5727 = dma.hbm_to_vmem [thread:$0]  (!%p6213_p8), %s250_s15, 10240, %s252_s18, [#allocation13], %s6117_s19, %s6117_s19, %s6118_s20  }
  0x19   : > { %p52_p9 = scmp.eq.s32.totalorder %s51_s22, 0  ;;  %s54_s23 = sadd.s32 1, %s6109_s26 }
  0x1a   : > { %p61_p10 = scmp.ne.s32.totalorder %s6109_s26, %s6105_s25  ;;  %p62_p11 = scmp.eq.s32.totalorder %s6113_s27, 0 }
  0x1b   : > { %s6231_s24 = scalar_select %p52_p9, %s6109_s26, %s54_s23  }
  0x1c   : > { %p63_p12 = por %p62_p11, %p61_p10  ;;  %p5745_p13 = scmp.lt.s32.totalorder %s6113_s27, 5 }
  0x1d   : > { %7372 = sst [smem:[#allocation22_spill]] %s6231_s24  ;;  %s7362_s30 = sand.u32 1, %s6113_s27  }
  0x1e   : > { %s6236_s8 = sand.u32 1, %s6109_s26   ;;  %s5347_s11 = sshll.u32 %s6113_s27, 3 }
  0x1f   : > { %s5687_s9 = smul.u32 784, %s6236_s8  ;;  %p6240_p0 = pnand %p5745_p13, %p63_p12 }
  0x20   : > { %s7374_s1 = sld [smem:[#allocation23_spill]]  ;;  %s6249_s20 = scalar_lea.sflag [#allocation7], %s7362_s30 }
  0x21   : > { %s281_s18 = scalar_lea.vmem [#allocation6], %s5687_s9  ;;  %p5885_p3 = pneg %p6240_p0 }
  0x22   : > { %s289_s19 = sshll.u32 %s281_s18, 4  ;;  %s290_s19 = int_to_ptr.vmem [resolvable:$true] %s289_s19 }
  0x26   : > { %s286_s15 = scalar_lea.hbm %s7374_s1, %s5347_s11  ;;  %s5888_s9 = scalar_lea.hbm %s7374_s1, 3920 }
  0x27   : > { %s287_s17 = sshll.u32 %s286_s15, 4  ;;  %s288_s17 = int_to_ptr.hbm [resolvable:$true] %s287_s17 }
  0x28   : > { %s5881_s22 = sshra.s32 %s288_s17, 4  ;;  %s5882_s22 = int_to_ptr.hbm [resolvable:$true] %s5881_s22 }
  0x29   : > { %s5883_s23 = scalar_lea.hbm %s5882_s22, 784  ;;  %p5889_p10 = scmp.lt.s32.totalorder %s5882_s22, %s7374_s1 }
  0x2a   : > { %p5884_p2 = scmp.ne.s32.totalorder %s5882_s22, %s5883_s23  ;;  %p5890_p11 = scmp.lt.s32.totalorder %s5888_s9, %s5883_s23 }
  0x2c   : > { %p5886_p7 = pnand %p5885_p3, %p5884_p2  ;;  %p5891_p12 = por %p5890_p11, %p5889_p10 }
  0x2e   : > { %p5887_p9 = pneg %p5886_p7 }
  0x30   : > { %p5892_p13 = pnand %p5891_p12, %p5887_p9 }
  0x32   : > { %5895 = shalt.err (!%p5892_p13)
}
  0x33   : > { %s6119_s18 = smov 640   ;;  %s6120_s30 = smov 128  }
  0x34   : > { %s6121_s4 = smov 8   ;;  %s226_s22 = sshll.u32 %s7354_s0, 4  ;;  %s227_s22 = int_to_ptr.hbm [resolvable:$true] %s226_s22 }
  0x35   : > { %5734 = dma.hbm_to_vmem [thread:$0]  (!%p6240_p0), %s288_s17, 12544, %s290_s19, %s6249_s20, %s6119_s18, %s6120_s30, %s6121_s4  }
  0x36   : > { %s6122_s23 = smov [#allocation3]   ;;  %s264_s1 = sshll.u32 %s7360_s6, 4  ;;  %s265_s1 = int_to_ptr.hbm [resolvable:$true] %s264_s1 }
  0x37   : > { %s228_s9 = sshll.u32 %s6122_s23, 4  ;;  %s6123_s5 = smov [#allocation14]   ;;  %s229_s9 = int_to_ptr.vmem [resolvable:$true] %s228_s9 }
  0x38   : > { %5721 = dma.hbm_to_vmem [thread:$0]  (!%p6213_p8), %s227_s22, 896, %s229_s9, [#allocation4]  }
  0x39   : > { %s266_s24 = sshll.u32 %s6123_s5, 4  ;;  %s3974_s4 = sshll.u32 %s6236_s8, 2  ;;  %s267_s24 = int_to_ptr.vmem [resolvable:$true] %s266_s24 }
  0x3a   : > { %5730 = dma.hbm_to_vmem [thread:$0]  (!%p6213_p8), %s265_s1, 16, %s267_s24, [#allocation13]  }
  0x3b   : > { %s5348_s30 = sshll.u32 %s6113_s27, 2  ;;  %s303_s17 = scalar_lea.vmem [#allocation8], %s3974_s4 }
  0x3c   : > { %s312_s19 = sshll.u32 %s303_s17, 4  ;;  %s308_s23 = scalar_lea.hbm %s7356_s2, %s5348_s30  ;;  %s313_s19 = int_to_ptr.vmem [resolvable:$true] %s312_s19 }
  0x3d   : > { %s310_s14 = sshll.u32 %s308_s23, 4  ;;  %s5688_s15 = smul.u32 1280, %s6236_s8  ;;  %s311_s14 = int_to_ptr.hbm [resolvable:$true] %s310_s14 }
  0x3e   : > { %s5971_s22 = sshra.s32 %s311_s14, 4  ;;  %s5978_s16 = scalar_lea.hbm %s7356_s2, 20  ;;  %s5972_s22 = int_to_ptr.hbm [resolvable:$true] %s5971_s22 }
  0x3f   : > { %s5973_s9 = scalar_lea.hbm %s5972_s22, 4  ;;  %p5979_p8 = scmp.lt.s32.totalorder %s5972_s22, %s7356_s2 }
  0x40   : > { %p5974_p2 = scmp.ne.s32.totalorder %s5972_s22, %s5973_s9  ;;  %p5980_p10 = scmp.lt.s32.totalorder %s5978_s16, %s5973_s9 }
  0x42   : > { %p5976_p7 = pnand %p5974_p2, %p5885_p3  ;;  %p5981_p11 = por %p5980_p10, %p5979_p8 }
  0x44   : > { %p5977_p9 = pneg %p5976_p7 }
  0x46   : > { %p5982_p12 = pnand %p5981_p11, %p5977_p9 }
  0x48   : > { %5985 = shalt.err (!%p5982_p12)
}
  0x49   : > { %5737 = dma.hbm_to_vmem [thread:$0]  (!%p6240_p0), %s311_s14, 64, %s313_s19, %s6249_s20  }
  0x4a   : > { %s5689_s8 = smul.u32 1280, %s6113_s27  ;;  %s323_s30 = scalar_lea.vmem [#allocation9], %s5688_s15 }
  0x4b   : > { %s332_s17 = sshll.u32 %s323_s30, 4  ;;  %s7375_s9 = sand.u32 1, %s6113_s27   ;;  %s333_s17 = int_to_ptr.vmem [resolvable:$true] %s332_s17 }
  0x4c   : > { %s329_s23 = scalar_lea.hbm %s7357_s3, %s5689_s8  ;;  %s320_s1 = scalar_lea.sflag [#allocation10], %s7375_s9 }
  0x4d   : > { %s330_s22 = sshll.u32 %s329_s23, 4  ;;  %s6008_s14 = scalar_lea.hbm %s7357_s3, 6400  ;;  %s331_s22 = int_to_ptr.hbm [resolvable:$true] %s330_s22 }
  0x4e   : > { %s6001_s5 = sshra.s32 %s331_s22, 4  ;;  %s6002_s5 = int_to_ptr.hbm [resolvable:$true] %s6001_s5 }
  0x4f   : > { %s6003_s16 = scalar_lea.hbm %s6002_s5, 1280  ;;  %p6009_p9 = scmp.lt.s32.totalorder %s6002_s5, %s7357_s3 }
  0x50   : > { %p6004_p13 = scmp.ne.s32.totalorder %s6002_s5, %s6003_s16  ;;  %p6010_p8 = scmp.lt.s32.totalorder %s6008_s14, %s6003_s16 }
  0x52   : > { %p6006_p2 = pnand %p6004_p13, %p5885_p3  ;;  %p6011_p10 = por %p6010_p8, %p6009_p9 }
  0x54   : > { %p6007_p7 = pneg %p6006_p2 }
  0x56   : > { %p6012_p11 = pnand %p6011_p10, %p6007_p7 }
  0x58   : > { %6015 = shalt.err (!%p6012_p11)
}
  0x59   : > { %s6124_s27 = smov 40   ;;  %344 = sbr.rel (%p6202_p6) target bundleno = 947 (0x3b3), region = 48 }
  0x5a   : > { %5740 = dma.hbm_to_vmem [thread:$0]  (!%p6240_p0), %s331_s22, 20480, %s333_s17, %s320_s1, %s6119_s18, %s6119_s18, %s6124_s27  }
  0x5e   : > { %6076 = dma.done.wait (%p68_p1), [#allocation4], 896  }
  0x5f   : > { %6078 = vsyncadd (%p68_p1), [#allocation4], 4294966400  ;;  %s351_s4 = sand.u32 1, %s6186_s28   ;;  %s353_s8 = sand.u32 1, %s6105_s25  }
  0x60   : > { %s5690_s30 = smul.u32 784, %s353_s8  ;;  %s352_s13 = scalar_lea.sflag [#allocation7], %s351_s4 }
  0x62   : > { %s6321_s12 = scalar_lea.vmem [#allocation6], %s5690_s30 }
  0x63   : > { %6080 = dma.done.wait (%p6195_p5), %s352_s13, 12608  }
  0x64   : > { %6082 = vsyncadd (%p6195_p5), %s352_s13, 4294954688  ;;  %s3982_s10 = sshll.u32 %s353_s8, 2  ;;  %s5691_s18 = smul.u32 1280, %s353_s8 }
  0x65   : > { %s6327_s17 = scalar_lea.vmem [#allocation8], %s3982_s10  ;;  %s372_s11 = scalar_lea.sflag [#allocation10], %s351_s4 }
  0x66   : > { %s6329_s23 = scalar_lea.vmem [#allocation9], %s5691_s18 }
  0x67   : > { %6084 = dma.done.wait (%p6195_p5), %s372_s11, 20480  }
  0x68   : > { %6086 = vsyncadd (%p6195_p5), %s372_s11, 4294946816 }
  0x69   : > { %6088 = dma.done.wait (%p68_p1), [#allocation10], 320  }
  0x6a   : > { %6090 = vsyncadd (%p68_p1), [#allocation10], 4294966976 }
  0x6b   : > { %6092 = dma.done.wait (%p68_p1), [#allocation13], 10256  }
  0x6c   : > { %6094 = vsyncadd (%p68_p1), [#allocation13], 4294957040  ;;  %434 = sbr.rel (%p3967_p4) target bundleno = 124 (0x7c), region = 80 }
  0x71   : > { %v6125_v0 = vmov 0.0  }
  0x72   : > { %435 = vst [vmem:[#allocation2 + $0x30] sm:$0xff] %v6125_v0 }
  0x73   : > { %436 = vst [vmem:[#allocation2] sm:$0xff] %v6125_v0 }
  0x74   : > { %437 = vst [vmem:[#allocation2 + $0x18] sm:$0xff] %v6125_v0 }
  0x75   : > { %438 = vst [vmem:[#allocation2 + $0x10] sm:$0xff] %v6125_v0 }
  0x76   : > { %439 = vst [vmem:[#allocation2 + $0x48] sm:$0xff] %v6125_v0 }
  0x77   : > { %440 = vst [vmem:[#allocation2 + $0x28] sm:$0xff] %v6125_v0 }
  0x78   : > { %441 = vst [vmem:[#allocation2 + $0x8] sm:$0xff] %v6125_v0 }
  0x79   : > { %442 = vst [vmem:[#allocation2 + $0x20] sm:$0xff] %v6125_v0 }
  0x7a   : > { %443 = vst [vmem:[#allocation2 + $0x40] sm:$0xff] %v6125_v0 }
  0x7b   : > { %444 = vst [vmem:[#allocation2 + $0x38] sm:$0xff] %v6125_v0 }
  0x7c PF: > { %v4045_v1 = vld [vmem:[%s6321_s12 + $0x70] sm:$0xf]  ;;  %v5364_v2 = vld [vmem:[%s6321_s12 + $0x74] sm:$0xf0]  ;;  %v4037_v12 = vld [vmem:[%s6321_s12 + $0x60] sm:$0xf] }
  0x7d   : > { %v4173_v3 = vld [vmem:[%s6321_s12 + $0x170] sm:$0xf]  ;;  %v4046_v4 = vor.u32 %v5364_v2, %v4045_v1  ;;  %v5396_v5 = vld [vmem:[%s6321_s12 + $0x174] sm:$0xf0]  ;;  %v5362_v14 = vld [vmem:[%s6321_s12 + $0x64] sm:$0xf0] }
  0x7e   : > { %v4237_v6 = vld [vmem:[%s6321_s12 + $0x1f0] sm:$0xf]  ;;  %v5412_v7 = vld [vmem:[%s6321_s12 + $0x1f4] sm:$0xf0]  ;;  %v4174_v8 = vor.u32 %v5396_v5, %v4173_v3  ;;  %v4165_v15 = vld [vmem:[%s6321_s12 + $0x160] sm:$0xf]  ;;  %v4038_v17 = vor.u32 %v5362_v14, %v4037_v12 }
  0x7f   : > { %v4238_v9 = vor.u32 %v5412_v7, %v4237_v6  ;;  %v4109_v10 = vld [vmem:[%s6321_s12 + $0xf0] sm:$0xf]  ;;  %v5380_v11 = vld [vmem:[%s6321_s12 + $0xf4] sm:$0xf0]  ;;  %1051 = vmatpush.bf16.msra.mxu0 %v4046_v4  ;;  %v5394_v16 = vld [vmem:[%s6321_s12 + $0x164] sm:$0xf0] }
  0x80   : > { %v4110_v13 = vor.u32 %v5380_v11, %v4109_v10  ;;  %1077 = vmatpush.bf16.msra.mxu2 %v4174_v8  ;;  %v4166_v18 = vor.u32 %v5394_v16, %v4165_v15  ;;  %v4229_v19 = vld [vmem:[%s6321_s12 + $0x1e0] sm:$0xf]  ;;  %v5410_v20 = vld [vmem:[%s6321_s12 + $0x1e4] sm:$0xf0]  ;;  %v4029_v24 = vld [vmem:[%s6321_s12 + $0x50] sm:$0xf] }
  0x81   : > { %1090 = vmatpush.bf16.msra.mxu3 %v4238_v9  ;;  %v4101_v21 = vld [vmem:[%s6321_s12 + $0xe0] sm:$0xf]  ;;  %v4230_v22 = vor.u32 %v5410_v20, %v4229_v19  ;;  %v5378_v23 = vld [vmem:[%s6321_s12 + $0xe4] sm:$0xf0]  ;;  %v5360_v25 = vld [vmem:[%s6321_s12 + $0x54] sm:$0xf0] }
  0x82   : > { %1064 = vmatpush.bf16.msra.mxu1 %v4110_v13  ;;  %v4102_v26 = vor.u32 %v5378_v23, %v4101_v21  ;;  %v4157_v27 = vld [vmem:[%s6321_s12 + $0x150] sm:$0xf]  ;;  %v5392_v28 = vld [vmem:[%s6321_s12 + $0x154] sm:$0xf0]  ;;  %v4030_v30 = vor.u32 %v5360_v25, %v4029_v24  ;;  %v4021_v36 = vld [vmem:[%s6321_s12 + $0x40] sm:$0xf] }
  0x83   : > { %v4221_v29 = vld [vmem:[%s6321_s12 + $0x1d0] sm:$0xf]  ;;  %1052 = vmatpush.bf16.msra.mxu0 %v4038_v17  ;;  %v5408_v31 = vld [vmem:[%s6321_s12 + $0x1d4] sm:$0xf0]  ;;  %v4158_v34 = vor.u32 %v5392_v28, %v4157_v27  ;;  %v5358_v37 = vld [vmem:[%s6321_s12 + $0x44] sm:$0xf0] }
  0x84   : > { %v4093_v32 = vld [vmem:[%s6321_s12 + $0xd0] sm:$0xf]  ;;  %v5376_v33 = vld [vmem:[%s6321_s12 + $0xd4] sm:$0xf0]  ;;  %1078 = vmatpush.bf16.msra.mxu2 %v4166_v18  ;;  %v4222_v35 = vor.u32 %v5408_v31, %v4221_v29  ;;  %v4149_v38 = vld [vmem:[%s6321_s12 + $0x140] sm:$0xf]  ;;  %v4022_v45 = vor.u32 %v5358_v37, %v4021_v36 }
  0x85   : > { %1091 = vmatpush.bf16.msra.mxu3 %v4230_v22  ;;  %v4094_v39 = vor.u32 %v5376_v33, %v4093_v32  ;;  %v5390_v40 = vld [vmem:[%s6321_s12 + $0x144] sm:$0xf0]  ;;  %v4213_v41 = vld [vmem:[%s6321_s12 + $0x1c0] sm:$0xf]  ;;  %v4013_v48 = vld [vmem:[%s6321_s12 + $0x30] sm:$0xf] }
  0x86   : > { %1065 = vmatpush.bf16.msra.mxu1 %v4102_v26  ;;  %v5406_v42 = vld [vmem:[%s6321_s12 + $0x1c4] sm:$0xf0]  ;;  %v4085_v43 = vld [vmem:[%s6321_s12 + $0xc0] sm:$0xf]  ;;  %v4150_v46 = vor.u32 %v5390_v40, %v4149_v38  ;;  %v5356_v49 = vld [vmem:[%s6321_s12 + $0x34] sm:$0xf0] }
  0x87   : > { %v5374_v44 = vld [vmem:[%s6321_s12 + $0xc4] sm:$0xf0]  ;;  %1053 = vmatpush.bf16.msra.mxu0 %v4030_v30  ;;  %v4214_v47 = vor.u32 %v5406_v42, %v4213_v41  ;;  %v4141_v50 = vld [vmem:[%s6321_s12 + $0x130] sm:$0xf]  ;;  %v5388_v52 = vld [vmem:[%s6321_s12 + $0x134] sm:$0xf0]  ;;  %v4014_v57 = vor.u32 %v5356_v49, %v4013_v48 }
  0x88   : > { %1079 = vmatpush.bf16.msra.mxu2 %v4158_v34  ;;  %v4086_v51 = vor.u32 %v5374_v44, %v4085_v43  ;;  %v4205_v53 = vld [vmem:[%s6321_s12 + $0x1b0] sm:$0xf]  ;;  %v5404_v54 = vld [vmem:[%s6321_s12 + $0x1b4] sm:$0xf0]  ;;  %v4142_v58 = vor.u32 %v5388_v52, %v4141_v50  ;;  %v4005_v60 = vld [vmem:[%s6321_s12 + $0x20] sm:$0xf] }
  0x89   : > { %1092 = vmatpush.bf16.msra.mxu3 %v4222_v35  ;;  %v4077_v55 = vld [vmem:[%s6321_s12 + $0xb0] sm:$0xf]  ;;  %v5372_v56 = vld [vmem:[%s6321_s12 + $0xb4] sm:$0xf0]  ;;  %v4206_v59 = vor.u32 %v5404_v54, %v4205_v53  ;;  %v5354_v61 = vld [vmem:[%s6321_s12 + $0x24] sm:$0xf0] }
  0x8a   : > { %1066 = vmatpush.bf16.msra.mxu1 %v4094_v39  ;;  %v4133_v62 = vld [vmem:[%s6321_s12 + $0x120] sm:$0xf]  ;;  %v4078_v63 = vor.u32 %v5372_v56, %v4077_v55  ;;  %v5386_v0 = vld [vmem:[%s6321_s12 + $0x124] sm:$0xf0]  ;;  %v4006_v5 = vor.u32 %v5354_v61, %v4005_v60  ;;  %v3997_v8 = vld [vmem:[%s6321_s12 + $0x10] sm:$0xf] }
  0x8b   : > { %1054 = vmatpush.bf16.msra.mxu0 %v4022_v45  ;;  %v4197_v1 = vld [vmem:[%s6321_s12 + $0x1a0] sm:$0xf]  ;;  %v5402_v2 = vld [vmem:[%s6321_s12 + $0x1a4] sm:$0xf0]  ;;  %v4134_v6 = vor.u32 %v5386_v0, %v4133_v62  ;;  %v5352_v9 = vld [vmem:[%s6321_s12 + $0x14] sm:$0xf0] }
  0x8c   : > { %1080 = vmatpush.bf16.msra.mxu2 %v4150_v46  ;;  %v4069_v3 = vld [vmem:[%s6321_s12 + $0xa0] sm:$0xf]  ;;  %v5370_v4 = vld [vmem:[%s6321_s12 + $0xa4] sm:$0xf0]  ;;  %v4198_v7 = vor.u32 %v5402_v2, %v4197_v1  ;;  %v4125_v10 = vld [vmem:[%s6321_s12 + $0x110] sm:$0xf]  ;;  %v3998_v17 = vor.u32 %v5352_v9, %v3997_v8 }
  0x8d   : > { %1093 = vmatpush.bf16.msra.mxu3 %v4214_v47  ;;  %v4070_v11 = vor.u32 %v5370_v4, %v4069_v3  ;;  %v5384_v12 = vld [vmem:[%s6321_s12 + $0x114] sm:$0xf0]  ;;  %v4189_v13 = vld [vmem:[%s6321_s12 + $0x190] sm:$0xf]  ;;  %v3989_v18 = vld [vmem:[%s6321_s12] sm:$0xf] }
  0x8e   : > { %1067 = vmatpush.bf16.msra.mxu1 %v4086_v51  ;;  %v5400_v14 = vld [vmem:[%s6321_s12 + $0x194] sm:$0xf0]  ;;  %v4061_v15 = vld [vmem:[%s6321_s12 + $0x90] sm:$0xf]  ;;  %v5350_v19 = vld [vmem:[%s6321_s12 + $0x4] sm:$0xf0]  ;;  %v4126_v21 = vor.u32 %v5384_v12, %v4125_v10 }
  0x8f   : > { %1055 = vmatpush.bf16.msra.mxu0 %v4014_v57  ;;  %v5368_v16 = vld [vmem:[%s6321_s12 + $0x94] sm:$0xf0]  ;;  %v4117_v20 = vld [vmem:[%s6321_s12 + $0x100] sm:$0xf]  ;;  %v4190_v22 = vor.u32 %v5400_v14, %v4189_v13  ;;  %v5382_v23 = vld [vmem:[%s6321_s12 + $0x104] sm:$0xf0]  ;;  %v3990_v33 = vor.u32 %v5350_v19, %v3989_v18 }
  0x90   : > { %1081 = vmatpush.bf16.msra.mxu2 %v4142_v58  ;;  %v4181_v24 = vld [vmem:[%s6321_s12 + $0x180] sm:$0xf]  ;;  %v5398_v25 = vld [vmem:[%s6321_s12 + $0x184] sm:$0xf0]  ;;  %v4062_v26 = vor.u32 %v5368_v16, %v4061_v15  ;;  %v4301_v27 = vld [vmem:[%s6321_s12 + $0x270] sm:$0xf]  ;;  %v4118_v37 = vor.u32 %v5382_v23, %v4117_v20 }
  0x91   : > { %1094 = vmatpush.bf16.msra.mxu3 %v4206_v59  ;;  %v5428_v28 = vld [vmem:[%s6321_s12 + $0x274] sm:$0xf0]  ;;  %v5363_v29 = vld [vmem:[%s6321_s12 + $0x74] sm:$0xf]  ;;  %v4047_v30 = vld [vmem:[%s6321_s12 + $0x78] sm:$0xf0]  ;;  %v4182_v38 = vor.u32 %v5398_v25, %v4181_v24 }
  0x92   : > { %1068 = vmatpush.bf16.msra.mxu1 %v4078_v63  ;;  %v4053_v31 = vld [vmem:[%s6321_s12 + $0x80] sm:$0xf]  ;;  %v5366_v32 = vld [vmem:[%s6321_s12 + $0x84] sm:$0xf0]  ;;  %v4365_v39 = vld [vmem:[%s6321_s12 + $0x2f0] sm:$0xf]  ;;  %v4302_v42 = vor.u32 %v5428_v28, %v4301_v27  ;;  %v4050_v43 = vor.u32 %v5363_v29, %v4047_v30 }
  0x93   : > { %1056 = vmatpush.bf16.msra.mxu0 %v4006_v5  ;;  %v447_v34 = vld [vmem:[#allocation3 + $0x10] sm:$0xff]  ;;  %v4373_v35 = vld [vmem:[%s6321_s12 + $0x300] sm:$0xf]  ;;  %v5379_v41 = vld [vmem:[%s6321_s12 + $0xf4] sm:$0xf]  ;;  %v4054_v47 = vor.u32 %v5366_v32, %v4053_v31  ;;  %vm1047_vm0 = vcmask 130048  }
  0x94   : > { %1082 = vmatpush.bf16.msra.mxu2 %v4134_v6  ;;  %v5446_v36 = vld [vmem:[%s6321_s12 + $0x304] sm:$0xf0]  ;;  %v5444_v40 = vld [vmem:[%s6321_s12 + $0x2f4] sm:$0xf0]  ;;  %v4111_v44 = vld [vmem:[%s6321_s12 + $0xf8] sm:$0xf0]  ;;  %v6423_v52 = vpack.c.bf16 %v447_v34, %v447_v34 }
  0x95   : > { %1095 = vmatpush.bf16.msra.mxu3 %v4198_v7  ;;  %v4293_v45 = vld [vmem:[%s6321_s12 + $0x260] sm:$0xf]  ;;  %v4374_v48 = vor.u32 %v5446_v36, %v4373_v35  ;;  %v5426_v49 = vld [vmem:[%s6321_s12 + $0x264] sm:$0xf0]  ;;  %v5361_v50 = vld [vmem:[%s6321_s12 + $0x64] sm:$0xf]  ;;  %v4366_v53 = vor.u32 %v5444_v40, %v4365_v39  ;;  %v4114_v56 = vor.u32 %v5379_v41, %v4111_v44 }
  0x96   : > { %1069 = vmatpush.bf16.msra.mxu1 %v4070_v11  ;;  %v448_v46 = vld [vmem:[#allocation3 + $0x18] sm:$0xff]  ;;  %v4039_v51 = vld [vmem:[%s6321_s12 + $0x68] sm:$0xf0]  ;;  %v446_v55 = vld [vmem:[#allocation3 + $0x8] sm:$0xff]  ;;  %v4294_v60 = vor.u32 %v5426_v49, %v4293_v45  ;;  %vm7363_vm6 = vcmask 1040384   ;;  %p5022_p1 = scmp.ne.s32.totalorder %s6186_s28, 4 }
  0x97   : > { %1057 = vmatpush.bf16.msra.mxu0 %v3998_v17  ;;  %v445_v54 = vld [vmem:[#allocation3] sm:$0xff]  ;;  %v4357_v57 = vld [vmem:[%s6321_s12 + $0x2e0] sm:$0xf]  ;;  %v6427_v59 = vpack.c.bf16 %v448_v46, %v448_v46  ;;  %v4042_v61 = vor.u32 %v5361_v50, %v4039_v51  ;;  %v5377_v62 = vld [vmem:[%s6321_s12 + $0xe4] sm:$0xf]  ;;  %v6437_v5 = vpack.c.bf16 %v446_v55, %v446_v55 }
  0x98   : > { %1083 = vmatpush.bf16.msra.mxu2 %v4126_v21  ;;  %v5442_v58 = vld [vmem:[%s6321_s12 + $0x2e4] sm:$0xf0]  ;;  %v4103_v63 = vld [vmem:[%s6321_s12 + $0xe8] sm:$0xf0]  ;;  %v4285_v0 = vld [vmem:[%s6321_s12 + $0x250] sm:$0xf]  ;;  %v6435_v4 = vpack.c.bf16 %v445_v54, %v445_v54 }
  0x99   : > { %1096 = vmatpush.bf16.msra.mxu3 %v4190_v22  ;;  %v5424_v1 = vld [vmem:[%s6321_s12 + $0x254] sm:$0xf0]  ;;  %v5359_v2 = vld [vmem:[%s6321_s12 + $0x54] sm:$0xf]  ;;  %v4031_v3 = vld [vmem:[%s6321_s12 + $0x58] sm:$0xf0]  ;;  %v4358_v6 = vor.u32 %v5442_v58, %v4357_v57  ;;  %v4106_v7 = vor.u32 %v5377_v62, %v4103_v63 }
  0x9a   : > { %1070 = vmatpush.bf16.msra.mxu1 %v4062_v26  ;;  %v4349_v8 = vld [vmem:[%s6321_s12 + $0x2d0] sm:$0xf]  ;;  %v5440_v9 = vld [vmem:[%s6321_s12 + $0x2d4] sm:$0xf0]  ;;  %v4286_v10 = vor.u32 %v5424_v1, %v4285_v0  ;;  %v4034_v11 = vor.u32 %v5359_v2, %v4031_v3  ;;  %v5375_v12 = vld [vmem:[%s6321_s12 + $0xd4] sm:$0xf] }
  0x9b   : > { %1058 = vmatpush.bf16.msra.mxu0 %v3990_v33  ;;  %v4095_v13 = vld [vmem:[%s6321_s12 + $0xd8] sm:$0xf0]  ;;  %v4277_v14 = vld [vmem:[%s6321_s12 + $0x240] sm:$0xf]  ;;  %v5422_v15 = vld [vmem:[%s6321_s12 + $0x244] sm:$0xf0]  ;;  %v4350_v18 = vor.u32 %v5440_v9, %v4349_v8 }
  0x9c   : > { %1084 = vmatpush.bf16.msra.mxu2 %v4118_v37  ;;  %v5357_v16 = vld [vmem:[%s6321_s12 + $0x44] sm:$0xf]  ;;  %v4023_v17 = vld [vmem:[%s6321_s12 + $0x48] sm:$0xf0]  ;;  %v4098_v19 = vor.u32 %v5375_v12, %v4095_v13  ;;  %v4341_v20 = vld [vmem:[%s6321_s12 + $0x2c0] sm:$0xf]  ;;  %v4278_v22 = vor.u32 %v5422_v15, %v4277_v14 }
  0x9d   : > { %1097 = vmatpush.bf16.msra.mxu3 %v4182_v38  ;;  %v5438_v21 = vld [vmem:[%s6321_s12 + $0x2c4] sm:$0xf0]  ;;  %v4026_v23 = vor.u32 %v5357_v16, %v4023_v17  ;;  %v5373_v24 = vld [vmem:[%s6321_s12 + $0xc4] sm:$0xf]  ;;  %v4087_v25 = vld [vmem:[%s6321_s12 + $0xc8] sm:$0xf0] }
  0x9e   : > { %1071 = vmatpush.bf16.msra.mxu1 %v4054_v47  ;;  %1059 = vmatmul.bf16.vlgmr.msra.gmra.mxu0 %v6435_v4  ;;  %v4269_v26 = vld [vmem:[%s6321_s12 + $0x230] sm:$0xf]  ;;  %v5420_v27 = vld [vmem:[%s6321_s12 + $0x234] sm:$0xf0]  ;;  %v5355_v28 = vld [vmem:[%s6321_s12 + $0x34] sm:$0xf]  ;;  %v4342_v30 = vor.u32 %v5438_v21, %v4341_v20  ;;  %v4090_v31 = vor.u32 %v5373_v24, %v4087_v25 }
  0x9f   : > { %1103 = vmatpush.bf16.msrb.mxu0 %v4302_v42  ;;  %1085 = vmatmul.bf16.vlgmr.msra.gmra.mxu2 %v6423_v52  ;;  %v4015_v29 = vld [vmem:[%s6321_s12 + $0x38] sm:$0xf0]  ;;  %v4333_v32 = vld [vmem:[%s6321_s12 + $0x2b0] sm:$0xf]  ;;  %v5436_v33 = vld [vmem:[%s6321_s12 + $0x2b4] sm:$0xf0]  ;;  %v4270_v35 = vor.u32 %v5420_v27, %v4269_v26 }
  0xa0   : > { %1136 = vmatpush.bf16.msrb.mxu2 %v4374_v48  ;;  %1098 = vmatmul.bf16.vlgmr.msra.gmra.mxu3 %v6427_v59  ;;  %v451_v34 = vld [vmem:[#allocation3 + $0x30] sm:$0xff]  ;;  %v4018_v36 = vor.u32 %v5355_v28, %v4015_v29  ;;  %v5371_v37 = vld [vmem:[%s6321_s12 + $0xb4] sm:$0xf]  ;;  %v4261_v39 = vld [vmem:[%s6321_s12 + $0x220] sm:$0xf] }
  0xa1   : > { %1142 = vmatpush.bf16.msrb.mxu3 %v4050_v43  ;;  %1072 = vmatmul.bf16.vlgmr.msra.gmra.mxu1 %v6437_v5  ;;  %v4079_v38 = vld [vmem:[%s6321_s12 + $0xb8] sm:$0xf0]  ;;  %v5418_v40 = vld [vmem:[%s6321_s12 + $0x224] sm:$0xf0]  ;;  %v5353_v41 = vld [vmem:[%s6321_s12 + $0x24] sm:$0xf]  ;;  %v4334_v43 = vor.u32 %v5436_v33, %v4333_v32  ;;  %v6467_v44 = vpack.c.bf16 %v451_v34, %v451_v34 }
  0xa2   : > { %1116 = vmatpush.bf16.msrb.mxu1 %v4366_v53  ;;  %v4007_v42 = vld [vmem:[%s6321_s12 + $0x28] sm:$0xf0]  ;;  %v4082_v45 = vor.u32 %v5371_v37, %v4079_v38  ;;  %v4325_v46 = vld [vmem:[%s6321_s12 + $0x2a0] sm:$0xf]  ;;  %v5434_v47 = vld [vmem:[%s6321_s12 + $0x2a4] sm:$0xf0]  ;;  %v4262_v48 = vor.u32 %v5418_v40, %v4261_v39 }
  0xa3   : > { %1104 = vmatpush.bf16.msrb.mxu0 %v4294_v60  ;;  %v4010_v49 = vor.u32 %v5353_v41, %v4007_v42  ;;  %v5369_v50 = vld [vmem:[%s6321_s12 + $0xa4] sm:$0xf]  ;;  %v4071_v51 = vld [vmem:[%s6321_s12 + $0xa8] sm:$0xf0]  ;;  %v4253_v53 = vld [vmem:[%s6321_s12 + $0x210] sm:$0xf]  ;;  %v4326_v57 = vor.u32 %v5434_v47, %v4325_v46 }
  0xa4   : > { %1155 = vmatpush.bf16.msra.mxu2 %v4114_v56  ;;  %v5416_v54 = vld [vmem:[%s6321_s12 + $0x214] sm:$0xf0]  ;;  %v5351_v55 = vld [vmem:[%s6321_s12 + $0x14] sm:$0xf]  ;;  %v3999_v56 = vld [vmem:[%s6321_s12 + $0x18] sm:$0xf0]  ;;  %v4074_v58 = vor.u32 %v5369_v50, %v4071_v51 }
  0xa5   : > { %1143 = vmatpush.bf16.msrb.mxu3 %v4042_v61  ;;  %v4317_v60 = vld [vmem:[%s6321_s12 + $0x290] sm:$0xf]  ;;  %v5432_v61 = vld [vmem:[%s6321_s12 + $0x294] sm:$0xf0]  ;;  %v5367_v62 = vld [vmem:[%s6321_s12 + $0x94] sm:$0xf]  ;;  %v4254_v63 = vor.u32 %v5416_v54, %v4253_v53  ;;  %v4002_v0 = vor.u32 %v5351_v55, %v3999_v56 }
  0xa6   : > { %1117 = vmatpush.bf16.msrb.mxu1 %v4358_v6  ;;  %v4063_v1 = vld [vmem:[%s6321_s12 + $0x98] sm:$0xf0]  ;;  %v4245_v2 = vld [vmem:[%s6321_s12 + $0x200] sm:$0xf]  ;;  %v5414_v3 = vld [vmem:[%s6321_s12 + $0x204] sm:$0xf0]  ;;  %v4318_v9 = vor.u32 %v5432_v61, %v4317_v60 }
  0xa7   : > { %1105 = vmatpush.bf16.msrb.mxu0 %v4286_v10  ;;  %v5349_v6 = vld [vmem:[%s6321_s12 + $0x4] sm:$0xf]  ;;  %v5395_v8 = vld [vmem:[%s6321_s12 + $0x174] sm:$0xf]  ;;  %v4175_v10 = vld [vmem:[%s6321_s12 + $0x178] sm:$0xf0]  ;;  %v4066_v13 = vor.u32 %v5367_v62, %v4063_v1  ;;  %v4246_v17 = vor.u32 %v5414_v3, %v4245_v2 }
  0xa8   : > { %1156 = vmatpush.bf16.msra.mxu2 %v4106_v7  ;;  %v3991_v7 = vld [vmem:[%s6321_s12 + $0x8] sm:$0xf0]  ;;  %v4303_v12 = vld [vmem:[%s6321_s12 + $0x278] sm:$0xf0]  ;;  %v4309_v14 = vld [vmem:[%s6321_s12 + $0x280] sm:$0xf] }
  0xa9   : > { %1144 = vmatpush.bf16.msrb.mxu3 %v4034_v11  ;;  %v5427_v11 = vld [vmem:[%s6321_s12 + $0x274] sm:$0xf]  ;;  %v5430_v15 = vld [vmem:[%s6321_s12 + $0x284] sm:$0xf0]  ;;  %v4055_v20 = vld [vmem:[%s6321_s12 + $0x88] sm:$0xf0] }
  0xaa   : > { %1118 = vmatpush.bf16.msrb.mxu1 %v4350_v18  ;;  %v449_v16 = vld [vmem:[#allocation3 + $0x20] sm:$0xff]  ;;  %v3994_v18 = vor.u32 %v5349_v6, %v3991_v7  ;;  %v5411_v21 = vld [vmem:[%s6321_s12 + $0x1f4] sm:$0xf]  ;;  %v4310_v27 = vor.u32 %v5430_v15, %v4309_v14  ;;  %v5393_v29 = vld [vmem:[%s6321_s12 + $0x164] sm:$0xf] }
  0xab   : > { %1106 = vmatpush.bf16.msrb.mxu0 %v4278_v22  ;;  %v4178_v22 = vor.u32 %v5395_v8, %v4175_v10  ;;  %v4239_v24 = vld [vmem:[%s6321_s12 + $0x1f8] sm:$0xf0]  ;;  %v5443_v25 = vld [vmem:[%s6321_s12 + $0x2f4] sm:$0xf]  ;;  %v5425_v33 = vld [vmem:[%s6321_s12 + $0x264] sm:$0xf] }
  0xac   : > { %1157 = vmatpush.bf16.msra.mxu2 %v4098_v19  ;;  %v5365_v19 = vld [vmem:[%s6321_s12 + $0x84] sm:$0xf]  ;;  %v4367_v26 = vld [vmem:[%s6321_s12 + $0x2f8] sm:$0xf0]  ;;  %v4295_v34 = vld [vmem:[%s6321_s12 + $0x268] sm:$0xf0] }
  0xad   : > { %1145 = vmatpush.bf16.msrb.mxu3 %v4026_v23  ;;  %v4306_v23 = vor.u32 %v5427_v11, %v4303_v12  ;;  %v450_v28 = vld [vmem:[#allocation3 + $0x28] sm:$0xff]  ;;  %v4058_v32 = vor.u32 %v5365_v19, %v4055_v20  ;;  %v4231_v40 = vld [vmem:[%s6321_s12 + $0x1e8] sm:$0xf0]  ;;  %v4159_v46 = vld [vmem:[%s6321_s12 + $0x158] sm:$0xf0] }
  0xae   : > { %1119 = vmatpush.bf16.msrb.mxu1 %v4342_v30  ;;  %v4167_v30 = vld [vmem:[%s6321_s12 + $0x168] sm:$0xf0]  ;;  %v5409_v37 = vld [vmem:[%s6321_s12 + $0x1e4] sm:$0xf]  ;;  %v6506_v38 = vpack.c.bf16 %v450_v28, %v450_v28  ;;  %v5423_v47 = vld [vmem:[%s6321_s12 + $0x254] sm:$0xf] }
  0xaf   : > { %1107 = vmatpush.bf16.msrb.mxu0 %v4270_v35  ;;  %4379 = vmatmul.msk.bf16.vlgmr.msrb.gmra.mxu2 %vm1047_vm0, %v6467_v44  ;;  %v4242_v35 = vor.u32 %v5411_v21, %v4239_v24  ;;  %v4170_v39 = vor.u32 %v5393_v29, %v4167_v30  ;;  %v5441_v41 = vld [vmem:[%s6321_s12 + $0x2e4] sm:$0xf]  ;;  %v4359_v42 = vld [vmem:[%s6321_s12 + $0x2e8] sm:$0xf0]  ;;  %v5407_v51 = vld [vmem:[%s6321_s12 + $0x1d4] sm:$0xf] }
  0xb0   : > { %1158 = vmatpush.bf16.msra.mxu2 %v4090_v31  ;;  %v6501_v31 = vpack.c.bf16 %v449_v16, %v449_v16  ;;  %v4362_v50 = vor.u32 %v5441_v41, %v4359_v42  ;;  %v4223_v54 = vld [vmem:[%s6321_s12 + $0x1d8] sm:$0xf0]  ;;  %v5439_v55 = vld [vmem:[%s6321_s12 + $0x2d4] sm:$0xf]  ;;  %v4151_v60 = vld [vmem:[%s6321_s12 + $0x148] sm:$0xf0] }
  0xb1   : > { %1146 = vmatpush.bf16.msrb.mxu3 %v4018_v36  ;;  %v4370_v36 = vor.u32 %v5443_v25, %v4367_v26  ;;  %v4351_v56 = vld [vmem:[%s6321_s12 + $0x2d8] sm:$0xf0]  ;;  %v5421_v61 = vld [vmem:[%s6321_s12 + $0x244] sm:$0xf]  ;;  %v4279_v62 = vld [vmem:[%s6321_s12 + $0x248] sm:$0xf0] }
  0xb2   : > { %1120 = vmatpush.bf16.msrb.mxu1 %v4334_v43  ;;  %v4298_v43 = vor.u32 %v5425_v33, %v4295_v34  ;;  %v5405_v1 = vld [vmem:[%s6321_s12 + $0x1c4] sm:$0xf]  ;;  %v4215_v3 = vld [vmem:[%s6321_s12 + $0x1c8] sm:$0xf0]  ;;  %v4282_v7 = vor.u32 %v5421_v61, %v4279_v62  ;;  %v5387_v8 = vld [vmem:[%s6321_s12 + $0x134] sm:$0xf] }
  0xb3   : > { %1108 = vmatpush.bf16.msrb.mxu0 %v4262_v48  ;;  %v4287_v48 = vld [vmem:[%s6321_s12 + $0x258] sm:$0xf0]  ;;  %v5437_v6 = vld [vmem:[%s6321_s12 + $0x2c4] sm:$0xf]  ;;  %v4218_v11 = vor.u32 %v5405_v1, %v4215_v3  ;;  %v5435_v16 = vld [vmem:[%s6321_s12 + $0x2b4] sm:$0xf] }
  0xb4   : > { %1159 = vmatpush.bf16.msra.mxu2 %v4082_v45  ;;  %v5391_v45 = vld [vmem:[%s6321_s12 + $0x154] sm:$0xf]  ;;  %v4271_v10 = vld [vmem:[%s6321_s12 + $0x238] sm:$0xf0]  ;;  %v5385_v19 = vld [vmem:[%s6321_s12 + $0x124] sm:$0xf] }
  0xb5   : > { %1147 = vmatpush.bf16.msrb.mxu3 %v4010_v49  ;;  %v4234_v49 = vor.u32 %v5409_v37, %v4231_v40  ;;  %v4162_v53 = vor.u32 %v5391_v45, %v4159_v46  ;;  %v4207_v15 = vld [vmem:[%s6321_s12 + $0x1b8] sm:$0xf0]  ;;  %v4135_v20 = vld [vmem:[%s6321_s12 + $0x128] sm:$0xf0]  ;;  %v5417_v21 = vld [vmem:[%s6321_s12 + $0x224] sm:$0xf] }
  0xb6   : > { %1121 = vmatpush.bf16.msrb.mxu1 %v4326_v57  ;;  %v4290_v57 = vor.u32 %v5423_v47, %v4287_v48  ;;  %v5401_v25 = vld [vmem:[%s6321_s12 + $0x1a4] sm:$0xf]  ;;  %v4138_v26 = vor.u32 %v5385_v19, %v4135_v20  ;;  %v4327_v29 = vld [vmem:[%s6321_s12 + $0x2a8] sm:$0xf0]  ;;  %v4127_v33 = vld [vmem:[%s6321_s12 + $0x118] sm:$0xf0] }
  0xb7   : > { %1109 = vmatpush.bf16.msrb.mxu0 %v4254_v63  ;;  %v4226_v63 = vor.u32 %v5407_v51, %v4223_v54  ;;  %v5433_v28 = vld [vmem:[%s6321_s12 + $0x2a4] sm:$0xf]  ;;  %v5415_v34 = vld [vmem:[%s6321_s12 + $0x214] sm:$0xf]  ;;  %v4191_v41 = vld [vmem:[%s6321_s12 + $0x198] sm:$0xf0] }
  0xb8   : > { %1160 = vmatpush.bf16.msra.mxu2 %v4074_v58  ;;  %v5389_v58 = vld [vmem:[%s6321_s12 + $0x144] sm:$0xf]  ;;  %v4330_v37 = vor.u32 %v5433_v28, %v4327_v29  ;;  %v5431_v42 = vld [vmem:[%s6321_s12 + $0x294] sm:$0xf]  ;;  %v4119_v47 = vld [vmem:[%s6321_s12 + $0x108] sm:$0xf0] }
  0xb9   : > { %1148 = vmatpush.bf16.msrb.mxu3 %v4002_v0  ;;  %v4354_v0 = vor.u32 %v5439_v55, %v4351_v56  ;;  %v4154_v2 = vor.u32 %v5389_v58, %v4151_v60  ;;  %v5381_v46 = vld [vmem:[%s6321_s12 + $0x104] sm:$0xf]  ;;  %v4375_v51 = vld [vmem:[%s6321_s12 + $0x308] sm:$0xf0]  ;;  %v4664_v28 = vld [vmem:[%s6329_s23 + $0x230] sm:$0xf] }
  0xba   : > { %1122 = vmatpush.bf16.msrb.mxu1 %v4318_v9  ;;  %v5419_v9 = vld [vmem:[%s6321_s12 + $0x234] sm:$0xf]  ;;  %v5413_v48 = vld [vmem:[%s6321_s12 + $0x204] sm:$0xf]  ;;  %v4122_v55 = vor.u32 %v5381_v46, %v4119_v47  ;;  %v4311_v61 = vld [vmem:[%s6321_s12 + $0x288] sm:$0xf0] }
  0xbb   : > { %1110 = vmatpush.bf16.msrb.mxu0 %v4246_v17  ;;  %v4335_v17 = vld [vmem:[%s6321_s12 + $0x2b8] sm:$0xf0]  ;;  %v5397_v56 = vld [vmem:[%s6321_s12 + $0x184] sm:$0xf]  ;;  %v5522_v29 = vld [vmem:[%s6329_s23 + $0x254] sm:$0xf0] }
  0xbc   : > { %1161 = vmatpush.bf16.msra.mxu2 %v4066_v13  ;;  %v5403_v13 = vld [vmem:[%s6321_s12 + $0x1b4] sm:$0xf]  ;;  %v4338_v24 = vor.u32 %v5435_v16, %v4335_v17  ;;  %v5429_v60 = vld [vmem:[%s6321_s12 + $0x284] sm:$0xf]  ;;  %v5512_v46 = vld [vmem:[%s6329_s23 + $0x204] sm:$0xf0] }
  0xbd   : > { %1149 = vmatpush.bf16.msrb.mxu3 %v3994_v18  ;;  %v4274_v18 = vor.u32 %v5419_v9, %v4271_v10  ;;  %v4944_v47 = vld [vmem:[%s6329_s23 + $0x460] sm:$0xf] }
  0xbe   : > { %1123 = vmatpush.bf16.msrb.mxu1 %v4310_v27  ;;  %1111 = vmatmul.bf16.vlgmr.msrb.gmra.mxu0 %v6501_v31  ;;  %v4199_v27 = vld [vmem:[%s6321_s12 + $0x1a8] sm:$0xf0] }
  0xbf   : > { %1168 = vmatpush.bf16.msra.mxu0 %v4178_v22  ;;  %v4263_v22 = vld [vmem:[%s6321_s12 + $0x228] sm:$0xf0] }
  0xc0   : > { %1162 = vmatpush.bf16.msra.mxu2 %v4058_v32  ;;  %1150 = vmatmul.bf16.vlgmr.msrb.gmra.mxu3 %v6435_v4  ;;  %v4143_v4 = vld [vmem:[%s6321_s12 + $0x138] sm:$0xf0]  ;;  %v4266_v30 = vor.u32 %v5417_v21, %v4263_v22  ;;  %v5383_v32 = vld [vmem:[%s6321_s12 + $0x114] sm:$0xf] }
  0xc1   : > { %1194 = vmatpush.bf16.msra.mxu3 %v4306_v23  ;;  %1124 = vmatmul.bf16.vlgmr.msrb.gmra.mxu1 %v6506_v38  ;;  %v4146_v14 = vor.u32 %v5387_v8, %v4143_v4  ;;  %v4210_v23 = vor.u32 %v5403_v13, %v4207_v15  ;;  %v4130_v40 = vor.u32 %v5383_v32, %v4127_v33  ;;  %v5602_v33 = vld [vmem:[%s6329_s23 + $0x4d4] sm:$0xf0] }
  0xc2   : > { %1181 = vmatpush.bf16.msra.mxu1 %v4242_v35  ;;  %v4255_v35 = vld [vmem:[%s6321_s12 + $0x218] sm:$0xf0]  ;;  %v4665_v32 = vor.u32 %v5522_v29, %v4664_v28  ;;  %v5562_v29 = vld [vmem:[%s6329_s23 + $0x394] sm:$0xf0] }
  0xc3   : > { %1169 = vmatpush.bf16.msra.mxu0 %v4170_v39  ;;  %1163 = vmatmul.bf16.vlgmr.msra.gmra.mxu2 %v6437_v5  ;;  %v4343_v5 = vld [vmem:[%s6321_s12 + $0x2c8] sm:$0xf0]  ;;  %v5399_v39 = vld [vmem:[%s6321_s12 + $0x194] sm:$0xf]  ;;  %v4258_v45 = vor.u32 %v5415_v34, %v4255_v35 }
  0xc4   : > { %1207 = vmatpush.bf16.msrb.mxu2 %v4370_v36  ;;  %v4346_v12 = vor.u32 %v5437_v6, %v4343_v5  ;;  %v4202_v36 = vor.u32 %v5401_v25, %v4199_v27  ;;  %v5517_v34 = vld [vmem:[%s6329_s23 + $0x234] sm:$0xf] }
  0xc5   : > { %1195 = vmatpush.bf16.msra.mxu3 %v4298_v43  ;;  %v4319_v43 = vld [vmem:[%s6321_s12 + $0x298] sm:$0xf0] }
  0xc6   : > { %1182 = vmatpush.bf16.msra.mxu1 %v4234_v49  ;;  %v4247_v49 = vld [vmem:[%s6321_s12 + $0x208] sm:$0xf0]  ;;  %v4322_v54 = vor.u32 %v5431_v42, %v4319_v43 }
  0xc7   : > { %1170 = vmatpush.bf16.msra.mxu0 %v4162_v53  ;;  %v4194_v53 = vor.u32 %v5399_v39, %v4191_v41  ;;  %v4250_v58 = vor.u32 %v5413_v48, %v4247_v49  ;;  %v4986_v39 = vld [vmem:[%s6329_s23 + $0x4d8] sm:$0xf0]  ;;  %v5592_v49 = vld [vmem:[%s6329_s23 + $0x484] sm:$0xf0] }
  0xc8   : > { %1208 = vmatpush.bf16.msrb.mxu2 %v4362_v50  ;;  %v5445_v50 = vld [vmem:[%s6321_s12 + $0x304] sm:$0xf] }
  0xc9   : > { %1196 = vmatpush.bf16.msra.mxu3 %v4290_v57  ;;  %v4183_v57 = vld [vmem:[%s6321_s12 + $0x188] sm:$0xf0]  ;;  %v4378_v62 = vor.u32 %v5445_v50, %v4375_v51  ;;  %v4626_v51 = vld [vmem:[%s6329_s23 + $0x208] sm:$0xf0] }
  0xca   : > { %1183 = vmatpush.bf16.msra.mxu1 %v4226_v63  ;;  %v4186_v63 = vor.u32 %v5397_v56, %v4183_v57  ;;  %v5507_v50 = vld [vmem:[%s6329_s23 + $0x1e4] sm:$0xf]  ;;  %v4946_v56 = vld [vmem:[%s6329_s23 + $0x488] sm:$0xf0] }
  0xcb   : > { %1171 = vmatpush.bf16.msra.mxu0 %v4154_v2 }
  0xcc   : > { %1209 = vmatpush.bf16.msrb.mxu2 %v4354_v0  ;;  %v4314_v0 = vor.u32 %v5429_v60, %v4311_v61  ;;  %v4584_v61 = vld [vmem:[%s6329_s23 + $0x190] sm:$0xf] }
  0xcd   : > { %1197 = vmatpush.bf16.msra.mxu3 %v4282_v7 }
  0xce   : > { %1184 = vmatpush.bf16.msra.mxu1 %v4218_v11 }
  0xcf   : > { %1172 = vmatpush.bf16.msra.mxu0 %v4146_v14 }
  0xd0   : > { %1210 = vmatpush.bf16.msrb.mxu2 %v4346_v12 }
  0xd1   : > { %1198 = vmatpush.bf16.msra.mxu3 %v4274_v18 }
  0xd2   : > { %1185 = vmatpush.bf16.msra.mxu1 %v4210_v23 }
  0xd3   : > { %1173 = vmatpush.bf16.msra.mxu0 %v4138_v26 }
  0xd4   : > { %1211 = vmatpush.bf16.msrb.mxu2 %v4338_v24 }
  0xd5   : > { %1199 = vmatpush.bf16.msra.mxu3 %v4266_v30  ;;  %v4984_v30 = vld [vmem:[%s6329_s23 + $0x4b0] sm:$0xf] }
  0xd6   : > { %1186 = vmatpush.bf16.msra.mxu1 %v4202_v36  ;;  %v4985_v35 = vor.u32 %v5602_v33, %v4984_v30  ;;  %v4666_v36 = vld [vmem:[%s6329_s23 + $0x258] sm:$0xf0]  ;;  %v5477_v30 = vld [vmem:[%s6329_s23 + $0xf4] sm:$0xf] }
  0xd7   : > { %1174 = vmatpush.bf16.msra.mxu0 %v4130_v40  ;;  %v4669_v42 = vor.u32 %v5517_v34, %v4666_v36  ;;  %v5557_v36 = vld [vmem:[%s6329_s23 + $0x374] sm:$0xf] }
  0xd8   : > { %1212 = vmatpush.bf16.msrb.mxu2 %v4330_v37  ;;  %v5597_v37 = vld [vmem:[%s6329_s23 + $0x4b4] sm:$0xf] }
  0xd9   : > { %1200 = vmatpush.bf16.msra.mxu3 %v4258_v45  ;;  %v4989_v43 = vor.u32 %v5597_v37, %v4986_v39  ;;  %v4624_v45 = vld [vmem:[%s6329_s23 + $0x1e0] sm:$0xf]  ;;  %v4826_v37 = vld [vmem:[%s6329_s23 + $0x398] sm:$0xf0] }
  0xda   : > { %1187 = vmatpush.bf16.msra.mxu1 %v4194_v53  ;;  %v4625_v48 = vor.u32 %v5512_v46, %v4624_v45  ;;  %v4945_v53 = vor.u32 %v5592_v49, %v4944_v47  ;;  %v5472_v45 = vld [vmem:[%s6329_s23 + $0xc4] sm:$0xf0]  ;;  %v4784_v46 = vld [vmem:[%s6329_s23 + $0x320] sm:$0xf] }
  0xdb   : > { %1175 = vmatpush.bf16.msra.mxu0 %v4122_v55  ;;  %v5587_v55 = vld [vmem:[%s6329_s23 + $0x464] sm:$0xf]  ;;  %v5552_v49 = vld [vmem:[%s6329_s23 + $0x344] sm:$0xf0] }
  0xdc   : > { %1213 = vmatpush.bf16.msrb.mxu2 %v4322_v54  ;;  %v4629_v54 = vor.u32 %v5507_v50, %v4626_v51  ;;  %v4949_v60 = vor.u32 %v5587_v55, %v4946_v56  ;;  %v5467_v50 = vld [vmem:[%s6329_s23 + $0xa4] sm:$0xf]  ;;  %v4466_v51 = vld [vmem:[%s6329_s23 + $0xc8] sm:$0xf0]  ;;  %v4785_v55 = vor.u32 %v5552_v49, %v4784_v46  ;;  %v4632_v46 = vld [vmem:[%s6329_s23 + $0x1e8] sm:$0xf] }
  0xdd   : > { %1201 = vmatpush.bf16.msra.mxu3 %v4250_v58  ;;  %v4469_v56 = vor.u32 %v5467_v50, %v4466_v51  ;;  %v4952_v50 = vld [vmem:[%s6329_s23 + $0x468] sm:$0xf]  ;;  %v5593_v51 = vld [vmem:[%s6329_s23 + $0x48c] sm:$0xf0] }
  0xde   : > { %1188 = vmatpush.bf16.msra.mxu1 %v4186_v63  ;;  %1176 = vmatmul.bf16.vlgmr.msra.gmra.mxu0 %v6423_v52  ;;  %v4904_v63 = vld [vmem:[%s6329_s23 + $0x410] sm:$0xf] }
  0xdf   : > { %1227 = vmatpush.bf16.msrb.mxu0 %v4378_v62  ;;  %v5502_v62 = vld [vmem:[%s6329_s23 + $0x1b4] sm:$0xf0] }
  0xe0   : > { %1202 = vmatmul.bf16.vlgmr.msra.gmra.mxu3 %v6501_v31  ;;  %1214 = vmatpush.bf16.msrb.mxu2 %v4314_v0  ;;  %v4585_v0 = vor.u32 %v5502_v62, %v4584_v61  ;;  %v4424_v62 = vld [vmem:[%s6329_s23 + $0x50] sm:$0xf] }
  0xe1   : > { %1189 = vmatmul.bf16.vlgmr.msra.gmra.mxu1 %v6427_v59  ;;  %2310 = vmatpush.bf16.msrb.mxu3 %v4985_v35 }
  0xe2   : > { %2297 = vmatpush.bf16.msrb.mxu1 %v4665_v32  ;;  %v4506_v32 = vld [vmem:[%s6329_s23 + $0x118] sm:$0xf0] }
  0xe3   : > { %1215 = vmatmul.bf16.vlgmr.msrb.gmra.mxu2 %v6506_v38  ;;  %2323 = vmatpush.bf16.msra.mxu0 %v4669_v42  ;;  %v4509_v35 = vor.u32 %v5477_v30, %v4506_v32 }
  0xe4   : > { %2336 = vmatpush.bf16.msra.mxu2 %v4989_v43  ;;  %v4464_v43 = vld [vmem:[%s6329_s23 + $0xa0] sm:$0xf] }
  0xe5   : > { %2311 = vmatpush.bf16.msrb.mxu3 %v4945_v53 }
  0xe6   : > { %2298 = vmatpush.bf16.msrb.mxu1 %v4625_v48  ;;  %v4465_v48 = vor.u32 %v5472_v45, %v4464_v43 }
  0xe7   : > { %2324 = vmatpush.bf16.msra.mxu0 %v4629_v54 }
  0xe8   : > { %2337 = vmatpush.bf16.msra.mxu2 %v4949_v60 }
  0xea   : > { %2299 = vmatpush.bf16.msrb.mxu1 %v4585_v0 }
  0xee   : > { %4380 = vmatmul.msk.bf16.vlgmr.msrb.gmra.mxu0 %vm1047_vm0, %v6467_v44 }
 0x11b   : > { %v1060_v1 = vpop.f32.mrf.mxu0 }
 0x11e   : > { %v1073_v2 = vpop.f32.mrf.mxu1 }
 0x11f   : > { %v1074_v9 = vadd.f32 %v1073_v2, %v1060_v1  ;;  %v5582_v1 = vld [vmem:[%s6329_s23 + $0x434] sm:$0xf0]  ;;  %v5497_v2 = vld [vmem:[%s6329_s23 + $0x194] sm:$0xf] }
 0x122   : > { %v1086_v3 = vpop.f32.mrf.mxu2 }
 0x123   : > { %v1099_v6 = vpop.f32.mrf.mxu3  ;;  %v1062_v5 = vpop.f32.mrf.mxu0  ;;  %v1087_v10 = vadd.f32 %v1086_v3, %v1074_v9  ;;  %v4905_v3 = vor.u32 %v5582_v1, %v4904_v63  ;;  %v5462_v63 = vld [vmem:[%s6329_s23 + $0x74] sm:$0xf0]  ;;  %v4744_v1 = vld [vmem:[%s6329_s23 + $0x2d0] sm:$0xf] }
 0x124   : > { %v5577_v5 = vld [vmem:[%s6329_s23 + $0x414] sm:$0xf]  ;;  %v4425_v0 = vor.u32 %v5462_v63, %v4424_v62  ;;  %v4592_v62 = vld [vmem:[%s6329_s23 + $0x198] sm:$0xf]  ;;  %v5503_v63 = vld [vmem:[%s6329_s23 + $0x1bc] sm:$0xf0] }
 0x125   : > { %v1100_v31 = vadd.f32 %v1099_v6, %v1087_v10  ;;  %v4586_v6 = vld [vmem:[%s6329_s23 + $0x1b8] sm:$0xf0]  ;;  %2312 = vmatpush.bf16.msrb.mxu3 %v4905_v3  ;;  %v5457_v3 = vld [vmem:[%s6329_s23 + $0x54] sm:$0xf] }
 0x126   : > { %v1075_v7 = vpop.f32.mrf.mxu1 }
 0x127   : > { %v4906_v7 = vld [vmem:[%s6329_s23 + $0x438] sm:$0xf0] }
 0x128   : > { %v4909_v10 = vor.u32 %v5577_v5, %v4906_v7 }
 0x12a   : > { %v1088_v8 = vpop.f32.mrf.mxu2  ;;  %2338 = vmatpush.bf16.msra.mxu2 %v4909_v10 }
 0x12b   : > { %v1101_v4 = vpop.f32.mrf.mxu3 }
 0x132   : > { %v1138_v52 = vpop.f32.mrf.mxu2 }
 0x13a   : > { %v1140_v59 = vpop.f32.mrf.mxu2 }
 0x13b   : > { %v1112_v11 = vpop.f32.mrf.mxu0 }
 0x13c   : > { %v1113_v12 = vadd.f32 %v1112_v11, %v1100_v31  ;;  %v4544_v31 = vld [vmem:[%s6329_s23 + $0x140] sm:$0xf]  ;;  %v5492_v11 = vld [vmem:[%s6329_s23 + $0x164] sm:$0xf0] }
 0x13d   : > { %v4545_v59 = vor.u32 %v5492_v11, %v4544_v31 }
 0x13e   : > { %v1125_v13 = vpop.f32.mrf.mxu1 }
 0x13f   : > { %v1126_v38 = vadd.f32 %v1125_v13, %v1113_v12  ;;  %v4864_v12 = vld [vmem:[%s6329_s23 + $0x3c0] sm:$0xf]  ;;  %v5572_v13 = vld [vmem:[%s6329_s23 + $0x3e4] sm:$0xf0]  ;;  %2300 = vmatpush.bf16.msrb.mxu1 %v4545_v59 }
 0x141   : > { %v6571_v14 = vadd.f32 %v1138_v52, %v1126_v38  ;;  %v4589_v52 = vor.u32 %v5497_v2, %v4586_v6  ;;  %v5487_v38 = vld [vmem:[%s6329_s23 + $0x144] sm:$0xf]  ;;  %v5542_v2 = vld [vmem:[%s6329_s23 + $0x2f4] sm:$0xf0] }
 0x142   : > { %v4745_v7 = vor.u32 %v5542_v2, %v4744_v1 }
 0x143   : > { %v1236_v44 = vrot.slane %v6571_v14, 4  ;;  %v1250_v15 = vmul.f32 %v6571_v14, %v6571_v14  ;;  %v1114_v16 = vpop.f32.mrf.mxu0  ;;  %v6579_v20 = vpop.f32.mrf.mxu3  ;;  %2325 = vmatpush.bf16.msra.mxu0 %v4589_v52  ;;  %v4746_v52 = vld [vmem:[%s6329_s23 + $0x2f8] sm:$0xf0] }
 0x145   : > { %v1237_v17 = vadd.f32 %v1236_v44, %v6571_v14  ;;  %v1252_v18 = vrot.slane %v1250_v15, 4  ;;  %v4546_v44 = vld [vmem:[%s6329_s23 + $0x168] sm:$0xf0] }
 0x146   : > { %v6577_v19 = vpop.f32.mrf.mxu2  ;;  %v1127_v21 = vpop.f32.mrf.mxu1 }
 0x147   : > { %v1238_v22 = vrot.slane %v1237_v17, 2  ;;  %v1253_v23 = vadd.f32 %v1252_v18, %v1250_v15  ;;  %v1165_v15 = vadd.f32 %v6577_v19, %v6579_v20  ;;  %v4549_v18 = vor.u32 %v5487_v38, %v4546_v44  ;;  %v5567_v21 = vld [vmem:[%s6329_s23 + $0x3c4] sm:$0xf]  ;;  %v5482_v19 = vld [vmem:[%s6329_s23 + $0x114] sm:$0xf0] }
 0x148   : > { %v4824_v20 = vld [vmem:[%s6329_s23 + $0x370] sm:$0xf]  ;;  %v5452_v38 = vld [vmem:[%s6329_s23 + $0x24] sm:$0xf0]  ;;  %v4704_v44 = vld [vmem:[%s6329_s23 + $0x280] sm:$0xf] }
 0x149   : > { %v1239_v24 = vadd.f32 %v1238_v22, %v1237_v17  ;;  %v1254_v25 = vrot.slane %v1253_v23, 2  ;;  %v4865_v17 = vor.u32 %v5572_v13, %v4864_v12  ;;  %v4866_v22 = vld [vmem:[%s6329_s23 + $0x3e8] sm:$0xf0]  ;;  %2326 = vmatpush.bf16.msra.mxu0 %v4549_v18  ;;  %v4825_v34 = vor.u32 %v5562_v29, %v4824_v20  ;;  %v4384_v13 = vld [vmem:[%s6329_s23] sm:$0xf] }
 0x14a   : > { %v5447_v18 = vld [vmem:[%s6329_s23 + $0x4] sm:$0xf]  ;;  %v4672_v20 = vld [vmem:[%s6329_s23 + $0x238] sm:$0xf] }
 0x14b   : > { %v1153_v27 = vpop.f32.mrf.mxu3  ;;  %v1240_v40 = vrot.slane %v1239_v24, 1  ;;  %v1255_v41 = vadd.f32 %v1254_v25, %v1253_v23  ;;  %v4869_v25 = vor.u32 %v5567_v21, %v4866_v22  ;;  %2313 = vmatpush.bf16.msrb.mxu3 %v4865_v17  ;;  %v5532_v17 = vld [vmem:[%s6329_s23 + $0x2a4] sm:$0xf0]  ;;  %v4386_v21 = vld [vmem:[%s6329_s23 + $0x28] sm:$0xf0] }
 0x14c   : > { %v4504_v27 = vld [vmem:[%s6329_s23 + $0xf0] sm:$0xf]  ;;  %v4992_v29 = vld [vmem:[%s6329_s23 + $0x4b8] sm:$0xf] }
 0x14d   : > { %v1241_v57 = vadd.f32 %v1240_v40, %v1239_v24  ;;  %v1256_v58 = vrot.slane %v1255_v41, 1  ;;  %2339 = vmatpush.bf16.msra.mxu2 %v4869_v25  ;;  %v4505_v28 = vor.u32 %v5482_v19, %v4504_v27  ;;  %2327 = vmatpush.bf16.msra.mxu0 %v4509_v35  ;;  %v4389_v25 = vor.u32 %v5447_v18, %v4386_v21  ;;  %v4706_v27 = vld [vmem:[%s6329_s23 + $0x2a8] sm:$0xf0]  ;;  %v5518_v35 = vld [vmem:[%s6329_s23 + $0x23c] sm:$0xf] }
 0x14e   : > { %v1166_v26 = vpop.f32.mrf.mxu2 }
 0x14f   : > { %v6605_v8 = vmul.f32 0.125, %v1241_v57  ;;  %v1257_v4 = vadd.f32 %v1256_v58, %v1255_v41  ;;  %2301 = vmatpush.bf16.msrb.mxu1 %v4505_v28  ;;  %v4829_v41 = vor.u32 %v5557_v36, %v4826_v37  ;;  %2314 = vmatpush.bf16.msrb.mxu3 %v4825_v34  ;;  %v5547_v57 = vld [vmem:[%s6329_s23 + $0x324] sm:$0xf]  ;;  %v4786_v58 = vld [vmem:[%s6329_s23 + $0x348] sm:$0xf0] }
 0x150   : > { %v4789_v61 = vor.u32 %v5547_v57, %v4786_v58  ;;  %v5523_v28 = vld [vmem:[%s6329_s23 + $0x25c] sm:$0xf0]  ;;  %v4674_v37 = vld [vmem:[%s6329_s23 + $0x260] sm:$0xf0]  ;;  %v4634_v57 = vld [vmem:[%s6329_s23 + $0x210] sm:$0xf0] }
 0x151   : > { %v1264_v23 = vmul.f32 0.125, %v1257_v4  ;;  %v1266_v24 = vmul.f32 %v6605_v8, %v6605_v8  ;;  %2340 = vmatpush.bf16.msra.mxu2 %v4829_v41  ;;  %2328 = vmatpush.bf16.msra.mxu0 %v4469_v56  ;;  %v4426_v4 = vld [vmem:[%s6329_s23 + $0x78] sm:$0xf0]  ;;  %v5603_v34 = vld [vmem:[%s6329_s23 + $0x4dc] sm:$0xf0]  ;;  %v4677_v43 = vor.u32 %v5518_v35, %v4674_v37  ;;  %v4953_v56 = vor.u32 %v5593_v51, %v4952_v50 }
 0x152   : > { %v4429_v11 = vor.u32 %v5457_v3, %v4426_v4  ;;  %v4993_v36 = vor.u32 %v5603_v34, %v4992_v29  ;;  %v5588_v58 = vld [vmem:[%s6329_s23 + $0x46c] sm:$0xf]  ;;  %v4912_v3 = vld [vmem:[%s6329_s23 + $0x418] sm:$0xf]  ;;  %v5498_v4 = vld [vmem:[%s6329_s23 + $0x19c] sm:$0xf] }
 0x153   : > { %v1268_v39 = vsub.f32 %v1264_v23, %v1266_v24  ;;  %2302 = vmatpush.bf16.msrb.mxu1 %v4465_v48  ;;  %2315 = vmatpush.bf16.msrb.mxu3 %v4785_v55  ;;  %v4705_v24 = vor.u32 %v5532_v17, %v4704_v44  ;;  %v4552_v44 = vld [vmem:[%s6329_s23 + $0x148] sm:$0xf]  ;;  %v5478_v37 = vld [vmem:[%s6329_s23 + $0xfc] sm:$0xf] }
 0x154   : > { %v4792_v50 = vld [vmem:[%s6329_s23 + $0x328] sm:$0xf] }
 0x155   : > { %v1270_v60 = vmax.f32 %v1268_v39, 0.0  ;;  %2341 = vmatpush.bf16.msra.mxu2 %v4789_v61  ;;  %2329 = vmatpush.bf16.msra.mxu0 %v4429_v11  ;;  %v5598_v39 = vld [vmem:[%s6329_s23 + $0x4bc] sm:$0xf]  ;;  %v4954_v61 = vld [vmem:[%s6329_s23 + $0x490] sm:$0xf0] }
 0x156   : > { %v4957_v2 = vor.u32 %v5588_v58, %v4954_v61  ;;  %v4474_v58 = vld [vmem:[%s6329_s23 + $0xd0] sm:$0xf0] }
 0x157   : > { %v6643_v10 = vadd.f32 1e-05, %v1270_v60  ;;  %2303 = vmatpush.bf16.msrb.mxu1 %v4425_v0  ;;  %2316 = vmatpush.bf16.msrb.mxu3 %v4745_v7  ;;  %v4794_v61 = vld [vmem:[%s6329_s23 + $0x350] sm:$0xf0] }
 0x159   : > { %2330 = vmatpush.bf16.msra.mxu0 %v4389_v25  ;;  %5796 = vrsqrt.f32 %v6643_v10  ;;  %v4554_v25 = vld [vmem:[%s6329_s23 + $0x170] sm:$0xf0]  ;;  %vm1280_vm5 = vweird.f32 %v6643_v10 }
 0x15b   : > { %v1177_v9 = vpop.f32.mrf.mxu0  ;;  %2317 = vmatpush.bf16.msrb.mxu3 %v4705_v24 }
 0x15c   : > { %v1178_v26 = vadd.f32 %v1177_v9, %v1165_v15  ;;  %v5537_v9 = vld [vmem:[%s6329_s23 + $0x2d4] sm:$0xf] }
 0x15d   : > { %v4749_v12 = vor.u32 %v5537_v9, %v4746_v52  ;;  %2375 = vmatpush.bf16.msrb.mxu0 %v4677_v43  ;;  %v4594_v9 = vld [vmem:[%s6329_s23 + $0x1c0] sm:$0xf0]  ;;  %v5578_v52 = vld [vmem:[%s6329_s23 + $0x41c] sm:$0xf] }
 0x15e   : > { %v1190_v16 = vpop.f32.mrf.mxu1 }
 0x15f   : > { %v1191_v42 = vadd.f32 %v1190_v16, %v1178_v26  ;;  %2342 = vmatpush.bf16.msra.mxu2 %v4749_v12  ;;  %v4385_v16 = vor.u32 %v5452_v38, %v4384_v13  ;;  %v5527_v26 = vld [vmem:[%s6329_s23 + $0x284] sm:$0xf]  ;;  %2362 = vmatpush.bf16.msra.mxu3 %v4993_v36  ;;  %v4597_v12 = vor.u32 %v5498_v4, %v4594_v9  ;;  %v5563_v36 = vld [vmem:[%s6329_s23 + $0x39c] sm:$0xf0]  ;;  %v6704_v43 = vpop.eup %5796 }
 0x160   : > { %v4709_v19 = vor.u32 %v5527_v26, %v4706_v27  ;;  %v4914_v13 = vld [vmem:[%s6329_s23 + $0x440] sm:$0xf0]  ;;  %v5568_v26 = vld [vmem:[%s6329_s23 + $0x3cc] sm:$0xf]  ;;  %v4874_v27 = vld [vmem:[%s6329_s23 + $0x3f0] sm:$0xf0]  ;;  %vm1281_vm2 = vweird.f32 %v6704_v43 }
 0x161   : > { %2304 = vmatpush.bf16.msrb.mxu1 %v4385_v16  ;;  %v4917_v38 = vor.u32 %v5578_v52, %v4914_v13  ;;  %v4872_v16 = vld [vmem:[%s6329_s23 + $0x3c8] sm:$0xf]  ;;  %v4877_v29 = vor.u32 %v5568_v26, %v4874_v27  ;;  %v5538_v52 = vld [vmem:[%s6329_s23 + $0x2dc] sm:$0xf]  ;;  %v5528_v26 = vld [vmem:[%s6329_s23 + $0x28c] sm:$0xf] }
 0x162   : > { %v4392_v13 = vld [vmem:[%s6329_s23 + $0x8] sm:$0xf]  ;;  %v4714_v27 = vld [vmem:[%s6329_s23 + $0x2b0] sm:$0xf0]  ;;  %vm1282_vm7 = vmor %vm1280_vm5, %vm1281_vm2 }
 0x163   : > { %v1203_v33 = vpop.f32.mrf.mxu3  ;;  %v1179_v40 = vpop.f32.mrf.mxu0  ;;  %2343 = vmatpush.bf16.msra.mxu2 %v4709_v19  ;;  %2363 = vmatpush.bf16.msra.mxu3 %v4953_v56  ;;  %v1275_v56 = vmul.f32 %v6704_v43, %v6643_v10  ;;  %v4381_v10 = vld [vmem:[%s6327_s17 + $0x1] ss:$2 sm:$0x3] }
 0x164   : > { %v1204_v53 = vadd.f32 %v1203_v33, %v1191_v42  ;;  %v4673_v33 = vor.u32 %v5523_v28, %v4672_v20  ;;  %v4994_v40 = vld [vmem:[%s6329_s23 + $0x4e0] sm:$0xf0] }
 0x165   : > { %v4997_v45 = vor.u32 %v5598_v39, %v4994_v40  ;;  %v4514_v39 = vld [vmem:[%s6329_s23 + $0x120] sm:$0xf0]  ;;  %v1276_v4 = vmul.f32 %v6704_v43, %v1275_v56  ;;  %v4680_v56 = vld [vmem:[%s6329_s23 + $0x240] sm:$0xf] }
 0x166   : > { %v1216_v47 = vpop.f32.mrf.mxu2  ;;  %v1192_v54 = vpop.f32.mrf.mxu1  ;;  %2349 = vmatpush.bf16.msra.mxu1 %v4673_v33  ;;  %v4832_v33 = vld [vmem:[%s6329_s23 + $0x378] sm:$0xf] }
 0x167   : > { %v1217_v6 = vadd.f32 %v1216_v47, %v1204_v53  ;;  %v5513_v47 = vld [vmem:[%s6329_s23 + $0x20c] sm:$0xf0]  ;;  %v5508_v53 = vld [vmem:[%s6329_s23 + $0x1ec] sm:$0xf]  ;;  %2388 = vmatpush.bf16.msrb.mxu2 %v4997_v45  ;;  %v4833_v40 = vor.u32 %v5563_v36, %v4832_v33 }
 0x168   : > { %v4633_v49 = vor.u32 %v5513_v47, %v4632_v46  ;;  %v4637_v60 = vor.u32 %v5508_v53, %v4634_v57  ;;  %v4517_v46 = vor.u32 %v5478_v37, %v4514_v39  ;;  %v1233_v36 = vld [vmem:[%s6327_s17] ss:$2 sm:$0x3] }
 0x16a   : > { %2350 = vmatpush.bf16.msra.mxu1 %v4633_v49  ;;  %2376 = vmatpush.bf16.msrb.mxu0 %v4637_v60  ;;  %v5473_v49 = vld [vmem:[%s6329_s23 + $0xcc] sm:$0xf0]  ;;  %v5548_v60 = vld [vmem:[%s6329_s23 + $0x32c] sm:$0xf] }
 0x16b   : > { %v1205_v5 = vpop.f32.mrf.mxu3  ;;  %v1229_v31 = vpop.f32.mrf.mxu0  ;;  %2389 = vmatpush.bf16.msrb.mxu2 %v4957_v2  ;;  %v4752_v2 = vld [vmem:[%s6329_s23 + $0x2d8] sm:$0xf] }
 0x16c   : > { %v6645_v59 = vadd.f32 %v1229_v31, %v1217_v6  ;;  %v5583_v6 = vld [vmem:[%s6329_s23 + $0x43c] sm:$0xf0]  ;;  %v4593_v5 = vor.u32 %v5503_v63, %v4592_v62  ;;  %v4797_v63 = vor.u32 %v5548_v60, %v4794_v61  ;;  %v5519_v60 = vld [vmem:[%s6329_s23 + $0x244] sm:$0xf]  ;;  %v4682_v61 = vld [vmem:[%s6329_s23 + $0x268] sm:$0xf0] }
 0x16d   : > { %v4913_v7 = vor.u32 %v5583_v6, %v4912_v3  ;;  %v5543_v6 = vld [vmem:[%s6329_s23 + $0x2fc] sm:$0xf0] }
 0x16e   : > { %v1218_v15 = vpop.f32.mrf.mxu2  ;;  %v1242_v22 = vrot.slane %v6645_v59, 4  ;;  %v1251_v23 = vmul.f32 %v6645_v59, %v6645_v59  ;;  %2351 = vmatpush.bf16.msra.mxu1 %v4593_v5  ;;  %2377 = vmatpush.bf16.msrb.mxu0 %v4597_v12  ;;  %v5458_v5 = vld [vmem:[%s6329_s23 + $0x5c] sm:$0xf]  ;;  %v4753_v9 = vor.u32 %v5543_v6, %v4752_v2  ;;  %v4640_v6 = vld [vmem:[%s6329_s23 + $0x1f0] sm:$0xf] }
 0x16f   : > { %v5493_v15 = vld [vmem:[%s6329_s23 + $0x16c] sm:$0xf0]  ;;  %2364 = vmatpush.bf16.msra.mxu3 %v4913_v7  ;;  %2390 = vmatpush.bf16.msrb.mxu2 %v4917_v38  ;;  %v4434_v7 = vld [vmem:[%s6329_s23 + $0x80] sm:$0xf0] }
 0x170   : > { %v1243_v30 = vadd.f32 %v1242_v22, %v6645_v59  ;;  %v1258_v32 = vrot.slane %v1251_v23, 4  ;;  %v4553_v21 = vor.u32 %v5493_v15, %v4552_v44  ;;  %v5573_v22 = vld [vmem:[%s6329_s23 + $0x3ec] sm:$0xf0]  ;;  %v4712_v44 = vld [vmem:[%s6329_s23 + $0x288] sm:$0xf] }
 0x171   : > { %v4873_v24 = vor.u32 %v5573_v22, %v4872_v16  ;;  %v5453_v38 = vld [vmem:[%s6329_s23 + $0x2c] sm:$0xf0]  ;;  %v4394_v22 = vld [vmem:[%s6329_s23 + $0x30] sm:$0xf0] }
 0x172   : > { %v1244_v41 = vrot.slane %v1243_v30, 2  ;;  %v1259_v42 = vadd.f32 %v1258_v32, %v1251_v23  ;;  %v5488_v23 = vld [vmem:[%s6329_s23 + $0x14c] sm:$0xf]  ;;  %v5483_v32 = vld [vmem:[%s6329_s23 + $0x11c] sm:$0xf0]  ;;  %2352 = vmatpush.bf16.msra.mxu1 %v4553_v21  ;;  %v4393_v16 = vor.u32 %v5453_v38, %v4392_v13 }
 0x173   : > { %v1231_v48 = vpop.f32.mrf.mxu0  ;;  %v4557_v28 = vor.u32 %v5488_v23, %v4554_v25  ;;  %2365 = vmatpush.bf16.msra.mxu3 %v4873_v24  ;;  %2391 = vmatpush.bf16.msrb.mxu2 %v4877_v29  ;;  %v5448_v21 = vld [vmem:[%s6329_s23 + $0xc] sm:$0xf]  ;;  %v1277_v23 = vmul.f32 0.5, %v1276_v4  ;;  %v4962_v13 = vld [vmem:[%s6329_s23 + $0x498] sm:$0xf0] }
 0x174   : > { %v1245_v54 = vadd.f32 %v1244_v41, %v1243_v30  ;;  %v1260_v55 = vrot.slane %v1259_v42, 2  ;;  %v4512_v30 = vld [vmem:[%s6329_s23 + $0xf8] sm:$0xf]  ;;  %v5558_v41 = vld [vmem:[%s6329_s23 + $0x37c] sm:$0xf] }
 0x175   : > { %v4513_v35 = vor.u32 %v5483_v32, %v4512_v30  ;;  %2378 = vmatpush.bf16.msrb.mxu0 %v4557_v28  ;;  %v4472_v48 = vld [vmem:[%s6329_s23 + $0xa8] sm:$0xf]  ;;  %v1278_v29 = vsub.f32 1.5, %v1277_v23 }
 0x176   : > { %v1246_v0 = vrot.slane %v1245_v54, 1  ;;  %v1261_v1 = vadd.f32 %v1260_v55, %v1259_v42  ;;  %v4834_v42 = vld [vmem:[%s6329_s23 + $0x3a0] sm:$0xf0]  ;;  %v4473_v53 = vor.u32 %v5473_v49, %v4472_v48  ;;  %v5468_v55 = vld [vmem:[%s6329_s23 + $0xac] sm:$0xf] }
 0x177   : > { %v4837_v47 = vor.u32 %v5558_v41, %v4834_v42  ;;  %2353 = vmatpush.bf16.msra.mxu1 %v4513_v35  ;;  %2366 = vmatpush.bf16.msra.mxu3 %v4833_v40  ;;  %v4477_v62 = vor.u32 %v5468_v55, %v4474_v58  ;;  %v1279_v33 = vmul.f32 %v6704_v43, %v1278_v29  ;;  %v5000_v58 = vld [vmem:[%s6329_s23 + $0x4c0] sm:$0xf]  ;;  %v5584_v23 = vld [vmem:[%s6329_s23 + $0x444] sm:$0xf0]  ;;  %v5494_v29 = vld [vmem:[%s6329_s23 + $0x174] sm:$0xf0] }
 0x178   : > { %v1247_v31 = vadd.f32 %v1246_v0, %v1245_v54  ;;  %v1262_v11 = vrot.slane %v1261_v1, 1  ;;  %v5553_v54 = vld [vmem:[%s6329_s23 + $0x34c] sm:$0xf0]  ;;  %v4432_v0 = vld [vmem:[%s6329_s23 + $0x58] sm:$0xf] }
 0x179   : > { %v4793_v57 = vor.u32 %v5553_v54, %v4792_v50  ;;  %2379 = vmatpush.bf16.msrb.mxu0 %v4517_v46  ;;  %2392 = vmatpush.bf16.msrb.mxu2 %v4837_v47  ;;  %v1283_v39 = vsel %vm1282_vm7, %v6704_v43, %v1279_v33  ;;  %v4880_v33 = vld [vmem:[%s6329_s23 + $0x3d0] sm:$0xf] }
 0x17a   : > { %v6687_v17 = vmul.f32 0.125, %v1247_v31  ;;  %v1263_v18 = vadd.f32 %v1262_v11, %v1261_v1  ;;  %v5463_v1 = vld [vmem:[%s6329_s23 + $0x7c] sm:$0xf0]  ;;  %v4754_v31 = vld [vmem:[%s6329_s23 + $0x300] sm:$0xf0]  ;;  %v4437_v11 = vor.u32 %v5458_v5, %v4434_v7  ;;  %v4685_v7 = vor.u32 %v5519_v60, %v4682_v61 }
 0x17b   : > { %2354 = vmatpush.bf16.msra.mxu1 %v4473_v53  ;;  %v4433_v3 = vor.u32 %v5463_v1, %v4432_v0  ;;  %2367 = vmatpush.bf16.msra.mxu3 %v4793_v57  ;;  %v4757_v12 = vor.u32 %v5538_v52, %v4754_v31  ;;  %v5524_v57 = vld [vmem:[%s6329_s23 + $0x264] sm:$0xf0]  ;;  %v5514_v5 = vld [vmem:[%s6329_s23 + $0x214] sm:$0xf0]  ;;  %v5509_v31 = vld [vmem:[%s6329_s23 + $0x1f4] sm:$0xf] }
 0x17c   : > { %v1265_v19 = vmul.f32 0.125, %v1263_v18  ;;  %v1267_v20 = vmul.f32 %v6687_v17, %v6687_v17  ;;  %v5533_v18 = vld [vmem:[%s6329_s23 + $0x2ac] sm:$0xf0]  ;;  %v4681_v2 = vor.u32 %v5524_v57, %v4680_v56  ;;  %v5594_v52 = vld [vmem:[%s6329_s23 + $0x494] sm:$0xf0]  ;;  %v4641_v38 = vor.u32 %v5514_v5, %v4640_v6 }
 0x17d   : > { %2380 = vmatpush.bf16.msrb.mxu0 %v4477_v62  ;;  %2393 = vmatpush.bf16.msrb.mxu2 %v4797_v63  ;;  %v4713_v25 = vor.u32 %v5533_v18, %v4712_v44  ;;  %v5469_v60 = vld [vmem:[%s6329_s23 + $0xb4] sm:$0xf]  ;;  %v4482_v61 = vld [vmem:[%s6329_s23 + $0xd8] sm:$0xf0] }
 0x17e   : > { %v1269_v34 = vsub.f32 %v1265_v19, %v1267_v20  ;;  %v4397_v19 = vor.u32 %v5448_v21, %v4394_v22  ;;  %v4717_v20 = vor.u32 %v5528_v26, %v4714_v27  ;;  %v4920_v22 = vld [vmem:[%s6329_s23 + $0x420] sm:$0xf]  ;;  %v5579_v26 = vld [vmem:[%s6329_s23 + $0x424] sm:$0xf]  ;;  %v4922_v27 = vld [vmem:[%s6329_s23 + $0x448] sm:$0xf0]  ;;  %v4485_v6 = vor.u32 %v5469_v60, %v4482_v61 }
 0x17f   : > { %2355 = vmatpush.bf16.msra.mxu1 %v4433_v3  ;;  %2368 = vmatpush.bf16.msra.mxu3 %v4753_v9  ;;  %v4960_v9 = vld [vmem:[%s6329_s23 + $0x470] sm:$0xf]  ;;  %v5580_v60 = vld [vmem:[%s6329_s23 + $0x42c] sm:$0xf]  ;;  %v4930_v61 = vld [vmem:[%s6329_s23 + $0x450] sm:$0xf0] }
 0x180   : > { %v1271_v45 = vmax.f32 %v1269_v34, 0.0  ;;  %v4961_v44 = vor.u32 %v5594_v52, %v4960_v9  ;;  %v5459_v9 = vld [vmem:[%s6329_s23 + $0x64] sm:$0xf]  ;;  %v4442_v52 = vld [vmem:[%s6329_s23 + $0x88] sm:$0xf0] }
 0x181   : > { %2381 = vmatpush.bf16.msrb.mxu0 %v4437_v11  ;;  %2394 = vmatpush.bf16.msrb.mxu2 %v4757_v12  ;;  %v4642_v11 = vld [vmem:[%s6329_s23 + $0x218] sm:$0xf0]  ;;  %v5589_v12 = vld [vmem:[%s6329_s23 + $0x474] sm:$0xf] }
 0x182   : > { %v6709_v51 = vadd.f32 1e-05, %v1271_v45  ;;  %v4645_v18 = vor.u32 %v5509_v31, %v4642_v11  ;;  %v4965_v21 = vor.u32 %v5589_v12, %v4962_v13  ;;  %v5539_v31 = vld [vmem:[%s6329_s23 + $0x2e4] sm:$0xf]  ;;  %v4762_v11 = vld [vmem:[%s6329_s23 + $0x308] sm:$0xf0] }
 0x183   : > { %2356 = vmatpush.bf16.msra.mxu1 %v4393_v16  ;;  %2369 = vmatpush.bf16.msra.mxu3 %v4713_v25  ;;  %v5504_v16 = vld [vmem:[%s6329_s23 + $0x1c4] sm:$0xf0]  ;;  %v4602_v25 = vld [vmem:[%s6329_s23 + $0x1c8] sm:$0xf0]  ;;  %v4400_v12 = vld [vmem:[%s6329_s23 + $0x10] sm:$0xf] }
 0x184   : > { %5798 = vrsqrt.f32 %v6709_v51  ;;  %vm1290_vm3 = vweird.f32 %v6709_v51 }
 0x185   : > { %2382 = vmatpush.bf16.msrb.mxu0 %v4397_v19  ;;  %2395 = vmatpush.bf16.msrb.mxu2 %v4717_v20  ;;  %v4921_v20 = vor.u32 %v5584_v23, %v4920_v22  ;;  %v5449_v22 = vld [vmem:[%s6329_s23 + $0x14] sm:$0xf]  ;;  %v4402_v23 = vld [vmem:[%s6329_s23 + $0x38] sm:$0xf0] }
 0x18a   : > { %v5799_v15 = vpop.eup %5798 }
 0x18b   : > { %v1285_v24 = vmul.f32 %v5799_v15, %v6709_v51  ;;  %vm1291_vm1 = vweird.f32 %v5799_v15 }
 0x18c   : > { %vm1292_vm4 = vmor %vm1290_vm3, %vm1291_vm1 }
 0x18d   : > { %v1286_v28 = vmul.f32 %v5799_v15, %v1285_v24  ;;  %v5499_v24 = vld [vmem:[%s6329_s23 + $0x1a4] sm:$0xf] }
 0x18f   : > { %v1287_v30 = vmul.f32 0.5, %v1286_v28  ;;  %v4560_v28 = vld [vmem:[%s6329_s23 + $0x150] sm:$0xf] }
 0x191   : > { %v1288_v32 = vsub.f32 1.5, %v1287_v30  ;;  %v4605_v30 = vor.u32 %v5499_v24, %v4602_v25  ;;  %v5529_v24 = vld [vmem:[%s6329_s23 + $0x294] sm:$0xf]  ;;  %v4722_v25 = vld [vmem:[%s6329_s23 + $0x2b8] sm:$0xf0] }
 0x193   : > { %v1289_v34 = vmul.f32 %v5799_v15, %v1288_v32  ;;  %v4925_v32 = vor.u32 %v5579_v26, %v4922_v27  ;;  %v4688_v26 = vld [vmem:[%s6329_s23 + $0x248] sm:$0xf]  ;;  %v5525_v27 = vld [vmem:[%s6329_s23 + $0x26c] sm:$0xf0] }
 0x195   : > { %v1293_v35 = vsel %vm1292_vm4, %v5799_v15, %v1289_v34  ;;  %v4600_v15 = vld [vmem:[%s6329_s23 + $0x1a0] sm:$0xf]  ;;  %v5574_v34 = vld [vmem:[%s6329_s23 + $0x3f4] sm:$0xf0] }
 0x196   : > { %v1296_v37 = vrot.slane %v1293_v35, 7  ;;  %v4601_v19 = vor.u32 %v5504_v16, %v4600_v15  ;;  %v5489_v35 = vld [vmem:[%s6329_s23 + $0x154] sm:$0xf]  ;;  %v4720_v15 = vld [vmem:[%s6329_s23 + $0x290] sm:$0xf] }
 0x197   : > { %v5534_v16 = vld [vmem:[%s6329_s23 + $0x2b4] sm:$0xf0] }
 0x198   : > { %v1298_v40 = vsel %vm7363_vm6, %v1283_v39, %v1296_v37  ;;  %v5569_v37 = vld [vmem:[%s6329_s23 + $0x3d4] sm:$0xf]  ;;  %v4882_v39 = vld [vmem:[%s6329_s23 + $0x3f8] sm:$0xf0] }
 0x199   : > { %v1300_v41 = vmul.f32 %v1298_v40, %v1233_v36  ;;  %v4562_v36 = vld [vmem:[%s6329_s23 + $0x178] sm:$0xf0]  ;;  %v4561_v40 = vor.u32 %v5494_v29, %v4560_v28  ;;  %v5520_v28 = vld [vmem:[%s6329_s23 + $0x24c] sm:$0xf] }
 0x19b   : > { %v1302_v42 = vperm.slane %v1300_v41, 0  ;;  %v1303_v45 = vperm.slane %v1300_v41, 1  ;;  %v4881_v41 = vor.u32 %v5574_v34, %v4880_v33  ;;  %v5600_v33 = vld [vmem:[%s6329_s23 + $0x4cc] sm:$0xf]  ;;  %v5010_v34 = vld [vmem:[%s6329_s23 + $0x4f0] sm:$0xf0] }
 0x19d   : > { %v1307_v46 = vmul.f32 %v1303_v45, %v6687_v17  ;;  %v1306_v47 = vmul.f32 %v1302_v42, %v6605_v8  ;;  %v1314_v50 = vmul.f32 %v1302_v42, %v6571_v14  ;;  %v1315_v51 = vmul.f32 %v1303_v45, %v6645_v59  ;;  %v5604_v8 = vld [vmem:[%s6329_s23 + $0x4e4] sm:$0xf0]  ;;  %v5599_v14 = vld [vmem:[%s6329_s23 + $0x4c4] sm:$0xf]  ;;  %v5002_v59 = vld [vmem:[%s6329_s23 + $0x4e8] sm:$0xf0] }
 0x19e   : > { %v5001_v3 = vor.u32 %v5604_v8, %v5000_v58  ;;  %v5005_v4 = vor.u32 %v5599_v14, %v5002_v59  ;;  %v4520_v42 = vld [vmem:[%s6329_s23 + $0x100] sm:$0xf]  ;;  %v5484_v45 = vld [vmem:[%s6329_s23 + $0x124] sm:$0xf0]  ;;  %v4800_v58 = vld [vmem:[%s6329_s23 + $0x330] sm:$0xf] }
 0x19f   : > { %v1310_v48 = vrot.slane %v1307_v46, 7  ;;  %v4565_v46 = vor.u32 %v5489_v35, %v4562_v36  ;;  %v5554_v8 = vld [vmem:[%s6329_s23 + $0x354] sm:$0xf0]  ;;  %v4405_v35 = vor.u32 %v5449_v22, %v4402_v23  ;;  %v4725_v36 = vor.u32 %v5529_v24, %v4722_v25  ;;  %v5560_v22 = vld [vmem:[%s6329_s23 + $0x38c] sm:$0xf] }
 0x1a0   : > { %v4801_v59 = vor.u32 %v5554_v8, %v4800_v58  ;;  %v5500_v58 = vld [vmem:[%s6329_s23 + $0x1ac] sm:$0xf]  ;;  %v4610_v8 = vld [vmem:[%s6329_s23 + $0x1d0] sm:$0xf0] }
 0x1a1   : > { %v1311_v49 = vsel %vm7363_vm6, %v1306_v47, %v1310_v48  ;;  %v4840_v47 = vld [vmem:[%s6329_s23 + $0x380] sm:$0xf]  ;;  %v5564_v48 = vld [vmem:[%s6329_s23 + $0x3a4] sm:$0xf0]  ;;  %v4850_v23 = vld [vmem:[%s6329_s23 + $0x3b0] sm:$0xf0] }
 0x1a2   : > { %v1313_v43 = vsub.f32 %v4381_v10, %v1311_v49  ;;  %v4885_v10 = vor.u32 %v5569_v37, %v4882_v39  ;;  %v5479_v49 = vld [vmem:[%s6329_s23 + $0x104] sm:$0xf]  ;;  %v4689_v37 = vor.u32 %v5525_v27, %v4688_v26  ;;  %v4488_v26 = vld [vmem:[%s6329_s23 + $0xb8] sm:$0xf]  ;;  %v5475_v27 = vld [vmem:[%s6329_s23 + $0xdc] sm:$0xf0] }
 0x1a4   : > { %v1317_v53 = vperm.slane %v1313_v43, 0  ;;  %v1318_v54 = vperm.slane %v1313_v43, 1  ;;  %v4522_v43 = vld [vmem:[%s6329_s23 + $0x128] sm:$0xf0] }
 0x1a5   : > { %v4525_v56 = vor.u32 %v5479_v49, %v4522_v43  ;;  %v5590_v49 = vld [vmem:[%s6329_s23 + $0x47c] sm:$0xf]  ;;  %v4970_v43 = vld [vmem:[%s6329_s23 + $0x4a0] sm:$0xf0] }
 0x1a6   : > { %v1321_v55 = vadd.f32 %v1317_v53, %v1314_v50  ;;  %v1322_v17 = vadd.f32 %v1318_v54, %v1315_v51  ;;  %v5559_v50 = vld [vmem:[%s6329_s23 + $0x384] sm:$0xf]  ;;  %v4842_v51 = vld [vmem:[%s6329_s23 + $0x3a8] sm:$0xf0]  ;;  %v4521_v53 = vor.u32 %v5484_v45, %v4520_v42  ;;  %v4841_v54 = vor.u32 %v5564_v48, %v4840_v47  ;;  %v5510_v47 = vld [vmem:[%s6329_s23 + $0x1fc] sm:$0xf] }
 0x1a7   : > { %v4845_v57 = vor.u32 %v5559_v50, %v4842_v51  ;;  %v5013_v45 = vor.u32 %v5600_v33, %v5010_v34  ;;  %v4650_v48 = vld [vmem:[%s6329_s23 + $0x220] sm:$0xf0]  ;;  %v5550_v33 = vld [vmem:[%s6329_s23 + $0x33c] sm:$0xf] }
 0x1a8   : > { %v1323_v62 = vmax.f32 %v1321_v55, 0.0  ;;  %v1324_v63 = vmax.f32 %v1322_v17, 0.0  ;;  %v4480_v55 = vld [vmem:[%s6329_s23 + $0xb0] sm:$0xf]  ;;  %v5474_v17 = vld [vmem:[%s6329_s23 + $0xd4] sm:$0xf0] }
 0x1a9   : > { %v4481_v14 = vor.u32 %v5474_v17, %v4480_v55  ;;  %v4653_v55 = vor.u32 %v5510_v47, %v4650_v48  ;;  %v4973_v17 = vor.u32 %v5590_v49, %v4970_v43  ;;  %v4810_v34 = vld [vmem:[%s6329_s23 + $0x360] sm:$0xf0]  ;;  %v5540_v47 = vld [vmem:[%s6329_s23 + $0x2ec] sm:$0xf]  ;;  %v4770_v48 = vld [vmem:[%s6329_s23 + $0x310] sm:$0xf0] }
 0x1aa   : > { %v6758_v0 = vpack.c.bf16 %v1323_v62, %v1323_v62  ;;  %v6760_v1 = vpack.c.bf16 %v1324_v63, %v1324_v63  ;;  %v5549_v62 = vld [vmem:[%s6329_s23 + $0x334] sm:$0xf]  ;;  %v4802_v63 = vld [vmem:[%s6329_s23 + $0x358] sm:$0xf0]  ;;  %v4408_v49 = vld [vmem:[%s6329_s23 + $0x18] sm:$0xf] }
 0x1ab   : > { %v4805_v5 = vor.u32 %v5549_v62, %v4802_v63 }
 0x1ac   : > { %2305 = vmatmul.bf16.vlgmr.msrb.gmra.mxu1 %v6758_v0  ;;  %2318 = vmatmul.bf16.vlgmr.msrb.gmra.mxu3 %v6760_v1 }
 0x1ad   : > { %2331 = vmatmul.bf16.vlgmr.msra.gmra.mxu0 %v6758_v0  ;;  %2344 = vmatmul.bf16.vlgmr.msra.gmra.mxu2 %v6760_v1 }
 0x1ae   : > { %2401 = vmatpush.bf16.msrb.mxu1 %v4681_v2  ;;  %2414 = vmatpush.bf16.msrb.mxu3 %v5001_v3  ;;  %v4440_v2 = vld [vmem:[%s6329_s23 + $0x60] sm:$0xf]  ;;  %v5464_v3 = vld [vmem:[%s6329_s23 + $0x84] sm:$0xf0] }
 0x1af   : > { %2427 = vmatpush.bf16.msra.mxu0 %v4685_v7  ;;  %2440 = vmatpush.bf16.msra.mxu2 %v5005_v4  ;;  %v4760_v7 = vld [vmem:[%s6329_s23 + $0x2e0] sm:$0xf]  ;;  %v5544_v4 = vld [vmem:[%s6329_s23 + $0x304] sm:$0xf0]  ;;  %v4441_v13 = vor.u32 %v5464_v3, %v4440_v2  ;;  %v4613_v2 = vor.u32 %v5500_v58, %v4610_v8  ;;  %v4933_v3 = vor.u32 %v5580_v60, %v4930_v61  ;;  %v5530_v58 = vld [vmem:[%s6329_s23 + $0x29c] sm:$0xf] }
 0x1b0   : > { %v4730_v8 = vld [vmem:[%s6329_s23 + $0x2c0] sm:$0xf0]  ;;  %v4696_v60 = vld [vmem:[%s6329_s23 + $0x250] sm:$0xf]  ;;  %v5526_v61 = vld [vmem:[%s6329_s23 + $0x274] sm:$0xf0] }
 0x1b2   : > { %2402 = vmatpush.bf16.msrb.mxu1 %v4641_v38  ;;  %2415 = vmatpush.bf16.msrb.mxu3 %v4961_v44  ;;  %v4761_v38 = vor.u32 %v5544_v4, %v4760_v7  ;;  %v5454_v44 = vld [vmem:[%s6329_s23 + $0x34] sm:$0xf0]  ;;  %v5490_v7 = vld [vmem:[%s6329_s23 + $0x15c] sm:$0xf]  ;;  %v4570_v4 = vld [vmem:[%s6329_s23 + $0x180] sm:$0xf0] }
 0x1b3   : > { %2428 = vmatpush.bf16.msra.mxu0 %v4645_v18  ;;  %2441 = vmatpush.bf16.msra.mxu2 %v4965_v21  ;;  %v4445_v18 = vor.u32 %v5459_v9, %v4442_v52  ;;  %v4765_v21 = vor.u32 %v5539_v31, %v4762_v11  ;;  %v4401_v29 = vor.u32 %v5454_v44, %v4400_v12  ;;  %v5570_v9 = vld [vmem:[%s6329_s23 + $0x3dc] sm:$0xf]  ;;  %v4890_v52 = vld [vmem:[%s6329_s23 + $0x400] sm:$0xf0]  ;;  %v4528_v12 = vld [vmem:[%s6329_s23 + $0x108] sm:$0xf] }
 0x1b4   : > { %v4893_v44 = vor.u32 %v5570_v9, %v4890_v52  ;;  %v4697_v9 = vor.u32 %v5526_v61, %v4696_v60  ;;  %v4496_v60 = vld [vmem:[%s6329_s23 + $0xc0] sm:$0xf]  ;;  %v5476_v61 = vld [vmem:[%s6329_s23 + $0xe4] sm:$0xf0] }
 0x1b6   : > { %2403 = vmatpush.bf16.msrb.mxu1 %v4601_v19  ;;  %2416 = vmatpush.bf16.msrb.mxu3 %v4921_v20  ;;  %v5008_v19 = vld [vmem:[%s6329_s23 + $0x4c8] sm:$0xf]  ;;  %v5605_v20 = vld [vmem:[%s6329_s23 + $0x4ec] sm:$0xf0] }
 0x1b7   : > { %2429 = vmatpush.bf16.msra.mxu0 %v4605_v30  ;;  %2442 = vmatpush.bf16.msra.mxu2 %v4925_v32  ;;  %v4721_v30 = vor.u32 %v5534_v16, %v4720_v15  ;;  %v4690_v32 = vld [vmem:[%s6329_s23 + $0x270] sm:$0xf0]  ;;  %v5009_v39 = vor.u32 %v5605_v20, %v5008_v19  ;;  %v4848_v15 = vld [vmem:[%s6329_s23 + $0x388] sm:$0xf]  ;;  %v5565_v16 = vld [vmem:[%s6329_s23 + $0x3ac] sm:$0xf0]  ;;  %v4853_v20 = vor.u32 %v5560_v22, %v4850_v23 }
 0x1b8   : > { %v4693_v42 = vor.u32 %v5520_v28, %v4690_v32  ;;  %v4849_v25 = vor.u32 %v5565_v16, %v4848_v15  ;;  %v4808_v28 = vld [vmem:[%s6329_s23 + $0x338] sm:$0xf]  ;;  %v4490_v32 = vld [vmem:[%s6329_s23 + $0xe0] sm:$0xf0]  ;;  %v4658_v16 = vld [vmem:[%s6329_s23 + $0x228] sm:$0xf0] }
 0x1b9   : > { %v5511_v15 = vld [vmem:[%s6329_s23 + $0x204] sm:$0xf] }
 0x1ba   : > { %2404 = vmatpush.bf16.msrb.mxu1 %v4561_v40  ;;  %2417 = vmatpush.bf16.msrb.mxu3 %v4881_v41  ;;  %v4648_v40 = vld [vmem:[%s6329_s23 + $0x1f8] sm:$0xf]  ;;  %v5515_v41 = vld [vmem:[%s6329_s23 + $0x21c] sm:$0xf0] }
 0x1bb   : > { %2430 = vmatpush.bf16.msra.mxu0 %v4565_v46  ;;  %2443 = vmatpush.bf16.msra.mxu2 %v4885_v10  ;;  %v4968_v46 = vld [vmem:[%s6329_s23 + $0x478] sm:$0xf]  ;;  %v5595_v10 = vld [vmem:[%s6329_s23 + $0x49c] sm:$0xf0]  ;;  %v4649_v50 = vor.u32 %v5515_v41, %v4648_v40  ;;  %v4813_v41 = vor.u32 %v5550_v33, %v4810_v34 }
 0x1bc   : > { %2357 = vmatmul.bf16.vlgmr.msra.gmra.mxu1 %v6758_v0  ;;  %2370 = vmatmul.bf16.vlgmr.msra.gmra.mxu3 %v6760_v1  ;;  %v4969_v51 = vor.u32 %v5595_v10, %v4968_v46  ;;  %v5460_v46 = vld [vmem:[%s6329_s23 + $0x6c] sm:$0xf]  ;;  %v4450_v10 = vld [vmem:[%s6329_s23 + $0x90] sm:$0xf0] }
 0x1bd   : > { %2383 = vmatmul.bf16.vlgmr.msrb.gmra.mxu0 %v6758_v0  ;;  %2396 = vmatmul.bf16.vlgmr.msrb.gmra.mxu2 %v6760_v1 }
 0x1be   : > { %2405 = vmatpush.bf16.msrb.mxu1 %v4521_v53  ;;  %2418 = vmatpush.bf16.msrb.mxu3 %v4841_v54  ;;  %v4608_v53 = vld [vmem:[%s6329_s23 + $0x1a8] sm:$0xf]  ;;  %v5505_v54 = vld [vmem:[%s6329_s23 + $0x1cc] sm:$0xf0] }
 0x1bf   : > { %2431 = vmatpush.bf16.msra.mxu0 %v4525_v56  ;;  %2444 = vmatpush.bf16.msra.mxu2 %v4845_v57  ;;  %v4928_v56 = vld [vmem:[%s6329_s23 + $0x428] sm:$0xf]  ;;  %v5585_v57 = vld [vmem:[%s6329_s23 + $0x44c] sm:$0xf0]  ;;  %v4609_v62 = vor.u32 %v5505_v54, %v4608_v53  ;;  %v4728_v53 = vld [vmem:[%s6329_s23 + $0x298] sm:$0xf] }
 0x1c0   : > { %v4929_v63 = vor.u32 %v5585_v57, %v4928_v56  ;;  %v5535_v54 = vld [vmem:[%s6329_s23 + $0x2bc] sm:$0xf0]  ;;  %v5450_v56 = vld [vmem:[%s6329_s23 + $0x1c] sm:$0xf]  ;;  %v4410_v57 = vld [vmem:[%s6329_s23 + $0x40] sm:$0xf0] }
 0x1c2   : > { %2406 = vmatpush.bf16.msrb.mxu1 %v4481_v14  ;;  %2419 = vmatpush.bf16.msrb.mxu3 %v4801_v59  ;;  %v4568_v14 = vld [vmem:[%s6329_s23 + $0x158] sm:$0xf]  ;;  %v5495_v59 = vld [vmem:[%s6329_s23 + $0x17c] sm:$0xf0] }
 0x1c3   : > { %2432 = vmatpush.bf16.msra.mxu0 %v4485_v6  ;;  %2445 = vmatpush.bf16.msra.mxu2 %v4805_v5  ;;  %v4888_v6 = vld [vmem:[%s6329_s23 + $0x3d8] sm:$0xf]  ;;  %v5575_v5 = vld [vmem:[%s6329_s23 + $0x3fc] sm:$0xf0]  ;;  %v4569_v31 = vor.u32 %v5495_v59, %v4568_v14  ;;  %v5521_v14 = vld [vmem:[%s6329_s23 + $0x254] sm:$0xf] }
 0x1c4   : > { %v4889_v11 = vor.u32 %v5575_v5, %v4888_v6  ;;  %v5601_v6 = vld [vmem:[%s6329_s23 + $0x4d4] sm:$0xf]  ;;  %v5018_v5 = vld [vmem:[%s6329_s23 + $0x4f8] sm:$0xf0] }
 0x1c6   : > { %2407 = vmatpush.bf16.msrb.mxu1 %v4441_v13  ;;  %2420 = vmatpush.bf16.msrb.mxu3 %v4761_v38  ;;  %v5485_v13 = vld [vmem:[%s6329_s23 + $0x12c] sm:$0xf0]  ;;  %v4573_v38 = vor.u32 %v5490_v7, %v4570_v4  ;;  %v4413_v7 = vor.u32 %v5450_v56, %v4410_v57  ;;  %v4733_v4 = vor.u32 %v5530_v58, %v4730_v8  ;;  %v5561_v56 = vld [vmem:[%s6329_s23 + $0x394] sm:$0xf]  ;;  %v4858_v57 = vld [vmem:[%s6329_s23 + $0x3b8] sm:$0xf0] }
 0x1c7   : > { %2433 = vmatpush.bf16.msra.mxu0 %v4445_v18  ;;  %2446 = vmatpush.bf16.msra.mxu2 %v4765_v21  ;;  %v5480_v18 = vld [vmem:[%s6329_s23 + $0x10c] sm:$0xf]  ;;  %v4530_v21 = vld [vmem:[%s6329_s23 + $0x130] sm:$0xf0]  ;;  %v4529_v24 = vor.u32 %v5485_v13, %v4528_v12  ;;  %v5021_v13 = vor.u32 %v5601_v6, %v5018_v5  ;;  %v5551_v6 = vld [vmem:[%s6329_s23 + $0x344] sm:$0xf] }
 0x1c8   : > { %v4533_v19 = vor.u32 %v5480_v18, %v4530_v21  ;;  %v5591_v18 = vld [vmem:[%s6329_s23 + $0x484] sm:$0xf]  ;;  %v4978_v21 = vld [vmem:[%s6329_s23 + $0x4a8] sm:$0xf0] }
 0x1c9   : > { %v4818_v5 = vld [vmem:[%s6329_s23 + $0x368] sm:$0xf0] }
 0x1ca   : > { %2408 = vmatpush.bf16.msrb.mxu1 %v4401_v29  ;;  %2421 = vmatpush.bf16.msrb.mxu3 %v4721_v30  ;;  %v5555_v29 = vld [vmem:[%s6329_s23 + $0x35c] sm:$0xf0]  ;;  %v5470_v30 = vld [vmem:[%s6329_s23 + $0xbc] sm:$0xf] }
 0x1cb   : > { %2434 = vmatpush.bf16.msra.mxu0 %v4405_v35  ;;  %2447 = vmatpush.bf16.msra.mxu2 %v4725_v36  ;;  %v4489_v35 = vor.u32 %v5475_v27, %v4488_v26  ;;  %v4809_v36 = vor.u32 %v5555_v29, %v4808_v28  ;;  %v4493_v40 = vor.u32 %v5470_v30, %v4490_v32  ;;  %v5501_v28 = vld [vmem:[%s6329_s23 + $0x1b4] sm:$0xf]  ;;  %v4618_v29 = vld [vmem:[%s6329_s23 + $0x1d8] sm:$0xf0] }
 0x1cc   : > { %v4661_v26 = vor.u32 %v5511_v15, %v4658_v16  ;;  %v4981_v27 = vor.u32 %v5591_v18, %v4978_v21  ;;  %v5581_v30 = vld [vmem:[%s6329_s23 + $0x434] sm:$0xf]  ;;  %v4938_v32 = vld [vmem:[%s6329_s23 + $0x458] sm:$0xf0] }
 0x1cd   : > { %2409 = vmatmul.bf16.vlgmr.msrb.gmra.mxu1 %v6758_v0  ;;  %2422 = vmatmul.bf16.vlgmr.msrb.gmra.mxu3 %v6760_v1  ;;  %v5541_v15 = vld [vmem:[%s6329_s23 + $0x2f4] sm:$0xf]  ;;  %v4778_v16 = vld [vmem:[%s6329_s23 + $0x318] sm:$0xf0] }
 0x1ce   : > { %2453 = vmatpush.bf16.msra.mxu1 %v4689_v37  ;;  %2466 = vmatpush.bf16.msra.mxu3 %v5009_v39  ;;  %v4448_v37 = vld [vmem:[%s6329_s23 + $0x68] sm:$0xf]  ;;  %v5465_v39 = vld [vmem:[%s6329_s23 + $0x8c] sm:$0xf0] }
 0x1cf   : > { %2479 = vmatpush.bf16.msrb.mxu0 %v4693_v42  ;;  %2492 = vmatpush.bf16.msrb.mxu2 %v5013_v45  ;;  %v4768_v42 = vld [vmem:[%s6329_s23 + $0x2e8] sm:$0xf]  ;;  %v5545_v45 = vld [vmem:[%s6329_s23 + $0x30c] sm:$0xf0]  ;;  %v4449_v43 = vor.u32 %v5465_v39, %v4448_v37  ;;  %v4621_v37 = vor.u32 %v5501_v28, %v4618_v29  ;;  %v4941_v39 = vor.u32 %v5581_v30, %v4938_v32  ;;  %v5531_v28 = vld [vmem:[%s6329_s23 + $0x2a4] sm:$0xf] }
 0x1d0   : > { %2435 = vmatmul.bf16.vlgmr.msra.gmra.mxu0 %v6758_v0  ;;  %2448 = vmatmul.bf16.vlgmr.msra.gmra.mxu2 %v6760_v1  ;;  %v4738_v29 = vld [vmem:[%s6329_s23 + $0x2c8] sm:$0xf0] }
 0x1d2   : > { %2454 = vmatpush.bf16.msra.mxu1 %v4649_v50  ;;  %2467 = vmatpush.bf16.msra.mxu3 %v4969_v51  ;;  %v4769_v50 = vor.u32 %v5545_v45, %v4768_v42  ;;  %v5455_v51 = vld [vmem:[%s6329_s23 + $0x3c] sm:$0xf0]  ;;  %v5491_v42 = vld [vmem:[%s6329_s23 + $0x164] sm:$0xf]  ;;  %v4578_v45 = vld [vmem:[%s6329_s23 + $0x188] sm:$0xf0] }
 0x1d3   : > { %2480 = vmatpush.bf16.msrb.mxu0 %v4653_v55  ;;  %2493 = vmatpush.bf16.msrb.mxu2 %v4973_v17  ;;  %v4453_v55 = vor.u32 %v5460_v46, %v4450_v10  ;;  %v4773_v17 = vor.u32 %v5540_v47, %v4770_v48  ;;  %v4409_v59 = vor.u32 %v5455_v51, %v4408_v49  ;;  %v5571_v46 = vld [vmem:[%s6329_s23 + $0x3e4] sm:$0xf]  ;;  %v4898_v10 = vld [vmem:[%s6329_s23 + $0x408] sm:$0xf0]  ;;  %v4536_v49 = vld [vmem:[%s6329_s23 + $0x110] sm:$0xf] }
 0x1d4   : > { %v4901_v51 = vor.u32 %v5571_v46, %v4898_v10 }
 0x1d6   : > { %2455 = vmatpush.bf16.msra.mxu1 %v4609_v62  ;;  %2468 = vmatpush.bf16.msra.mxu3 %v4929_v63  ;;  %v5016_v62 = vld [vmem:[%s6329_s23 + $0x4d0] sm:$0xf]  ;;  %v5606_v63 = vld [vmem:[%s6329_s23 + $0x4f4] sm:$0xf0] }
 0x1d7   : > { %2481 = vmatpush.bf16.msrb.mxu0 %v4613_v2  ;;  %2494 = vmatpush.bf16.msrb.mxu2 %v4933_v3  ;;  %v4729_v2 = vor.u32 %v5535_v54, %v4728_v53  ;;  %v4698_v3 = vld [vmem:[%s6329_s23 + $0x278] sm:$0xf0]  ;;  %v5017_v52 = vor.u32 %v5606_v63, %v5016_v62  ;;  %v4856_v53 = vld [vmem:[%s6329_s23 + $0x390] sm:$0xf]  ;;  %v5566_v54 = vld [vmem:[%s6329_s23 + $0x3b4] sm:$0xf0]  ;;  %v4861_v63 = vor.u32 %v5561_v56, %v4858_v57 }
 0x1d8   : > { %v4701_v12 = vor.u32 %v5521_v14, %v4698_v3  ;;  %v4857_v8 = vor.u32 %v5566_v54, %v4856_v53  ;;  %v4816_v14 = vld [vmem:[%s6329_s23 + $0x340] sm:$0xf]  ;;  %v4498_v3 = vld [vmem:[%s6329_s23 + $0xe8] sm:$0xf0] }
 0x1d9   : > { %v1328_v54 = vld [vmem:[#allocation2 + $0x10] sm:$0xff] }
 0x1da   : > { %2456 = vmatpush.bf16.msra.mxu1 %v4569_v31  ;;  %2469 = vmatpush.bf16.msra.mxu3 %v4889_v11  ;;  %v4656_v31 = vld [vmem:[%s6329_s23 + $0x200] sm:$0xf]  ;;  %v5516_v11 = vld [vmem:[%s6329_s23 + $0x224] sm:$0xf0] }
 0x1db   : > { %2482 = vmatpush.bf16.msrb.mxu0 %v4573_v38  ;;  %2495 = vmatpush.bf16.msrb.mxu2 %v4893_v44  ;;  %v4976_v38 = vld [vmem:[%s6329_s23 + $0x480] sm:$0xf]  ;;  %v5596_v44 = vld [vmem:[%s6329_s23 + $0x4a4] sm:$0xf0]  ;;  %v4657_v22 = vor.u32 %v5516_v11, %v4656_v31  ;;  %v4821_v11 = vor.u32 %v5551_v6, %v4818_v5 }
 0x1dc   : > { %v4977_v23 = vor.u32 %v5596_v44, %v4976_v38  ;;  %v5461_v38 = vld [vmem:[%s6329_s23 + $0x74] sm:$0xf]  ;;  %v4458_v44 = vld [vmem:[%s6329_s23 + $0x98] sm:$0xf0] }
 0x1de   : > { %2457 = vmatpush.bf16.msra.mxu1 %v4529_v24  ;;  %2470 = vmatpush.bf16.msra.mxu3 %v4849_v25  ;;  %v4616_v24 = vld [vmem:[%s6329_s23 + $0x1b0] sm:$0xf]  ;;  %v5506_v25 = vld [vmem:[%s6329_s23 + $0x1d4] sm:$0xf0] }
 0x1df   : > { %2483 = vmatpush.bf16.msrb.mxu0 %v4533_v19  ;;  %2496 = vmatpush.bf16.msrb.mxu2 %v4853_v20  ;;  %v4936_v19 = vld [vmem:[%s6329_s23 + $0x430] sm:$0xf]  ;;  %v5586_v20 = vld [vmem:[%s6329_s23 + $0x454] sm:$0xf0]  ;;  %v4617_v33 = vor.u32 %v5506_v25, %v4616_v24  ;;  %v4461_v24 = vor.u32 %v5461_v38, %v4458_v44  ;;  %v4781_v25 = vor.u32 %v5541_v15, %v4778_v16 }
 0x1e0   : > { %v4937_v34 = vor.u32 %v5586_v20, %v4936_v19  ;;  %v5451_v19 = vld [vmem:[%s6329_s23 + $0x24] sm:$0xf]  ;;  %v4418_v20 = vld [vmem:[%s6329_s23 + $0x48] sm:$0xf0]  ;;  %v1331_v38 = vld [vmem:[#allocation2 + $0x8] sm:$0xff] }
 0x1e1   : > { %v1332_v16 = vld [vmem:[#allocation2 + $0x20] sm:$0xff] }
 0x1e2   : > { %2458 = vmatpush.bf16.msra.mxu1 %v4489_v35  ;;  %2471 = vmatpush.bf16.msra.mxu3 %v4809_v36  ;;  %v4576_v35 = vld [vmem:[%s6329_s23 + $0x160] sm:$0xf]  ;;  %v5496_v36 = vld [vmem:[%s6329_s23 + $0x184] sm:$0xf0] }
 0x1e3   : > { %2484 = vmatpush.bf16.msrb.mxu0 %v4493_v40  ;;  %2497 = vmatpush.bf16.msrb.mxu2 %v4813_v41  ;;  %v4896_v40 = vld [vmem:[%s6329_s23 + $0x3e0] sm:$0xf]  ;;  %v5576_v41 = vld [vmem:[%s6329_s23 + $0x404] sm:$0xf0]  ;;  %v4577_v47 = vor.u32 %v5496_v36, %v4576_v35 }
 0x1e4   : > { %v4897_v48 = vor.u32 %v5576_v41, %v4896_v40  ;;  %v1326_v41 = vld [vmem:[#allocation2] sm:$0xff] }
 0x1e6   : > { %2459 = vmatpush.bf16.msra.mxu1 %v4449_v43  ;;  %2472 = vmatpush.bf16.msra.mxu3 %v4769_v50  ;;  %v5486_v43 = vld [vmem:[%s6329_s23 + $0x134] sm:$0xf0]  ;;  %v4581_v50 = vor.u32 %v5491_v42, %v4578_v45 }
 0x1e7   : > { %2485 = vmatpush.bf16.msrb.mxu0 %v4453_v55  ;;  %2498 = vmatpush.bf16.msrb.mxu2 %v4773_v17  ;;  %v5481_v55 = vld [vmem:[%s6329_s23 + $0x114] sm:$0xf]  ;;  %v4538_v17 = vld [vmem:[%s6329_s23 + $0x138] sm:$0xf0]  ;;  %v4537_v58 = vor.u32 %v5486_v43, %v4536_v49 }
 0x1e8   : > { %v4541_v62 = vor.u32 %v5481_v55, %v4538_v17 }
 0x1ea   : > { %2460 = vmatpush.bf16.msra.mxu1 %v4409_v59  ;;  %2473 = vmatpush.bf16.msra.mxu3 %v4729_v2  ;;  %v5556_v59 = vld [vmem:[%s6329_s23 + $0x364] sm:$0xf0]  ;;  %v5471_v2 = vld [vmem:[%s6329_s23 + $0xc4] sm:$0xf] }
 0x1eb   : > { %2486 = vmatpush.bf16.msrb.mxu0 %v4413_v7  ;;  %2499 = vmatpush.bf16.msrb.mxu2 %v4733_v4  ;;  %v4497_v7 = vor.u32 %v5476_v61, %v4496_v60  ;;  %v4817_v4 = vor.u32 %v5556_v59, %v4816_v14  ;;  %v4501_v31 = vor.u32 %v5471_v2, %v4498_v3  ;;  %v1329_v14 = vld [vmem:[#allocation2 + $0x48] sm:$0xff] }
 0x1ec   : > { %v1330_v3 = vld [vmem:[#allocation2 + $0x28] sm:$0xff] }
 0x1ed   : > { %2461 = vmatmul.bf16.vlgmr.msra.gmra.mxu1 %v6758_v0  ;;  %2474 = vmatmul.bf16.vlgmr.msra.gmra.mxu3 %v6760_v1 }
 0x1ee   : > { %2505 = vmatpush.bf16.msrb.mxu1 %v4697_v9  ;;  %2518 = vmatpush.bf16.msrb.mxu3 %v5017_v52  ;;  %v4456_v9 = vld [vmem:[%s6329_s23 + $0x70] sm:$0xf]  ;;  %v5466_v52 = vld [vmem:[%s6329_s23 + $0x94] sm:$0xf0] }
 0x1ef   : > { %2531 = vmatpush.bf16.msra.mxu0 %v4701_v12  ;;  %2544 = vmatpush.bf16.msra.mxu2 %v5021_v13  ;;  %v4776_v12 = vld [vmem:[%s6329_s23 + $0x2f0] sm:$0xf]  ;;  %v5546_v13 = vld [vmem:[%s6329_s23 + $0x314] sm:$0xf0]  ;;  %v4457_v18 = vor.u32 %v5466_v52, %v4456_v9 }
 0x1f0   : > { %2487 = vmatmul.bf16.vlgmr.msrb.gmra.mxu0 %v6758_v0  ;;  %2500 = vmatmul.bf16.vlgmr.msrb.gmra.mxu2 %v6760_v1  ;;  %v4777_v21 = vor.u32 %v5546_v13, %v4776_v12 }
 0x1f2   : > { %2506 = vmatpush.bf16.msrb.mxu1 %v4657_v22  ;;  %2519 = vmatpush.bf16.msrb.mxu3 %v4977_v23  ;;  %v4416_v22 = vld [vmem:[%s6329_s23 + $0x20] sm:$0xf]  ;;  %v5456_v23 = vld [vmem:[%s6329_s23 + $0x44] sm:$0xf0] }
 0x1f3   : > { %2532 = vmatpush.bf16.msra.mxu0 %v4661_v26  ;;  %2545 = vmatpush.bf16.msra.mxu2 %v4981_v27  ;;  %v4736_v26 = vld [vmem:[%s6329_s23 + $0x2a0] sm:$0xf]  ;;  %v5536_v27 = vld [vmem:[%s6329_s23 + $0x2c4] sm:$0xf0]  ;;  %v4417_v30 = vor.u32 %v5456_v23, %v4416_v22 }
 0x1f4   : > { %v4737_v32 = vor.u32 %v5536_v27, %v4736_v26 }
 0x1f6   : > { %2507 = vmatpush.bf16.msrb.mxu1 %v4617_v33  ;;  %2520 = vmatpush.bf16.msrb.mxu3 %v4937_v34  ;;  %v4421_v33 = vor.u32 %v5451_v19, %v4418_v20  ;;  %v4741_v34 = vor.u32 %v5531_v28, %v4738_v29  ;;  %v1333_v28 = vld [vmem:[#allocation2 + $0x40] sm:$0xff] }
 0x1f7   : > { %2533 = vmatpush.bf16.msra.mxu0 %v4621_v37  ;;  %2546 = vmatpush.bf16.msra.mxu2 %v4941_v39  ;;  %v1325_v37 = vld [vmem:[#allocation2 + $0x30] sm:$0xff] }
 0x1fa   : > { %2508 = vmatpush.bf16.msrb.mxu1 %v4577_v47  ;;  %2521 = vmatpush.bf16.msrb.mxu3 %v4897_v48 }
 0x1fb   : > { %2534 = vmatpush.bf16.msra.mxu0 %v4581_v50  ;;  %2547 = vmatpush.bf16.msra.mxu2 %v4901_v51  ;;  %v1327_v51 = vld [vmem:[#allocation2 + $0x18] sm:$0xff] }
 0x1fe   : > { %2509 = vmatpush.bf16.msrb.mxu1 %v4537_v58  ;;  %2522 = vmatpush.bf16.msrb.mxu3 %v4857_v8 }
 0x1ff   : > { %2535 = vmatpush.bf16.msra.mxu0 %v4541_v62  ;;  %2548 = vmatpush.bf16.msra.mxu2 %v4861_v63 }
 0x202   : > { %2510 = vmatpush.bf16.msrb.mxu1 %v4497_v7  ;;  %2523 = vmatpush.bf16.msrb.mxu3 %v4817_v4 }
 0x203   : > { %2536 = vmatpush.bf16.msra.mxu0 %v4501_v31  ;;  %2549 = vmatpush.bf16.msra.mxu2 %v4821_v11 }
 0x206   : > { %2511 = vmatpush.bf16.msrb.mxu1 %v4457_v18  ;;  %2524 = vmatpush.bf16.msrb.mxu3 %v4777_v21 }
 0x207   : > { %2537 = vmatpush.bf16.msra.mxu0 %v4461_v24  ;;  %2550 = vmatpush.bf16.msra.mxu2 %v4781_v25 }
 0x20a   : > { %2512 = vmatpush.bf16.msrb.mxu1 %v4417_v30  ;;  %2525 = vmatpush.bf16.msrb.mxu3 %v4737_v32  ;;  %v1334_v32 = vld [vmem:[#allocation2 + $0x38] sm:$0xff] }
 0x20b   : > { %2538 = vmatpush.bf16.msra.mxu0 %v4421_v33  ;;  %2551 = vmatpush.bf16.msra.mxu2 %v4741_v34 }
 0x20d   : > { %2513 = vmatmul.bf16.vlgmr.msrb.gmra.mxu1 %v6758_v0  ;;  %2526 = vmatmul.bf16.vlgmr.msrb.gmra.mxu3 %v6760_v1 }
 0x20e   : > { %2539 = vmatmul.bf16.vlgmr.msra.gmra.mxu0 %v6758_v0  ;;  %2552 = vmatmul.bf16.vlgmr.msra.gmra.mxu2 %v6760_v1 }
 0x229   : > { %v2306_v35 = vpop.f32.mrf.mxu1 }
 0x22a   : > { %v2332_v36 = vpop.f32.mrf.mxu0 }
 0x22f   : > { %v2319_v39 = vpop.f32.mrf.mxu3 }
 0x230   : > { %v2320_v40 = vadd.f32 %v2319_v39, %v2306_v35  ;;  %v2345_v42 = vpop.f32.mrf.mxu2 }
 0x231   : > { %v2346_v45 = vadd.f32 %v2345_v42, %v2332_v36  ;;  %v2308_v46 = vpop.f32.mrf.mxu1 }
 0x232   : > { %v2557_v10 = vadd.f32 %v2320_v40, %v1325_v37  ;;  %v2334_v47 = vpop.f32.mrf.mxu0 }
 0x233   : > { %v2558_v48 = vadd.f32 %v2346_v45, %v1326_v41 }
 0x234   : > { %2567 = vst [vmem:[#allocation2 + $0x30] sm:$0xff] %v2557_v10 }
 0x235   : > { %2568 = vst [vmem:[#allocation2] sm:$0xff] %v2558_v48 }
 0x237   : > { %v2321_v49 = vpop.f32.mrf.mxu3 }
 0x238   : > { %v2347_v43 = vpop.f32.mrf.mxu2 }
 0x239   : > { %v2358_v50 = vpop.f32.mrf.mxu1 }
 0x23a   : > { %v2384_v0 = vpop.f32.mrf.mxu0 }
 0x23f   : > { %v2371_v1 = vpop.f32.mrf.mxu3 }
 0x240   : > { %v2372_v53 = vadd.f32 %v2371_v1, %v2358_v50  ;;  %v2397_v55 = vpop.f32.mrf.mxu2 }
 0x241   : > { %v2398_v17 = vadd.f32 %v2397_v55, %v2384_v0  ;;  %v2360_v56 = vpop.f32.mrf.mxu1 }
 0x242   : > { %v2559_v57 = vadd.f32 %v2372_v53, %v1327_v51  ;;  %v2386_v58 = vpop.f32.mrf.mxu0 }
 0x243   : > { %v2560_v8 = vadd.f32 %v2398_v17, %v1328_v54 }
 0x244   : > { %2569 = vst [vmem:[#allocation2 + $0x18] sm:$0xff] %v2559_v57 }
 0x245   : > { %2570 = vst [vmem:[#allocation2 + $0x10] sm:$0xff] %v2560_v8 }
 0x247   : > { %v2373_v60 = vpop.f32.mrf.mxu3 }
 0x248   : > { %v2399_v61 = vpop.f32.mrf.mxu2 }
 0x24a   : > { %v2410_v62 = vpop.f32.mrf.mxu1 }
 0x24d   : > { %v2436_v63 = vpop.f32.mrf.mxu0 }
 0x250   : > { %v2423_v59 = vpop.f32.mrf.mxu3 }
 0x251   : > { %v2424_v2 = vadd.f32 %v2423_v59, %v2410_v62 }
 0x252   : > { %v2412_v7 = vpop.f32.mrf.mxu1 }
 0x253   : > { %v2449_v6 = vpop.f32.mrf.mxu2  ;;  %v2561_v4 = vadd.f32 %v2424_v2, %v1329_v14 }
 0x254   : > { %v2450_v5 = vadd.f32 %v2449_v6, %v2436_v63 }
 0x255   : > { %v2438_v9 = vpop.f32.mrf.mxu0  ;;  %2571 = vst [vmem:[#allocation2 + $0x48] sm:$0xff] %v2561_v4 }
 0x256   : > { %v2562_v52 = vadd.f32 %v2450_v5, %v1330_v3 }
 0x258   : > { %2572 = vst [vmem:[#allocation2 + $0x28] sm:$0xff] %v2562_v52  ;;  %v2425_v31 = vpop.f32.mrf.mxu3 }
 0x25b   : > { %v2451_v11 = vpop.f32.mrf.mxu2 }
 0x26a   : > { %v2462_v12 = vpop.f32.mrf.mxu1 }
 0x26d   : > { %v2488_v13 = vpop.f32.mrf.mxu0 }
 0x270   : > { %v2475_v44 = vpop.f32.mrf.mxu3 }
 0x271   : > { %v2476_v15 = vadd.f32 %v2475_v44, %v2462_v12 }
 0x272   : > { %v2464_v22 = vpop.f32.mrf.mxu1 }
 0x273   : > { %v2501_v18 = vpop.f32.mrf.mxu2  ;;  %v2563_v23 = vadd.f32 %v2476_v15, %v1331_v38 }
 0x274   : > { %v2502_v21 = vadd.f32 %v2501_v18, %v2488_v13 }
 0x275   : > { %v2490_v24 = vpop.f32.mrf.mxu0  ;;  %2573 = vst [vmem:[#allocation2 + $0x8] sm:$0xff] %v2563_v23 }
 0x276   : > { %v2564_v25 = vadd.f32 %v2502_v21, %v1332_v16 }
 0x278   : > { %2574 = vst [vmem:[#allocation2 + $0x20] sm:$0xff] %v2564_v25  ;;  %v2477_v26 = vpop.f32.mrf.mxu3 }
 0x27b   : > { %v2503_v27 = vpop.f32.mrf.mxu2 }
 0x28a   : > { %v2514_v19 = vpop.f32.mrf.mxu1 }
 0x28b   : > { %v2540_v20 = vpop.f32.mrf.mxu0 }
 0x290   : > { %v2527_v29 = vpop.f32.mrf.mxu3 }
 0x291   : > { %v2528_v30 = vadd.f32 %v2527_v29, %v2514_v19  ;;  %v2553_v33 = vpop.f32.mrf.mxu2 }
 0x292   : > { %v2554_v34 = vadd.f32 %v2553_v33, %v2540_v20  ;;  %v2516_v35 = vpop.f32.mrf.mxu1 }
 0x293   : > { %v2565_v36 = vadd.f32 %v2528_v30, %v1333_v28  ;;  %v2542_v37 = vpop.f32.mrf.mxu0 }
 0x294   : > { %v2566_v39 = vadd.f32 %v2554_v34, %v1334_v32 }
 0x295   : > { %2575 = vst [vmem:[#allocation2 + $0x40] sm:$0xff] %v2565_v36  ;;  %2580 = sbr.rel (%p5022_p1) target bundleno = 942 (0x3ae), region = 84 }
 0x296   : > { %2576 = vst [vmem:[#allocation2 + $0x38] sm:$0xff] %v2566_v39 }
 0x298   : > { %v2529_v40 = vpop.f32.mrf.mxu3 }
 0x299   : > { %v2555_v41 = vpop.f32.mrf.mxu2 }
 0x29a   : > { %v5614_v42 = vld [vmem:[#allocation12 + $0x38] sm:$0xff]  ;;  %v5613_v46 = vld [vmem:[#allocation12 + $0x30] sm:$0xff]  ;;  %v5612_v50 = vld [vmem:[#allocation12 + $0x28] sm:$0xff] }
 0x29b   : > { %v5622_v45 = vld [vmem:[#allocation12 + $0x78] sm:$0xff]  ;;  %3692 = vmatpush.bf16.msra.mxu0 %v5614_v42  ;;  %v5621_v10 = vld [vmem:[#allocation12 + $0x70] sm:$0xff]  ;;  %v5620_v0 = vld [vmem:[#allocation12 + $0x68] sm:$0xff] }
 0x29c   : > { %3705 = vmatpush.bf16.msra.mxu1 %v5622_v45  ;;  %v5630_v47 = vld [vmem:[#allocation12 + $0xb8] sm:$0xff]  ;;  %v5629_v49 = vld [vmem:[#allocation12 + $0xb0] sm:$0xff]  ;;  %v5628_v51 = vld [vmem:[#allocation12 + $0xa8] sm:$0xff] }
 0x29d   : > { %v5638_v48 = vld [vmem:[#allocation12 + $0xf8] sm:$0xff]  ;;  %3718 = vmatpush.bf16.msra.mxu2 %v5630_v47  ;;  %v5637_v43 = vld [vmem:[#allocation12 + $0xf0] sm:$0xff]  ;;  %v5636_v1 = vld [vmem:[#allocation12 + $0xe8] sm:$0xff] }
 0x29e   : > { %3731 = vmatpush.bf16.msra.mxu3 %v5638_v48  ;;  %v5611_v53 = vld [vmem:[#allocation12 + $0x20] sm:$0xff]  ;;  %v5610_v56 = vld [vmem:[#allocation12 + $0x18] sm:$0xff]  ;;  %v6967_v8 = vld [vmem:[#allocation2 + $0x30] sm:$0xff] }
 0x29f   : > { %3693 = vmatpush.bf16.msra.mxu0 %v5613_v46  ;;  %v5619_v54 = vld [vmem:[#allocation12 + $0x60] sm:$0xff]  ;;  %v5618_v57 = vld [vmem:[#allocation12 + $0x58] sm:$0xff]  ;;  %v5609_v60 = vld [vmem:[#allocation12 + $0x10] sm:$0xff]  ;;  %v2598_v14 = vrot.slane %v6967_v8, 4  ;;  %v6985_v4 = vmul.f32 %v6967_v8, %v6967_v8 }
 0x2a0   : > { %3706 = vmatpush.bf16.msra.mxu1 %v5621_v10  ;;  %v5627_v55 = vld [vmem:[#allocation12 + $0xa0] sm:$0xff]  ;;  %v5626_v58 = vld [vmem:[#allocation12 + $0x98] sm:$0xff]  ;;  %v6973_v63 = vld [vmem:[#allocation2 + $0x10] sm:$0xff] }
 0x2a1   : > { %3719 = vmatpush.bf16.msra.mxu2 %v5629_v49  ;;  %v5635_v17 = vld [vmem:[#allocation12 + $0xe0] sm:$0xff]  ;;  %v6971_v62 = vld [vmem:[#allocation2 + $0x18] sm:$0xff]  ;;  %v2616_v7 = vrot.slane %v6973_v63, 4  ;;  %v2599_v11 = vadd.f32 %v2598_v14, %v6967_v8  ;;  %v5608_v29 = vld [vmem:[#allocation12 + $0x8] sm:$0xff] }
 0x2a2   : > { %3732 = vmatpush.bf16.msra.mxu3 %v5637_v43  ;;  %v6969_v61 = vld [vmem:[#allocation2] sm:$0xff]  ;;  %v6976_v2 = vld [vmem:[#allocation2 + $0x48] sm:$0xff]  ;;  %v2610_v5 = vrot.slane %v6971_v62, 4  ;;  %v5617_v9 = vld [vmem:[#allocation12 + $0x50] sm:$0xff] }
 0x2a3   : > { %3694 = vmatpush.bf16.msra.mxu0 %v5612_v50  ;;  %v5634_v59 = vld [vmem:[#allocation12 + $0xd8] sm:$0xff]  ;;  %v6978_v3 = vld [vmem:[#allocation2 + $0x28] sm:$0xff]  ;;  %v2604_v6 = vrot.slane %v6969_v61, 4  ;;  %v2622_v12 = vrot.slane %v6976_v2, 4  ;;  %v6996_v38 = vmul.f32 %v6969_v61, %v6969_v61  ;;  %v2617_v16 = vadd.f32 %v2616_v7, %v6973_v63  ;;  %v5625_v21 = vld [vmem:[#allocation12 + $0x90] sm:$0xff] }
 0x2a4   : > { %3707 = vmatpush.bf16.msra.mxu1 %v5620_v0  ;;  %v6987_v52 = vld [vmem:[#allocation2 + $0x8] sm:$0xff]  ;;  %v6989_v31 = vld [vmem:[#allocation2 + $0x20] sm:$0xff]  ;;  %v2628_v13 = vrot.slane %v6978_v3, 4  ;;  %v2611_v15 = vadd.f32 %v2610_v5, %v6971_v62  ;;  %v2600_v22 = vrot.slane %v2599_v11, 2  ;;  %v5633_v26 = vld [vmem:[#allocation12 + $0xd0] sm:$0xff] }
 0x2a5   : > { %3720 = vmatpush.bf16.msra.mxu2 %v5628_v51  ;;  %v2605_v44 = vadd.f32 %v2604_v6, %v6969_v61  ;;  %v2634_v18 = vrot.slane %v6987_v52, 4  ;;  %v2623_v23 = vadd.f32 %v2622_v12, %v6976_v2  ;;  %v2640_v25 = vrot.slane %v6989_v31, 4  ;;  %v5616_v30 = vld [vmem:[#allocation12 + $0x48] sm:$0xff]  ;;  %v5607_v0 = vld [vmem:[#allocation12] sm:$0xff] }
 0x2a6   : > { %3733 = vmatpush.bf16.msra.mxu3 %v5636_v1  ;;  %v2629_v24 = vadd.f32 %v2628_v13, %v6978_v3  ;;  %v2612_v19 = vrot.slane %v2611_v15, 2  ;;  %v2618_v20 = vrot.slane %v2617_v16, 2  ;;  %v2601_v32 = vadd.f32 %v2600_v22, %v2599_v11  ;;  %v5624_v41 = vld [vmem:[#allocation12 + $0x88] sm:$0xff]  ;;  %v5615_v51 = vld [vmem:[#allocation12 + $0x40] sm:$0xff]  ;;  %v5662_v11 = vld [vmem:[#allocation12 + $0x1b8] sm:$0xff] }
 0x2a7   : > { %3695 = vmatpush.bf16.msra.mxu0 %v5611_v53  ;;  %v2606_v27 = vrot.slane %v2605_v44, 2  ;;  %v2635_v28 = vadd.f32 %v2634_v18, %v6987_v52  ;;  %v2624_v33 = vrot.slane %v2623_v23, 2  ;;  %v2641_v35 = vadd.f32 %v2640_v25, %v6989_v31  ;;  %v5632_v47 = vld [vmem:[#allocation12 + $0xc8] sm:$0xff]  ;;  %v5631_v12 = vld [vmem:[#allocation12 + $0xc0] sm:$0xff]  ;;  %v5670_v18 = vld [vmem:[#allocation12 + $0x1f8] sm:$0xff] }
 0x2a8   : > { %3708 = vmatpush.bf16.msra.mxu1 %v5619_v54  ;;  %v2630_v34 = vrot.slane %v2629_v24, 2  ;;  %v2613_v37 = vadd.f32 %v2612_v19, %v2611_v15  ;;  %v2619_v39 = vadd.f32 %v2618_v20, %v2617_v16  ;;  %v2602_v42 = vrot.slane %v2601_v32, 1  ;;  %v5645_v25 = vld [vmem:[#allocation12 + $0x130] sm:$0xff] }
 0x2a9   : > { %3721 = vmatpush.bf16.msra.mxu2 %v5627_v55  ;;  %v2607_v36 = vadd.f32 %v2606_v27, %v2605_v44  ;;  %v2636_v40 = vrot.slane %v2635_v28, 2  ;;  %v2625_v45 = vadd.f32 %v2624_v33, %v2623_v23  ;;  %v2642_v10 = vrot.slane %v2641_v35, 2 }
 0x2aa   : > { %3734 = vmatpush.bf16.msra.mxu3 %v5635_v17  ;;  %v2631_v46 = vadd.f32 %v2630_v34, %v2629_v24  ;;  %v2614_v49 = vrot.slane %v2613_v37, 1  ;;  %v2620_v43 = vrot.slane %v2619_v39, 1  ;;  %v2603_v1 = vadd.f32 %v2602_v42, %v2601_v32  ;;  %v5646_v17 = vld [vmem:[#allocation12 + $0x138] sm:$0xff]  ;;  %v5661_v34 = vld [vmem:[#allocation12 + $0x1b0] sm:$0xff] }
 0x2ab   : > { %3696 = vmatpush.bf16.msra.mxu0 %v5610_v56  ;;  %v2608_v48 = vrot.slane %v2607_v36, 1  ;;  %v2637_v50 = vadd.f32 %v2636_v40, %v2635_v28  ;;  %v2626_v53 = vrot.slane %v2625_v45, 1  ;;  %v2643_v55 = vadd.f32 %v2642_v10, %v2641_v35  ;;  %v5654_v56 = vld [vmem:[#allocation12 + $0x178] sm:$0xff]  ;;  %v5669_v40 = vld [vmem:[#allocation12 + $0x1f0] sm:$0xff]  ;;  %v5644_v10 = vld [vmem:[#allocation12 + $0x128] sm:$0xff] }
 0x2ac   : > { %3709 = vmatpush.bf16.msra.mxu1 %v5618_v57  ;;  %v2632_v54 = vrot.slane %v2631_v46, 1  ;;  %v7009_v44 = vmul.f32 0.125, %v2603_v1  ;;  %v2671_v24 = vmul.f32 %v6973_v63, %v6973_v63  ;;  %v2672_v19 = vmul.f32 %v6976_v2, %v6976_v2 }
 0x2ad   : > { %3722 = vmatpush.bf16.msra.mxu2 %v5626_v58  ;;  %v2609_v57 = vadd.f32 %v2608_v48, %v2607_v36  ;;  %v2615_v58 = vadd.f32 %v2614_v49, %v2613_v37  ;;  %v2638_v14 = vrot.slane %v2637_v50, 1  ;;  %v2627_v6 = vadd.f32 %v2626_v53, %v2625_v45 }
 0x2ae   : > { %3735 = vmatpush.bf16.msra.mxu3 %v5634_v59  ;;  %v5623_v59 = vld [vmem:[#allocation12 + $0x80] sm:$0xff]  ;;  %v2633_v5 = vadd.f32 %v2632_v54, %v2631_v46  ;;  %v2644_v7 = vrot.slane %v2643_v55, 1  ;;  %v2673_v20 = vmul.f32 %v6978_v3, %v6978_v3  ;;  %v2674_v28 = vmul.f32 %v6987_v52, %v6987_v52  ;;  %v5660_v54 = vld [vmem:[#allocation12 + $0x1a8] sm:$0xff] }
 0x2af   : > { %3697 = vmatpush.bf16.msra.mxu0 %v5609_v60  ;;  %v2621_v60 = vadd.f32 %v2620_v43, %v2619_v39  ;;  %v2639_v13 = vadd.f32 %v2638_v14, %v2637_v50  ;;  %v7011_v15 = vmul.f32 0.125, %v2609_v57  ;;  %v7013_v16 = vmul.f32 0.125, %v2615_v58 }
 0x2b0   : > { %3710 = vmatpush.bf16.msra.mxu1 %v5617_v9  ;;  %v2670_v9 = vmul.f32 %v6971_v62, %v6971_v62  ;;  %v7017_v23 = vmul.f32 0.125, %v2627_v6  ;;  %v7021_v27 = vmul.f32 0.125, %v2633_v5  ;;  %v2678_v32 = vrot.slane %v6985_v4, 4  ;;  %v5651_v6 = vld [vmem:[#allocation12 + $0x160] sm:$0xff] }
 0x2b1   : > { %3723 = vmatpush.bf16.msra.mxu2 %v5625_v21  ;;  %v2645_v21 = vadd.f32 %v2644_v7, %v2643_v55  ;;  %v7015_v22 = vmul.f32 0.125, %v2621_v60  ;;  %v2684_v33 = vrot.slane %v6996_v38, 4  ;;  %v2696_v36 = vrot.slane %v2671_v24, 4 }
 0x2b2   : > { %3736 = vmatpush.bf16.msra.mxu3 %v5633_v26  ;;  %v5653_v26 = vld [vmem:[#allocation12 + $0x170] sm:$0xff]  ;;  %v2690_v35 = vrot.slane %v2670_v9, 4  ;;  %v2702_v37 = vrot.slane %v2672_v19, 4  ;;  %v2708_v39 = vrot.slane %v2673_v20, 4  ;;  %v2714_v45 = vrot.slane %v2674_v28, 4 }
 0x2b3   : > { %3698 = vmatpush.bf16.msra.mxu0 %v5608_v29  ;;  %v7029_v29 = vmul.f32 0.125, %v2639_v13  ;;  %v2685_v42 = vadd.f32 %v2684_v33, %v6996_v38  ;;  %v7037_v48 = vmul.f32 0.125, %v2645_v21  ;;  %v2697_v43 = vadd.f32 %v2696_v36, %v2671_v24  ;;  %v5659_v24 = vld [vmem:[#allocation12 + $0x1a0] sm:$0xff]  ;;  %v5650_v36 = vld [vmem:[#allocation12 + $0x158] sm:$0xff] }
 0x2b4   : > { %3711 = vmatpush.bf16.msra.mxu1 %v5616_v30  ;;  %v2675_v30 = vmul.f32 %v6989_v31, %v6989_v31  ;;  %v2691_v49 = vadd.f32 %v2690_v35, %v2670_v9  ;;  %v2703_v50 = vadd.f32 %v2702_v37, %v2672_v19  ;;  %v2709_v1 = vadd.f32 %v2708_v39, %v2673_v20  ;;  %v5642_v35 = vld [vmem:[#allocation12 + $0x118] sm:$0xff] }
 0x2b5   : > { %3724 = vmatpush.bf16.msra.mxu2 %v5624_v41  ;;  %v2679_v41 = vadd.f32 %v2678_v32, %v6985_v4  ;;  %v2715_v53 = vadd.f32 %v2714_v45, %v2674_v28  ;;  %v2698_v55 = vrot.slane %v2697_v43, 2  ;;  %v5667_v28 = vld [vmem:[#allocation12 + $0x1e0] sm:$0xff] }
 0x2b6   : > { %3737 = vmatpush.bf16.msra.mxu3 %v5632_v47  ;;  %v2720_v46 = vrot.slane %v2675_v30, 4  ;;  %v5652_v47 = vld [vmem:[#allocation12 + $0x168] sm:$0xff]  ;;  %v2692_v4 = vrot.slane %v2691_v49, 2  ;;  %v2704_v38 = vrot.slane %v2703_v50, 2  ;;  %v2710_v60 = vrot.slane %v2709_v1, 2 }
 0x2b7   : > { %3699 = vmatpush.bf16.msra.mxu0 %v5607_v0  ;;  %v2680_v0 = vrot.slane %v2679_v41, 2  ;;  %v2716_v14 = vrot.slane %v2715_v53, 2  ;;  %v2699_v7 = vadd.f32 %v2698_v55, %v2697_v43 }
 0x2b8   : > { %3712 = vmatpush.bf16.msra.mxu1 %v5615_v51  ;;  %v2686_v51 = vrot.slane %v2685_v42, 2  ;;  %v2693_v5 = vadd.f32 %v2692_v4, %v2691_v49  ;;  %v2705_v9 = vadd.f32 %v2704_v38, %v2703_v50  ;;  %v5649_v4 = vld [vmem:[#allocation12 + $0x150] sm:$0xff]  ;;  %v2750_v38 = vmul.f32 %v7013_v16, %v7013_v16 }
 0x2b9   : > { %3725 = vmatpush.bf16.msra.mxu2 %v5623_v59  ;;  %v2681_v57 = vadd.f32 %v2680_v0, %v2679_v41  ;;  %v5643_v59 = vld [vmem:[#allocation12 + $0x120] sm:$0xff]  ;;  %v2717_v21 = vadd.f32 %v2716_v14, %v2715_v53  ;;  %v2749_v53 = vmul.f32 %v7011_v15, %v7011_v15 }
 0x2ba   : > { %3738 = vmatpush.bf16.msra.mxu3 %v5631_v12  ;;  %v2687_v58 = vadd.f32 %v2686_v51, %v2685_v42  ;;  %v2706_v19 = vrot.slane %v2705_v9, 1 }
 0x2bb   : > { %3744 = vmatpush.bf16.msrb.mxu0 %v5646_v17  ;;  %v2721_v17 = vadd.f32 %v2720_v46, %v2675_v30  ;;  %v2682_v12 = vrot.slane %v2681_v57, 1 }
 0x2bc   : > { %3757 = vmatpush.bf16.msrb.mxu1 %v5654_v56  ;;  %v5668_v56 = vld [vmem:[#allocation12 + $0x1e8] sm:$0xff]  ;;  %v2688_v13 = vrot.slane %v2687_v58, 1 }
 0x2bd   : > { %3770 = vmatpush.bf16.msrb.mxu2 %v5662_v11  ;;  %v2722_v11 = vrot.slane %v2721_v17, 2  ;;  %v2683_v30 = vadd.f32 %v2682_v12, %v2681_v57  ;;  %v2753_v57 = vmul.f32 %v7021_v27, %v7021_v27 }
 0x2be   : > { %3783 = vmatpush.bf16.msrb.mxu3 %v5670_v18  ;;  %v2711_v18 = vadd.f32 %v2710_v60, %v2709_v1  ;;  %v2689_v32 = vadd.f32 %v2688_v13, %v2687_v58  ;;  %v2748_v1 = vmul.f32 %v7009_v44, %v7009_v44  ;;  %v2754_v58 = vmul.f32 %v7029_v29, %v7029_v29 }
 0x2bf   : > { %3745 = vmatpush.bf16.msrb.mxu0 %v5645_v25  ;;  %v2694_v25 = vrot.slane %v2693_v5, 1  ;;  %v2723_v20 = vadd.f32 %v2722_v11, %v2721_v17  ;;  %v2738_v46 = vmul.f32 0.125, %v2683_v30  ;;  %v2751_v17 = vmul.f32 %v7015_v22, %v7015_v22 }
 0x2c0   : > { %3758 = vmatpush.bf16.msrb.mxu1 %v5653_v26  ;;  %v2700_v26 = vrot.slane %v2699_v7, 1  ;;  %v2712_v33 = vrot.slane %v2711_v18, 1  ;;  %v2755_v60 = vmul.f32 %v7037_v48, %v7037_v48 }
 0x2c1   : > { %3771 = vmatpush.bf16.msrb.mxu2 %v5661_v34  ;;  %v2718_v34 = vrot.slane %v2717_v21, 1  ;;  %v2695_v37 = vadd.f32 %v2694_v25, %v2693_v5  ;;  %v2724_v41 = vrot.slane %v2723_v20, 1  ;;  %v2758_v14 = vsub.f32 %v2738_v46, %v2748_v1 }
 0x2c2   : > { %3784 = vmatpush.bf16.msrb.mxu3 %v5669_v40  ;;  %v2701_v39 = vadd.f32 %v2700_v26, %v2699_v7  ;;  %v2707_v40 = vadd.f32 %v2706_v19, %v2705_v9  ;;  %v2713_v42 = vadd.f32 %v2712_v33, %v2711_v18  ;;  %v5640_v18 = vld [vmem:[#allocation12 + $0x108] sm:$0xff] }
 0x2c3   : > { %3746 = vmatpush.bf16.msrb.mxu0 %v5644_v10  ;;  %v2719_v45 = vadd.f32 %v2718_v34, %v2717_v21  ;;  %v2739_v10 = vmul.f32 0.125, %v2689_v32  ;;  %v2740_v49 = vmul.f32 0.125, %v2695_v37  ;;  %v2768_v13 = vmax.f32 %v2758_v14, 0.0  ;;  %v5648_v21 = vld [vmem:[#allocation12 + $0x148] sm:$0xff]  ;;  %v7066_v37 = vld [vmem:[#allocation2 + $0x40] sm:$0xff] }
 0x2c4   : > { %3759 = vmatpush.bf16.msrb.mxu1 %v5652_v47  ;;  %v2725_v47 = vadd.f32 %v2724_v41, %v2723_v20  ;;  %v2741_v43 = vmul.f32 0.125, %v2701_v39  ;;  %v2742_v50 = vmul.f32 0.125, %v2707_v40  ;;  %v2743_v0 = vmul.f32 0.125, %v2713_v42  ;;  %v7077_v42 = vld [vmem:[#allocation2 + $0x38] sm:$0xff] }
 0x2c5   : > { %3772 = vmatpush.bf16.msrb.mxu2 %v5660_v54  ;;  %v2744_v51 = vmul.f32 0.125, %v2719_v45  ;;  %v5641_v54 = vld [vmem:[#allocation12 + $0x110] sm:$0xff]  ;;  %v7055_v32 = vadd.f32 1e-05, %v2768_v13  ;;  %v2676_v45 = vmul.f32 %v7066_v37, %v7066_v37 }
 0x2c6   : > { %3785 = vmatpush.bf16.msrb.mxu3 %v5668_v56  ;;  %v2745_v55 = vmul.f32 0.125, %v2725_v47  ;;  %v2752_v56 = vmul.f32 %v7017_v23, %v7017_v23  ;;  %v2761_v5 = vsub.f32 %v2741_v43, %v2751_v17  ;;  %v2763_v9 = vsub.f32 %v2743_v0, %v2753_v57 }
 0x2c7   : > { %3747 = vmatpush.bf16.msrb.mxu0 %v5643_v59  ;;  %v2759_v59 = vsub.f32 %v2739_v10, %v2749_v53  ;;  %v2764_v11 = vsub.f32 %v2744_v51, %v2754_v58  ;;  %5801 = vrsqrt.f32 %v7055_v32  ;;  %vm2794_vm8 = vweird.f32 %v7055_v32 }
 0x2c8   : > { %3760 = vmatpush.bf16.msrb.mxu1 %v5651_v6  ;;  %v2760_v6 = vsub.f32 %v2740_v49, %v2750_v38  ;;  %v2762_v7 = vsub.f32 %v2742_v50, %v2752_v56  ;;  %v2765_v12 = vsub.f32 %v2745_v55, %v2755_v60  ;;  %v2771_v26 = vmax.f32 %v2761_v5, 0.0 }
 0x2c9   : > { %3773 = vmatpush.bf16.msrb.mxu2 %v5659_v24  ;;  %v2769_v24 = vmax.f32 %v2759_v59, 0.0  ;;  %v2773_v20 = vmax.f32 %v2763_v9, 0.0  ;;  %v2646_v10 = vrot.slane %v7066_v37, 4  ;;  %v2652_v47 = vrot.slane %v7077_v42, 4 }
 0x2ca   : > { %3786 = vmatpush.bf16.msrb.mxu3 %v5667_v28  ;;  %v2770_v25 = vmax.f32 %v2760_v6, 0.0  ;;  %v2772_v19 = vmax.f32 %v2762_v7, 0.0  ;;  %v2774_v28 = vmax.f32 %v2764_v11, 0.0  ;;  %v2775_v30 = vmax.f32 %v2765_v12, 0.0 }
 0x2cb   : > { %3748 = vmatpush.bf16.msrb.mxu0 %v5642_v35  ;;  %v7057_v33 = vadd.f32 1e-05, %v2769_v24  ;;  %v7061_v35 = vadd.f32 1e-05, %v2771_v26  ;;  %v7068_v39 = vadd.f32 1e-05, %v2773_v20  ;;  %v7094_v49 = vmul.f32 %v7077_v42, %v7077_v42 }
 0x2cc   : > { %3761 = vmatpush.bf16.msrb.mxu1 %v5650_v36  ;;  %v7059_v34 = vadd.f32 1e-05, %v2770_v25  ;;  %v7063_v36 = vadd.f32 1e-05, %v2772_v19  ;;  %v7071_v40 = vadd.f32 1e-05, %v2774_v28  ;;  %v7110_v53 = vadd.f32 %v2646_v10, %v7066_v37 }
 0x2cd   : > { %5803 = vrsqrt.f32 %v7057_v33  ;;  %v7074_v41 = vadd.f32 1e-05, %v2775_v30  ;;  %vm2804_vm9 = vweird.f32 %v7057_v33  ;;  %v7086_v46 = vpop.eup %5801  ;;  %vm2824_vm11 = vweird.f32 %v7061_v35 }
 0x2ce   : > { %5805 = vrsqrt.f32 %v7059_v34  ;;  %vm2814_vm10 = vweird.f32 %v7059_v34  ;;  %v2789_v50 = vmul.f32 %v7086_v46, %v7055_v32  ;;  %vm2795_vm12 = vweird.f32 %v7086_v46 }
 0x2cf   : > { %3749 = vmatpush.bf16.msrb.mxu0 %v5641_v54  ;;  %5807 = vrsqrt.f32 %v7061_v35  ;;  %vm2834_vm13 = vweird.f32 %v7063_v36  ;;  %v2726_v0 = vrot.slane %v2676_v45, 4  ;;  %vm2844_vm15 = vweird.f32 %v7068_v39  ;;  %vm7153_vm6 = vmor %vm2794_vm8, %vm2795_vm12 }
 0x2d0   : > { %3762 = vmatpush.bf16.msrb.mxu1 %v5649_v4  ;;  %5809 = vrsqrt.f32 %v7063_v36  ;;  %v7113_v54 = vadd.f32 %v2652_v47, %v7077_v42  ;;  %v2790_v55 = vmul.f32 %v7086_v46, %v2789_v50  ;;  %vm2854_vm1 = vweird.f32 %v7071_v40 }
 0x2d1   : > { %5811 = vrsqrt.f32 %v7068_v39  ;;  %v7122_v17 = vadd.f32 %v2726_v0, %v2676_v45  ;;  %v2648_v60 = vrot.slane %v7110_v53, 2  ;;  %v5658_v45 = vld [vmem:[#allocation12 + $0x198] sm:$0xff] }
 0x2d2   : > { %5813 = vrsqrt.f32 %v7071_v40  ;;  %v2791_v59 = vmul.f32 0.5, %v2790_v55  ;;  %3774 = vmatpush.bf16.msrb.mxu2 %v5658_v45 }
 0x2d3   : > { %3750 = vmatpush.bf16.msrb.mxu0 %v5640_v18  ;;  %v7096_v43 = vpop.eup %5803  ;;  %5815 = vrsqrt.f32 %v7074_v41 }
 0x2d4   : > { %3763 = vmatpush.bf16.msrb.mxu1 %v5648_v21  ;;  %v7103_v51 = vpop.eup %5805  ;;  %v2799_v1 = vmul.f32 %v7096_v43, %v7057_v33  ;;  %vm2805_vm14 = vweird.f32 %v7096_v43  ;;  %v2792_v18 = vsub.f32 1.5, %v2791_v59 }
 0x2d5   : > { %v7115_v4 = vpop.eup %5807  ;;  %v2809_v38 = vmul.f32 %v7103_v51, %v7059_v34  ;;  %vm2815_vm0 = vweird.f32 %v7103_v51  ;;  %vm7164_vm7 = vmor %vm2804_vm9, %vm2805_vm14  ;;  %vm7390_vm14 = vweird.f32 %v7074_v41  ;;  %v2732_v34 = vrot.slane %v7094_v49, 4 }
 0x2d6   : > { %v7124_v56 = vpop.eup %5809  ;;  %v2800_v57 = vmul.f32 %v7096_v43, %v2799_v1  ;;  %v2819_v58 = vmul.f32 %v7115_v4, %v7061_v35  ;;  %vm2825_vm2 = vweird.f32 %v7115_v4  ;;  %v2793_v30 = vmul.f32 %v7086_v46, %v2792_v18  ;;  %vm7174_vm8 = vmor %vm2814_vm10, %vm2815_vm0 }
 0x2d7   : > { %v7131_v14 = vpop.eup %5811  ;;  %v2810_v6 = vmul.f32 %v7103_v51, %v2809_v38  ;;  %v2829_v5 = vmul.f32 %v7124_v56, %v7063_v36  ;;  %vm2835_vm3 = vweird.f32 %v7124_v56  ;;  %vm7188_vm9 = vmor %vm2824_vm11, %vm2825_vm2  ;;  %vm2911_vm0 = vcmask 1044484  }
 0x2d8   : > { %v7137_v7 = vpop.eup %5813  ;;  %v2801_v9 = vmul.f32 0.5, %v2800_v57  ;;  %v2820_v11 = vmul.f32 %v7115_v4, %v2819_v58  ;;  %v2839_v12 = vmul.f32 %v7131_v14, %v7068_v39  ;;  %vm2845_vm4 = vweird.f32 %v7131_v14 }
 0x2d9   : > { %v7144_v13 = vpop.eup %5815  ;;  %v2811_v21 = vmul.f32 0.5, %v2810_v6  ;;  %v2830_v24 = vmul.f32 %v7124_v56, %v2829_v5  ;;  %v2849_v25 = vmul.f32 %v7137_v7, %v7071_v40  ;;  %vm2855_vm5 = vweird.f32 %v7137_v7  ;;  %vm7213_vm10 = vmor %vm2844_vm15, %vm2845_vm4 }
 0x2da   : > { %v2802_v19 = vsub.f32 1.5, %v2801_v9  ;;  %v2821_v20 = vmul.f32 0.5, %v2820_v11  ;;  %v2840_v28 = vmul.f32 %v7131_v14, %v2839_v12  ;;  %v2859_v55 = vmul.f32 %v7144_v13, %v7074_v41  ;;  %vm7226_vm12 = vmor %vm2854_vm1, %vm2855_vm5 }
 0x2db   : > { %v2812_v32 = vsub.f32 1.5, %v2811_v21  ;;  %v2831_v10 = vmul.f32 0.5, %v2830_v24  ;;  %v2850_v47 = vmul.f32 %v7137_v7, %v2849_v25  ;;  %v2797_v38 = vsel %vm7153_vm6, %v7086_v46, %v2793_v30  ;;  %vm7200_vm6 = vmor %vm2834_vm13, %vm2835_vm3 }
 0x2dc   : > { %v2803_v50 = vmul.f32 %v7096_v43, %v2802_v19  ;;  %v2822_v1 = vsub.f32 1.5, %v2821_v20  ;;  %v2841_v33 = vmul.f32 0.5, %v2840_v28  ;;  %v2860_v9 = vmul.f32 %v7144_v13, %v2859_v55  ;;  %v5639_v20 = vld [vmem:[#allocation12 + $0x100] sm:$0xff] }
 0x2dd   : > { %v2813_v57 = vmul.f32 %v7103_v51, %v2812_v32  ;;  %v2832_v58 = vsub.f32 1.5, %v2831_v10  ;;  %v2851_v59 = vmul.f32 0.5, %v2850_v47  ;;  %vm2865_vm11 = vweird.f32 %v7144_v13  ;;  %v5647_v28 = vld [vmem:[#allocation12 + $0x140] sm:$0xff]  ;;  %3751 = vmatpush.bf16.msrb.mxu0 %v5639_v20 }
 0x2de   : > { %v2807_v6 = vsel %vm7164_vm7, %v7096_v43, %v2803_v50  ;;  %v2823_v5 = vmul.f32 %v7115_v4, %v2822_v1  ;;  %v2842_v35 = vsub.f32 1.5, %v2841_v33  ;;  %v2861_v39 = vmul.f32 0.5, %v2860_v9  ;;  %vm7244_vm15 = vmor %vm7390_vm14, %vm2865_vm11  ;;  %3764 = vmatpush.bf16.msrb.mxu1 %v5647_v28  ;;  %v5657_v1 = vld [vmem:[#allocation12 + $0x190] sm:$0xff] }
 0x2df   : > { %v2817_v11 = vsel %vm7174_vm8, %v7103_v51, %v2813_v57  ;;  %v2833_v12 = vmul.f32 %v7124_v56, %v2832_v58  ;;  %v2852_v36 = vsub.f32 1.5, %v2851_v59  ;;  %v2898_v24 = vrot.slane %v2807_v6, 7  ;;  %3775 = vmatpush.bf16.msrb.mxu2 %v5657_v1 }
 0x2e0   : > { %v2827_v18 = vsel %vm7188_vm9, %v7115_v4, %v2823_v5  ;;  %v2843_v21 = vmul.f32 %v7131_v14, %v2842_v35  ;;  %v2899_v19 = vrot.slane %v2817_v11, 6  ;;  %v2862_v30 = vsub.f32 1.5, %v2861_v39  ;;  %v5656_v5 = vld [vmem:[#allocation12 + $0x188] sm:$0xff] }
 0x2e1   : > { %v2837_v25 = vsel %vm7200_vm6, %v7124_v56, %v2833_v12  ;;  %v2853_v26 = vmul.f32 %v7137_v7, %v2852_v36  ;;  %v2900_v4 = vrot.slane %v2827_v18, 5  ;;  %vm2909_vm13 = vcmask 1041408   ;;  %v2591_v35 = vld [vmem:[#allocation11] ss:$2 sm:$0xff] }
 0x2e2   : > { %v2847_v40 = vsel %vm7213_vm10, %v7131_v14, %v2843_v21  ;;  %v2901_v10 = vrot.slane %v2837_v25, 4  ;;  %v2863_v14 = vmul.f32 %v7144_v13, %v2862_v30  ;;  %vm7393_vm1 = vcmask 1040384   ;;  %v5664_v18 = vld [vmem:[#allocation12 + $0x1c8] sm:$0xff]  ;;  %v5655_v21 = vld [vmem:[#allocation12 + $0x180] sm:$0xff] }
 0x2e3   : > { %v2857_v32 = vsel %vm7226_vm12, %v7137_v7, %v2853_v26  ;;  %v2902_v47 = vrot.slane %v2847_v40, 3  ;;  %v2906_v50 = vsel %vm7393_vm1, %v2797_v38, %v2898_v24  ;;  %vm7394_vm2 = vcmask 1042434   ;;  %v5666_v7 = vld [vmem:[#allocation12 + $0x1d8] sm:$0xff]  ;;  %3776 = vmatpush.bf16.msrb.mxu2 %v5656_v5  ;;  %vm7395_vm7 = vmmov %vm7393_vm1 }
 0x2e4   : > { %v2908_v0 = vsel %vm7394_vm2, %v2899_v19, %v2900_v4  ;;  %v2649_v41 = vadd.f32 %v2648_v60, %v7110_v53  ;;  %v2903_v33 = vrot.slane %v2857_v32, 2  ;;  %v2654_v55 = vrot.slane %v7113_v54, 2  ;;  %3787 = vmatpush.bf16.msrb.mxu3 %v5666_v7  ;;  %v5665_v60 = vld [vmem:[#allocation12 + $0x1d0] sm:$0xff]  ;;  %vm7396_vm8 = vmmov %vm7394_vm2 }
 0x2e5   : > { %v2728_v57 = vrot.slane %v7122_v17, 2  ;;  %v2867_v38 = vsel %vm7244_vm15, %v7144_v13, %v2863_v14  ;;  %vm2913_vm3 = vcmask 1046534   ;;  %v2912_v59 = vsel %vm2911_vm0, %v2901_v10, %v2902_v47  ;;  %v5663_v10 = vld [vmem:[#allocation12 + $0x1c0] sm:$0xff]  ;;  %vm7399_vm14 = vmmov %vm7393_vm1 }
 0x2e6   : > { %v2904_v58 = vrot.slane %v2867_v38, 1  ;;  %vm2915_vm4 = vcmask 1045508   ;;  %v2733_v6 = vadd.f32 %v2732_v34, %v7094_v49  ;;  %v2910_v53 = vsel %vm2909_vm13, %v2906_v50, %v2908_v0  ;;  %vm7400_vm15 = vmmov %vm7393_vm1 }
 0x2e7   : > { %vm2917_vm5 = vcmask 1043456   ;;  %v2650_v46 = vrot.slane %v2649_v41, 1  ;;  %v2655_v13 = vadd.f32 %v2654_v55, %v7113_v54  ;;  %v2729_v11 = vadd.f32 %v2728_v57, %v7122_v17  ;;  %3777 = vmatpush.bf16.msrb.mxu2 %v5655_v21  ;;  %v2595_v57 = vld [vmem:[#allocation11 + $0x1] ss:$2 sm:$0xff] }
 0x2e8   : > { %v2914_v9 = vsel %vm2913_vm3, %v2903_v33, %v2904_v58  ;;  %v2734_v12 = vrot.slane %v2733_v6, 2  ;;  %3788 = vmatpush.bf16.msrb.mxu3 %v5665_v60 }
 0x2e9   : > { %v2916_v43 = vsel %vm2915_vm4, %v2912_v59, %v2914_v9  ;;  %v2651_v51 = vadd.f32 %v2650_v46, %v2649_v41  ;;  %v2656_v39 = vrot.slane %v2655_v13, 1  ;;  %v2730_v24 = vrot.slane %v2729_v11, 1 }
 0x2ea   : > { %v2918_v49 = vsel %vm2917_vm5, %v2910_v53, %v2916_v43  ;;  %v2735_v25 = vadd.f32 %v2734_v12, %v2733_v6 }
 0x2eb   : > { %v7268_v36 = vmul.f32 %v2918_v49, %v2591_v35  ;;  %v7294_v0 = vmul.f32 0.125, %v2651_v51  ;;  %v2657_v55 = vadd.f32 %v2656_v39, %v2655_v13 }
 0x2ec   : > { %3789 = vmatpush.bf16.msrb.mxu3 %v5664_v18  ;;  %v2736_v58 = vrot.slane %v2735_v25, 1 }
 0x2ed   : > { %v2926_v26 = vperm.slane %v7268_v36, 0  ;;  %v2927_v54 = vperm.slane %v7268_v36, 1  ;;  %v2928_v17 = vperm.slane %v7268_v36, 2  ;;  %v2929_v19 = vperm.slane %v7268_v36, 3 }
 0x2ee   : > { %v2930_v4 = vperm.slane %v7268_v36, 4  ;;  %v2931_v20 = vperm.slane %v7268_v36, 5  ;;  %v2932_v28 = vperm.slane %v7268_v36, 6  ;;  %v2933_v40 = vperm.slane %v7268_v36, 7 }
 0x2ef   : > { %v2946_v30 = vmul.f32 %v2926_v26, %v7009_v44  ;;  %v2947_v45 = vmul.f32 %v2927_v54, %v7011_v15  ;;  %v2948_v32 = vmul.f32 %v2928_v17, %v7013_v16  ;;  %v2949_v56 = vmul.f32 %v2929_v19, %v7015_v22 }
 0x2f0   : > { %v2950_v47 = vmul.f32 %v2930_v4, %v7017_v23  ;;  %v2951_v14 = vmul.f32 %v2931_v20, %v7021_v27  ;;  %v2952_v44 = vmul.f32 %v2932_v28, %v7029_v29  ;;  %v2953_v15 = vmul.f32 %v2933_v40, %v7037_v48  ;;  %3790 = vmatpush.bf16.msrb.mxu3 %v5663_v10 }
 0x2f1   : > { %v2966_v16 = vrot.slane %v2947_v45, 7  ;;  %v2967_v22 = vrot.slane %v2948_v32, 6  ;;  %v2968_v50 = vrot.slane %v2949_v56, 5  ;;  %v2731_v29 = vadd.f32 %v2730_v24, %v2729_v11  ;;  %v5686_v56 = vld [vmem:[#allocation12 + $0x278] sm:$0xff] }
 0x2f2   : > { %v2969_v7 = vrot.slane %v2950_v47, 4  ;;  %v2970_v23 = vrot.slane %v2951_v14, 3  ;;  %v2971_v1 = vrot.slane %v2952_v44, 2  ;;  %v2972_v41 = vrot.slane %v2953_v15, 1 }
 0x2f3   : > { %v2974_v27 = vsel %vm7395_vm7, %v2946_v30, %v2966_v16  ;;  %v2975_v33 = vsel %vm7396_vm8, %v2967_v22, %v2968_v50  ;;  %v2986_v53 = vmul.f32 %v2926_v26, %v6967_v8  ;;  %v2987_v5 = vmul.f32 %v2927_v54, %v6969_v61  ;;  %v5677_v50 = vld [vmem:[#allocation12 + $0x230] sm:$0xff] }
 0x2f4   : > { %v2976_v34 = vsel %vm2909_vm13, %v2974_v27, %v2975_v33  ;;  %v2977_v48 = vsel %vm2911_vm0, %v2969_v7, %v2970_v23  ;;  %v2978_v38 = vsel %vm2913_vm3, %v2971_v1, %v2972_v41  ;;  %v2988_v46 = vmul.f32 %v2928_v17, %v6971_v62 }
 0x2f5   : > { %v2979_v59 = vsel %vm2915_vm4, %v2977_v48, %v2978_v38  ;;  %v2989_v35 = vmul.f32 %v2929_v19, %v6973_v63  ;;  %v7307_v9 = vmul.f32 0.125, %v2657_v55  ;;  %v2737_v13 = vadd.f32 %v2736_v58, %v2735_v25  ;;  %v5678_v19 = vld [vmem:[#allocation12 + $0x238] sm:$0xff]  ;;  %v5676_v55 = vld [vmem:[#allocation12 + $0x228] sm:$0xff]  ;;  %v5675_v48 = vld [vmem:[#allocation12 + $0x220] sm:$0xff] }
 0x2f6   : > { %v2980_v6 = vsel %vm2917_vm5, %v2976_v34, %v2979_v59  ;;  %v2746_v11 = vmul.f32 0.125, %v2731_v29  ;;  %v2756_v12 = vmul.f32 %v7294_v0, %v7294_v0  ;;  %v2990_v47 = vmul.f32 %v2930_v4, %v6976_v2  ;;  %v5685_v2 = vld [vmem:[#allocation12 + $0x270] sm:$0xff] }
 0x2f7   : > { %v2984_v60 = vsub.f32 %v2595_v57, %v2980_v6  ;;  %v2747_v61 = vmul.f32 0.125, %v2737_v13  ;;  %v2757_v62 = vmul.f32 %v7307_v9, %v7307_v9  ;;  %v2991_v14 = vmul.f32 %v2931_v20, %v6978_v3  ;;  %v5682_v13 = vld [vmem:[#allocation12 + $0x258] sm:$0xff] }
 0x2f8   : > { %v2766_v63 = vsub.f32 %v2746_v11, %v2756_v12  ;;  %v2992_v7 = vmul.f32 %v2932_v28, %v6987_v52  ;;  %v2993_v3 = vmul.f32 %v2933_v40, %v6989_v31  ;;  %v5684_v52 = vld [vmem:[#allocation12 + $0x268] sm:$0xff]  ;;  %v5683_v40 = vld [vmem:[#allocation12 + $0x260] sm:$0xff] }
 0x2f9   : > { %v2998_v43 = vperm.slane %v2984_v60, 0  ;;  %v2999_v49 = vperm.slane %v2984_v60, 1  ;;  %v3000_v18 = vperm.slane %v2984_v60, 2  ;;  %v3001_v21 = vperm.slane %v2984_v60, 3 }
 0x2fa   : > { %v3002_v44 = vperm.slane %v2984_v60, 4  ;;  %v3003_v15 = vperm.slane %v2984_v60, 5  ;;  %v2767_v16 = vsub.f32 %v2747_v61, %v2757_v62  ;;  %v2776_v22 = vmax.f32 %v2766_v63, 0.0  ;;  %v5672_v61 = vld [vmem:[#allocation12 + $0x208] sm:$0xff] }
 0x2fb   : > { %v3018_v51 = vadd.f32 %v2998_v43, %v2986_v53  ;;  %v3019_v8 = vadd.f32 %v2999_v49, %v2987_v5  ;;  %v3020_v39 = vadd.f32 %v3000_v18, %v2988_v46  ;;  %v3021_v24 = vadd.f32 %v3001_v21, %v2989_v35  ;;  %v5674_v5 = vld [vmem:[#allocation12 + $0x218] sm:$0xff]  ;;  %v5673_v49 = vld [vmem:[#allocation12 + $0x210] sm:$0xff]  ;;  %v5680_v63 = vld [vmem:[#allocation12 + $0x248] sm:$0xff] }
 0x2fc   : > { %v3004_v23 = vperm.slane %v2984_v60, 6  ;;  %v3005_v4 = vperm.slane %v2984_v60, 7  ;;  %v2777_v20 = vmax.f32 %v2767_v16, 0.0  ;;  %v2786_v1 = vadd.f32 1e-05, %v2776_v22 }
 0x2fd   : > { %v3028_v26 = vmax.f32 %v3018_v51, 0.0  ;;  %v3029_v54 = vmax.f32 %v3019_v8, 0.0  ;;  %v3030_v25 = vmax.f32 %v3020_v39, 0.0  ;;  %v3031_v17 = vmax.f32 %v3021_v24, 0.0  ;;  %v5681_v51 = vld [vmem:[#allocation12 + $0x250] sm:$0xff] }
 0x2fe   : > { %v3022_v41 = vadd.f32 %v3002_v44, %v2990_v47  ;;  %v3023_v27 = vadd.f32 %v3003_v15, %v2991_v14  ;;  %v2787_v33 = vadd.f32 1e-05, %v2777_v20  ;;  %5817 = vrsqrt.f32 %v2786_v1  ;;  %v2597_v44 = vld [vmem:[#allocation11 + $0x11] ss:$2 sm:$0x3] }
 0x2ff   : > { %v3038_v30 = vpack.c.bf16 %v3028_v26, %v3028_v26  ;;  %v3039_v45 = vpack.c.bf16 %v3029_v54, %v3029_v54  ;;  %v3040_v32 = vpack.c.bf16 %v3030_v25, %v3030_v25  ;;  %v3041_v10 = vpack.c.bf16 %v3031_v17, %v3031_v17  ;;  %v2593_v25 = vld [vmem:[#allocation11 + $0x10] ss:$2 sm:$0x3] }
 0x300   : > { %v3024_v29 = vadd.f32 %v3004_v23, %v2992_v7  ;;  %v3025_v28 = vadd.f32 %v3005_v4, %v2993_v3  ;;  %5819 = vrsqrt.f32 %v2787_v33  ;;  %v3032_v57 = vmax.f32 %v3022_v41, 0.0 }
 0x301   : > { %3700 = vmatmul.bf16.vlgmr.msra.gmra.mxu0 %v3038_v30  ;;  %3713 = vmatmul.bf16.vlgmr.msra.gmra.mxu1 %v3039_v45  ;;  %v3033_v34 = vmax.f32 %v3023_v27, 0.0  ;;  %vm2874_vm9 = vweird.f32 %v2786_v1  ;;  %vm2884_vm10 = vweird.f32 %v2787_v33  ;;  %v5679_v30 = vld [vmem:[#allocation12 + $0x240] sm:$0xff] }
 0x302   : > { %3726 = vmatmul.bf16.vlgmr.msra.gmra.mxu2 %v3040_v32  ;;  %3796 = vmatpush.bf16.msra.mxu0 %v5678_v19  ;;  %v3034_v36 = vmax.f32 %v3024_v29, 0.0  ;;  %v3035_v38 = vmax.f32 %v3025_v28, 0.0  ;;  %v3042_v6 = vpack.c.bf16 %v3032_v57, %v3032_v57  ;;  %v5671_v19 = vld [vmem:[#allocation12 + $0x200] sm:$0xff] }
 0x303   : > { %3809 = vmatpush.bf16.msra.mxu1 %v5686_v56  ;;  %3739 = vmatmul.bf16.vlgmr.msra.gmra.mxu3 %v3041_v10  ;;  %v3043_v53 = vpack.c.bf16 %v3033_v34, %v3033_v34  ;;  %v5800_v34 = vld [vmem:[#allocation14] ss:$0 sm:$0xff] }
 0x304   : > { %v5818_v31 = vpop.eup %5817  ;;  %v3044_v60 = vpack.c.bf16 %v3034_v36, %v3034_v36  ;;  %v3045_v11 = vpack.c.bf16 %v3035_v38, %v3035_v38 }
 0x305   : > { %v2869_v58 = vmul.f32 %v5818_v31, %v2786_v1  ;;  %vm2875_vm6 = vweird.f32 %v5818_v31 }
 0x306   : > { %3797 = vmatpush.bf16.msra.mxu0 %v5677_v50  ;;  %v5820_v59 = vpop.eup %5819  ;;  %vm7325_vm12 = vmor %vm2874_vm9, %vm2875_vm6 }
 0x307   : > { %3810 = vmatpush.bf16.msra.mxu1 %v5685_v2  ;;  %v2870_v46 = vmul.f32 %v5818_v31, %v2869_v58  ;;  %v2879_v35 = vmul.f32 %v5820_v59, %v2787_v33  ;;  %vm2885_vm11 = vweird.f32 %v5820_v59 }
 0x308   : > { %vm2886_vm13 = vmor %vm2884_vm10, %vm2885_vm11 }
 0x309   : > { %v2871_v12 = vmul.f32 0.5, %v2870_v46  ;;  %v2880_v43 = vmul.f32 %v5820_v59, %v2879_v35 }
 0x30a   : > { %3798 = vmatpush.bf16.msra.mxu0 %v5676_v55 }
 0x30b   : > { %3811 = vmatpush.bf16.msra.mxu1 %v5684_v52  ;;  %v2872_v18 = vsub.f32 1.5, %v2871_v12  ;;  %v2881_v21 = vmul.f32 0.5, %v2880_v43 }
 0x30d   : > { %v2873_v8 = vmul.f32 %v5818_v31, %v2872_v18  ;;  %v2882_v24 = vsub.f32 1.5, %v2881_v21 }
 0x30e   : > { %3799 = vmatpush.bf16.msra.mxu0 %v5675_v48 }
 0x30f   : > { %3812 = vmatpush.bf16.msra.mxu1 %v5683_v40  ;;  %v2883_v62 = vmul.f32 %v5820_v59, %v2882_v24  ;;  %v2877_v26 = vsel %vm7325_vm12, %v5818_v31, %v2873_v8 }
 0x311   : > { %3752 = vmatmul.bf16.vlgmr.msrb.gmra.mxu0 %v3042_v6  ;;  %3765 = vmatmul.bf16.vlgmr.msrb.gmra.mxu1 %v3043_v53  ;;  %v2887_v54 = vsel %vm2886_vm13, %v5820_v59, %v2883_v62 }
 0x312   : > { %3778 = vmatmul.bf16.vlgmr.msrb.gmra.mxu2 %v3044_v60  ;;  %3800 = vmatpush.bf16.msra.mxu0 %v5674_v5  ;;  %v2905_v17 = vrot.slane %v2887_v54, 7 }
 0x313   : > { %3813 = vmatpush.bf16.msra.mxu1 %v5682_v13  ;;  %3791 = vmatmul.bf16.vlgmr.msrb.gmra.mxu3 %v3045_v11 }
 0x314   : > { %v2919_v45 = vsel %vm7399_vm14, %v2877_v26, %v2905_v17 }
 0x315   : > { %v2923_v32 = vmul.f32 %v2919_v45, %v2593_v25 }
 0x316   : > { %3801 = vmatpush.bf16.msra.mxu0 %v5673_v49 }
 0x317   : > { %3814 = vmatpush.bf16.msra.mxu1 %v5681_v51  ;;  %v2934_v56 = vperm.slane %v2923_v32, 0  ;;  %v2935_v10 = vperm.slane %v2923_v32, 1 }
 0x319   : > { %v2954_v47 = vmul.f32 %v2934_v56, %v7294_v0  ;;  %v2955_v14 = vmul.f32 %v2935_v10, %v7307_v9  ;;  %v2994_v50 = vmul.f32 %v2934_v56, %v7066_v37  ;;  %v2995_v7 = vmul.f32 %v2935_v10, %v7077_v42 }
 0x31a   : > { %3802 = vmatpush.bf16.msra.mxu0 %v5672_v61 }
 0x31b   : > { %3815 = vmatpush.bf16.msra.mxu1 %v5680_v63  ;;  %v2973_v15 = vrot.slane %v2955_v14, 7 }
 0x31d   : > { %v2981_v16 = vsel %vm7400_vm15, %v2954_v47, %v2973_v15 }
 0x31e   : > { %3803 = vmatpush.bf16.msra.mxu0 %v5671_v19  ;;  %v2985_v22 = vsub.f32 %v2597_v44, %v2981_v16 }
 0x31f   : > { %3816 = vmatpush.bf16.msra.mxu1 %v5679_v30 }
 0x320   : > { %v3006_v23 = vperm.slane %v2985_v22, 0  ;;  %v3007_v2 = vperm.slane %v2985_v22, 1 }
 0x322   : > { %v3026_v3 = vadd.f32 %v3006_v23, %v2994_v50  ;;  %v3027_v4 = vadd.f32 %v3007_v2, %v2995_v7 }
 0x324   : > { %v3036_v20 = vmax.f32 %v3026_v3, 0.0  ;;  %v3037_v1 = vmax.f32 %v3027_v4, 0.0 }
 0x326   : > { %v3046_v41 = vpack.c.bf16 %v3036_v20, %v3036_v20  ;;  %v3047_v27 = vpack.c.bf16 %v3037_v1, %v3037_v1 }
 0x328   : > { %3804 = vmatmul.bf16.vlgmr.msra.gmra.mxu0 %v3046_v41  ;;  %3817 = vmatmul.bf16.vlgmr.msra.gmra.mxu1 %v3047_v27 }
 0x37e   : > { %v3701_v0 = vpop.f32.mrf.mxu0  ;;  %v3714_v9 = vpop.f32.mrf.mxu1 }
 0x37f   : > { %v3702_v48 = vadd.f32 %v5800_v34, %v3701_v0 }
 0x381   : > { %v3715_v58 = vadd.f32 %v3714_v9, %v3702_v48 }
 0x385   : > { %v3727_v33 = vpop.f32.mrf.mxu2 }
 0x386   : > { %v3703_v55 = vpop.f32.mrf.mxu0  ;;  %v3716_v29 = vpop.f32.mrf.mxu1  ;;  %v3728_v59 = vadd.f32 %v3727_v33, %v3715_v58 }
 0x387   : > { %v3740_v52 = vpop.f32.mrf.mxu3 }
 0x388   : > { %v3741_v53 = vadd.f32 %v3740_v52, %v3728_v59 }
 0x38d   : > { %v3729_v28 = vpop.f32.mrf.mxu2 }
 0x38e   : > { %v3753_v37 = vpop.f32.mrf.mxu0  ;;  %v3766_v57 = vpop.f32.mrf.mxu1 }
 0x38f   : > { %v3742_v42 = vpop.f32.mrf.mxu3  ;;  %v3754_v5 = vadd.f32 %v3753_v37, %v3741_v53 }
 0x391   : > { %v3767_v46 = vadd.f32 %v3766_v57, %v3754_v5 }
 0x395   : > { %v3779_v36 = vpop.f32.mrf.mxu2 }
 0x396   : > { %v3755_v31 = vpop.f32.mrf.mxu0  ;;  %v3768_v40 = vpop.f32.mrf.mxu1  ;;  %v3780_v35 = vadd.f32 %v3779_v36, %v3767_v46 }
 0x397   : > { %v3792_v38 = vpop.f32.mrf.mxu3 }
 0x398   : > { %v3793_v13 = vadd.f32 %v3792_v38, %v3780_v35 }
 0x39d   : > { %v3781_v6 = vpop.f32.mrf.mxu2 }
 0x39f   : > { %v3794_v60 = vpop.f32.mrf.mxu3 }
 0x3a5   : > { %v3805_v11 = vpop.f32.mrf.mxu0  ;;  %v3818_v12 = vpop.f32.mrf.mxu1 }
 0x3a6   : > { %v3806_v43 = vadd.f32 %v3805_v11, %v3793_v13 }
 0x3a8   : > { %v3819_v49 = vadd.f32 %v3818_v12, %v3806_v43 }
 0x3aa   : > { %3822 = vst [vmem:[#allocation15] sm:$0xff] %v3819_v49 }
 0x3ad   : > { %v3807_v18 = vpop.f32.mrf.mxu0  ;;  %v3820_v21 = vpop.f32.mrf.mxu1 }
 0x3ae PF: > { %p5750_p4 = scmp.eq.s32.totalorder %s6186_s28, 4  ;;  %s6126_s29 = smov [#allocation15]  }
 0x3af   : > { %s3829_s22 = sshll.u32 %s6126_s29, 4  ;;  %s3831_s5 = sshll.u32 %s7361_s7, 4  ;;  %s3830_s22 = int_to_ptr.vmem [resolvable:$true] %s3829_s22  ;;  %s3832_s5 = int_to_ptr.hbm [resolvable:$true] %s3831_s5 }
 0x3b0   : > { %5715 = dma.vmem_to_hbm [thread:$0]  (%p5750_p4), %s3830_s22, 128, %s3832_s5, [#allocation5]  }
 0x3b1   : > { %6096 = dma.done.wait (%p5750_p4), [#allocation5], 128  }
 0x3b2   : > { %6098 = vsyncadd (%p5750_p4), [#allocation5], 4294967168 }
 0x3b3 PF: > { %s7401_s16 = sld [smem:[#allocation22_spill]]  ;;  %p23_p5 = scmp.ge.s32.totalorder %s6222_s21, 7  }
 0x3b4   : > { %s7402_s24 = smov %s6105_s25  ;;  %s7403_s25 = smov %s6109_s26 }
 0x3b5   : > { %s7405_s27 = smov %s6222_s21  ;;  %25 = sbr.rel (!%p23_p5) target bundleno = 12 (0xc), region = 138 }
 0x3b9   : > { %s7404_s26 = smov %s7401_s16 }
 0x3ba   :  { %3845 = vsyncpa [#allocation4], 1 }
 0x3bb   :  { %3847 = vsyncpa [#allocation4 + $0x1], 1 }
 0x3bc   :  { %3848 = vsyncpa [#allocation7], 1 }
 0x3bd   :  { %3850 = vsyncpa [#allocation7 + $0x1], 1 }
 0x3be   :  { %3851 = vsyncpa [#allocation10], 1 }
 0x3bf   :  { %3853 = vsyncpa [#allocation10 + $0x1], 1 }
 0x3c0   :  { %3854 = vsyncpa [#allocation13], 1 }
 0x3c1   :  { %3855 = vsyncpa [#allocation5], 1 }
 0x3c2   :  { %3857 = vsyncpa [#allocation5 + $0x1], 1 }

</bundles_post_ra>
